<compile_context>
chip_gen: v7x
topology: tpu7x:2x2x1
jax: 0.10.0
libtpu: 0.0.40
codegen_flags: <defaults>
</compile_context>

<pallas_src>
import jax
import jax.numpy as jnp
from jax.experimental import pallas as pl
from jax.experimental.pallas import tpu as pltpu


def _se_gate_mul_kernel(x_ref, w_ref, b_ref, y_ref, o_ref):
    # x_ref : (C_in, 1)       -- squeezed 1x1 conv input as a column
    # w_ref : (TILE_N, C_in)  -- native conv weight slice (no transpose)
    # b_ref : (TILE_N, 1)     -- bias column slice
    # y_ref : (TILE_N, HW)    -- feature-map slice, channels on sublanes
    # o_ref : (TILE_N, HW)
    #
    # 1x1 conv for this channel tile on the MXU (degenerate N=1 matmul,
    # f32 accumulation); the MXU slot is otherwise idle so this hides
    # entirely under the per-step DMA.
    logits = jnp.dot(w_ref[...], x_ref[...],
                     preferred_element_type=jnp.float32) + b_ref[...]
    gate = jax.nn.sigmoid(logits)            # (TILE_N, 1), f32
    # Gate broadcasts along the lane (H*W) dimension.
    o_ref[...] = y_ref[...] * gate


def _pick_num_tiles(c_out):
    # Exactly 2 grid steps when possible: one step per TensorCore on v7x and
    # enough to overlap input fetch with output writeback on single-TC
    # v5e/v6e, while keeping the ~0.35us/step fixed overhead minimal for this
    # tiny, HBM-bound op.
    for nt in (2, 1):
        if c_out % nt == 0 and (c_out // nt) % 8 == 0:
            return nt
    return 1


@jax.jit
def se_gate_mul(x824, x821, weight, bias):
    """x824: (1, C_in, 1, 1) NCHW; x821: (1, C_out, H, W) NCHW.
    weight: (C_out, C_in, 1, 1); bias: (C_out,). Returns (1, C_out, H, W)."""
    n, c_in, _, _ = x824.shape
    _, c_out, h, w = x821.shape
    assert n == 1
    hw = h * w

    num_tiles = _pick_num_tiles(c_out)
    tile_n = c_out // num_tiles

    # All reshapes below are free (row-major bitcasts) under jit -- no
    # transposes anywhere in the wrapper.
    x_col = x824.reshape(c_in, 1).astype(jnp.float32)        # (C_in, 1)
    w2d = weight.reshape(c_out, c_in).astype(jnp.float32)    # native (C_out, C_in)
    b_col = bias.reshape(c_out, 1).astype(jnp.float32)       # (C_out, 1)
    y = x821.reshape(c_out, hw).astype(jnp.float32)          # (C_out, HW), free

    out = pl.pallas_call(
        _se_gate_mul_kernel,
        out_shape=jax.ShapeDtypeStruct((c_out, hw), jnp.float32),
        grid_spec=pltpu.PrefetchScalarGridSpec(
            num_scalar_prefetch=0,
            grid=(num_tiles,),
            in_specs=[
                pl.BlockSpec((c_in, 1), lambda i: (0, 0)),        # x (tiny, re-read)
                pl.BlockSpec((tile_n, c_in), lambda i: (i, 0)),   # weight: one pass
                pl.BlockSpec((tile_n, 1), lambda i: (i, 0)),      # bias slice
                pl.BlockSpec((tile_n, hw), lambda i: (i, 0)),     # feature map slice
            ],
            out_specs=pl.BlockSpec((tile_n, hw), lambda i: (i, 0)),
        ),
        compiler_params=pltpu.CompilerParams(
            dimension_semantics=("parallel",)),
        # NOTE(perf): when the caller does NOT reuse x821 afterwards, add
        #   input_output_aliases={3: 0}
        # here and donate x821 at the jit boundary to gate the feature map in
        # place (saves the ~441 KiB output allocation).  Left off because the
        # self-test below reuses x821 for the reference check.
    )(x_col, w2d, b_col, y)

    # Free reshape back to NCHW.
    return out.reshape(1, c_out, h, w)


if __name__ == "__main__":
    # Shapes taken directly from the PyTorch module (already small).
    C_IN, C_OUT, H, W = 96, 2304, 7, 7

    key = jax.random.PRNGKey(0)
    k1, k2, k3, k4 = jax.random.split(key, 4)
    x824 = jax.random.normal(k1, (1, C_IN, 1, 1), dtype=jnp.float32)
    x821 = jax.random.normal(k2, (1, C_OUT, H, W), dtype=jnp.float32)
    # Deterministic synthetic conv parameters (Conv2d(96, 2304, 1x1) shapes).
    weight = jax.random.normal(k3, (C_OUT, C_IN, 1, 1), dtype=jnp.float32) * 0.05
    bias = jax.random.normal(k4, (C_OUT,), dtype=jnp.float32) * 0.05

    # Pure-JAX f32 reference.  The kernel uses an MXU dot (different
    # accumulation order than this sum), but for K=96 in f32 the difference
    # is far below the 1e-5 test tolerance.
    logits_ref = (jnp.sum(weight.reshape(C_OUT, C_IN) * x824.reshape(1, C_IN),
                          axis=1, keepdims=True)
                  + bias.reshape(C_OUT, 1))
    gate_ref = jax.nn.sigmoid(logits_ref).reshape(1, C_OUT, 1, 1)
    ref = gate_ref * x821

    out = se_gate_mul(x824, x821, weight, bias)
    out = jax.block_until_ready(out)

    assert out.shape == (1, C_OUT, H, W)
    assert jnp.allclose(out, ref, atol=1e-5, rtol=1e-5)

    print("KERNEL_OK")
</pallas_src>

<mosaic_0001>
module attributes {stable_mosaic.version = 11 : i64} {
  func.func @_se_gate_mul_kernel(%arg0: i32, %arg1: memref<96x1xf32, #tpu.memory_space<vmem>>, %arg2: memref<1152x96xf32, #tpu.memory_space<vmem>>, %arg3: memref<1152x1xf32, #tpu.memory_space<vmem>>, %arg4: memref<1152x49xf32, #tpu.memory_space<vmem>>, %arg5: memref<1152x49xf32, #tpu.memory_space<vmem>>) attributes {dimension_semantics = [#tpu.dimension_semantics<parallel>], iteration_bounds = array<i64: 2>, scalar_prefetch = 0 : i64, scratch_operands = 0 : i64, tpu.core_type = #tpu.core_type<tc>, window_params = [{pipeline_mode = #tpu.pipeline_mode<synchronous>, transform_indices = @transform_0, window_bounds = array<i64: 96, 1>}, {transform_indices = @transform_1, window_bounds = array<i64: 1152, 96>}, {transform_indices = @transform_2, window_bounds = array<i64: 1152, 1>}, {transform_indices = @transform_3, window_bounds = array<i64: 1152, 49>}, {transform_indices = @transform_4, window_bounds = array<i64: 1152, 49>}]} {
    %c0 = arith.constant 0 : index
    %c0_0 = arith.constant 0 : index
    %0 = vector.load %arg2[%c0, %c0_0] : memref<1152x96xf32, #tpu.memory_space<vmem>>, vector<1152x96xf32>
    %c0_1 = arith.constant 0 : index
    %c0_2 = arith.constant 0 : index
    %1 = vector.load %arg1[%c0_1, %c0_2] : memref<96x1xf32, #tpu.memory_space<vmem>>, vector<96x1xf32>
    %cst = arith.constant dense<0.000000e+00> : vector<1152x1xf32>
    %2 = tpu.matmul %0, %1, %cst {dimension_numbers = #tpu.dot_dimension_numbers<[1], [0], [0], [1], [0, 0, 1, 1], [], []>} : vector<1152x96xf32>, vector<96x1xf32>, vector<1152x1xf32> -> vector<1152x1xf32>
    %c0_3 = arith.constant 0 : index
    %c0_4 = arith.constant 0 : index
    %3 = vector.load %arg3[%c0_3, %c0_4] : memref<1152x1xf32, #tpu.memory_space<vmem>>, vector<1152x1xf32>
    %4 = arith.addf %2, %3 : vector<1152x1xf32>
    %5 = arith.negf %4 : vector<1152x1xf32>
    %6 = math.exp %5 : vector<1152x1xf32>
    %cst_5 = arith.constant 1.000000e+00 : f32
    %7 = vector.broadcast %cst_5 : f32 to vector<1152x1xf32>
    %8 = arith.addf %7, %6 : vector<1152x1xf32>
    %9 = arith.divf %7, %8 : vector<1152x1xf32>
    %c0_6 = arith.constant 0 : index
    %c0_7 = arith.constant 0 : index
    %10 = vector.load %arg4[%c0_6, %c0_7] : memref<1152x49xf32, #tpu.memory_space<vmem>>, vector<1152x49xf32>
    %11 = vector.broadcast %9 : vector<1152x1xf32> to vector<1152x49xf32>
    %12 = arith.mulf %10, %11 : vector<1152x49xf32>
    %c0_8 = arith.constant 0 : index
    %c0_9 = arith.constant 0 : index
    %13 = vector.load %arg5[%c0_8, %c0_9] : memref<1152x49xf32, #tpu.memory_space<vmem>>, vector<1152x49xf32>
    tpu.vector_store %arg5[%c0_8, %c0_9], %12 {strides = array<i32>} : memref<1152x49xf32, #tpu.memory_space<vmem>>, vector<1152x49xf32>,
    return
  }
  func.func @transform_0(%arg0: i32) -> (i32, i32) {
    %c0_i32 = arith.constant 0 : i32
    %c0_i32_0 = arith.constant 0 : i32
    %c0_i32_1 = arith.constant 0 : i32
    return %c0_i32, %c0_i32_0 : i32, i32
  }
  func.func @transform_1(%arg0: i32) -> (i32, i32) {
    %c0_i32 = arith.constant 0 : i32
    %c0_i32_0 = arith.constant 0 : i32
    return %arg0, %c0_i32 : i32, i32
  }
  func.func @transform_2(%arg0: i32) -> (i32, i32) {
    %c0_i32 = arith.constant 0 : i32
    %c0_i32_0 = arith.constant 0 : i32
    return %arg0, %c0_i32 : i32, i32
  }
  func.func @transform_3(%arg0: i32) -> (i32, i32) {
    %c0_i32 = arith.constant 0 : i32
    %c0_i32_0 = arith.constant 0 : i32
    return %arg0, %c0_i32 : i32, i32
  }
  func.func @transform_4(%arg0: i32) -> (i32, i32) {
    %c0_i32 = arith.constant 0 : i32
    %c0_i32_0 = arith.constant 0 : i32
    return %arg0, %c0_i32 : i32, i32
  }
}

</mosaic_0001>

<bundles_post_ra>
// kernel: se_gate_mul.1
= control target key start
LH: loop header
LB: loop body
LE: loop exit
PB: predicated region body
PF: predicated region fallthrough
CT: control target
= control target key end

     0   :  { %s5212_s15 = smov 0   ;;  %s6578_s0 = inlined_call_operand.vmem [shape: f32[96,1], index: 0, kind: input, shape index: {}]   ;;  %s6579_s1 = inlined_call_operand.vmem [shape: f32[2304,96], index: 1, kind: input, shape index: {}]   ;;  %s6580_s2 = inlined_call_operand.vmem [shape: f32[2304,1], index: 2, kind: input, shape index: {}]   ;;  %s6581_s3 = inlined_call_operand.vmem [shape: f32[2304,49], index: 3, kind: input, shape index: {}]   ;;  %s6582_s4 = inlined_call_operand.vmem [shape: f32[2304,49], index: 4, kind: output, shape index: {}]  }
   0x1 LB: > { %s3860_s16 = sadd.s32 4294967295, %s5184_s15   ;;  %p3864_p0 = scmp.ge.s32.totalorder %s5184_s15, 1  ;;  %s5184_s15 = sphi %s5212_s15, %s14_s15  }
   0x2   : > { %p185_p1 = scmp.lt.s32.totalorder %s5184_s15, 3 }
   0x4   : > { %p186_p2 = pnand %p3864_p0, %p185_p1 }
   0x6   : > { %189 = sbr.rel (%p186_p2) target bundleno = 698 (0x2ba), region = 36 }
   0xd   : > { %v389_v0 = vld [vmem:[%s6578_s0] sm:$0xff]  ;;  %v390_v1 = vld [vmem:[%s6578_s0 + $0x8] sm:$0xff]  ;;  %v391_v2 = vld [vmem:[%s6578_s0 + $0x10] sm:$0xff]  ;;  %s221_s23 = smul.u32 144, %s3860_s16  ;;  %vm545_vm0 = vcmask 785408   ;;  %vm3635_vm1 = vcmask 400384  }
   0xe   : > { %v4555_v3 = vpack.c.bf16 %v390_v1, %v389_v0  ;;  %v392_v4 = vld [vmem:[%s6578_s0 + $0x18] sm:$0xff]  ;;  %v393_v6 = vld [vmem:[%s6578_s0 + $0x20] sm:$0xff]  ;;  %v394_v7 = vld [vmem:[%s6578_s0 + $0x28] sm:$0xff] }
   0xf   : > { %v4559_v5 = vpack.c.bf16 %v392_v4, %v391_v2  ;;  %p222_p3 = scmp.lt.s32.totalorder %s221_s23, 287  ;;  %v4563_v8 = vpack.c.bf16 %v394_v7, %v393_v6  ;;  %v395_v9 = vld [vmem:[%s6578_s0 + $0x30] sm:$0xff]  ;;  %v396_v10 = vld [vmem:[%s6578_s0 + $0x38] sm:$0xff]  ;;  %v397_v14 = vld [vmem:[%s6578_s0 + $0x40] sm:$0xff] }
  0x10   : > { %4556 = vmatprep.subr.bf16.mxu0 %v4555_v3  ;;  %4579 = vmatprep.subr.bf16.mxu1 %v4555_v3  ;;  %v4567_v13 = vpack.c.bf16 %v396_v10, %v395_v9  ;;  %v398_v15 = vld [vmem:[%s6578_s0 + $0x48] sm:$0xff]  ;;  %v399_v17 = vld [vmem:[%s6578_s0 + $0x50] sm:$0xff]  ;;  %v400_v18 = vld [vmem:[%s6578_s0 + $0x58] sm:$0xff] }
  0x11   : > { %4558 = vmatpush3.bf16.msra.mxu0 %v4555_v3  ;;  %4585 = vmatpush3.bf16.msra.mxu1 %v4555_v3  ;;  %s6630_s23 = smov (!%p222_p3, %s221_s23), 287  ;;  %v4571_v16 = vpack.c.bf16 %v398_v15, %v397_v14  ;;  %v4575_v19 = vpack.c.bf16 %v400_v18, %v399_v17 }
  0x12   : > { %4560 = vmatprep.subr.bf16.mxu0 %v4559_v5  ;;  %4580 = vmatprep.subr.bf16.mxu1 %v4559_v5  ;;  %s5244_s8 = sshll.u32 %s6630_s23, 3 }
  0x13   : > { %s5250_s11 = scalar_lea.vmem %s6579_s1, %s5244_s8  ;;  %s5556_s23 = scalar_lea.vmem %s6580_s2, %s5244_s8 }
  0x14   : > { %v245_v11 = vld [vmem:[%s5250_s11] sm:$0xff]  ;;  %v246_v20 = vld [vmem:[%s5250_s11 + $0x8] sm:$0xff]  ;;  %v247_v22 = vld [vmem:[%s5250_s11 + $0x10] sm:$0xff]  ;;  %s5955_s26 = scalar_lea.vmem %s6581_s3, %s5244_s8  ;;  %s5973_s29 = scalar_lea.vmem %s6582_s4, %s5244_s8 }
  0x15   : > { %4562 = vmatpush3.bf16.msra.mxu0 %v4559_v5  ;;  %4586 = vmatpush3.bf16.msra.mxu1 %v4559_v5  ;;  %v317_v12 = vld [vmem:[%s5250_s11 + $0x240] sm:$0xff]  ;;  %v318_v21 = vld [vmem:[%s5250_s11 + $0x248] sm:$0xff]  ;;  %v319_v23 = vld [vmem:[%s5250_s11 + $0x250] sm:$0xff] }
  0x16   : > { %4564 = vmatprep.subr.bf16.mxu0 %v4563_v8  ;;  %4581 = vmatprep.subr.bf16.mxu1 %v4563_v8  ;;  %v248_v24 = vld [vmem:[%s5250_s11 + $0x18] sm:$0xff]  ;;  %v249_v26 = vld [vmem:[%s5250_s11 + $0x20] sm:$0xff]  ;;  %v250_v28 = vld [vmem:[%s5250_s11 + $0x28] sm:$0xff] }
  0x17   : > { %4339 = vmatprep.mubr.msk.f32.mxu0 %vm545_vm0, %v245_v11  ;;  %4447 = vmatprep.mubr.msk.f32.mxu1 %vm545_vm0, %v317_v12  ;;  %v320_v25 = vld [vmem:[%s5250_s11 + $0x258] sm:$0xff]  ;;  %v321_v27 = vld [vmem:[%s5250_s11 + $0x260] sm:$0xff]  ;;  %v322_v29 = vld [vmem:[%s5250_s11 + $0x268] sm:$0xff] }
  0x18   : > { %v251_v30 = vld [vmem:[%s5250_s11 + $0x30] sm:$0xff]  ;;  %v252_v32 = vld [vmem:[%s5250_s11 + $0x38] sm:$0xff]  ;;  %v253_v34 = vld [vmem:[%s5250_s11 + $0x40] sm:$0xff] }
  0x19   : > { %4566 = vmatpush3.bf16.msra.mxu0 %v4563_v8  ;;  %4587 = vmatpush3.bf16.msra.mxu1 %v4563_v8  ;;  %v323_v31 = vld [vmem:[%s5250_s11 + $0x270] sm:$0xff]  ;;  %v324_v33 = vld [vmem:[%s5250_s11 + $0x278] sm:$0xff]  ;;  %v325_v35 = vld [vmem:[%s5250_s11 + $0x280] sm:$0xff] }
  0x1a   : > { %4568 = vmatprep.subr.bf16.mxu0 %v4567_v13  ;;  %4582 = vmatprep.subr.bf16.mxu1 %v4567_v13  ;;  %v254_v36 = vld [vmem:[%s5250_s11 + $0x48] sm:$0xff]  ;;  %v255_v38 = vld [vmem:[%s5250_s11 + $0x50] sm:$0xff]  ;;  %v256_v40 = vld [vmem:[%s5250_s11 + $0x58] sm:$0xff] }
  0x1b   : > { %v326_v37 = vld [vmem:[%s5250_s11 + $0x288] sm:$0xff]  ;;  %v327_v39 = vld [vmem:[%s5250_s11 + $0x290] sm:$0xff]  ;;  %v328_v41 = vld [vmem:[%s5250_s11 + $0x298] sm:$0xff] }
  0x1c   : > { %v257_v42 = vld [vmem:[%s5250_s11 + $0x60] sm:$0xff]  ;;  %v258_v44 = vld [vmem:[%s5250_s11 + $0x68] sm:$0xff]  ;;  %v259_v46 = vld [vmem:[%s5250_s11 + $0x70] sm:$0xff] }
  0x1d   : > { %4570 = vmatpush3.bf16.msra.mxu0 %v4567_v13  ;;  %4588 = vmatpush3.bf16.msra.mxu1 %v4567_v13  ;;  %v329_v43 = vld [vmem:[%s5250_s11 + $0x2a0] sm:$0xff]  ;;  %v330_v45 = vld [vmem:[%s5250_s11 + $0x2a8] sm:$0xff]  ;;  %v331_v47 = vld [vmem:[%s5250_s11 + $0x2b0] sm:$0xff] }
  0x1e   : > { %4572 = vmatprep.subr.bf16.mxu0 %v4571_v16  ;;  %4583 = vmatprep.subr.bf16.mxu1 %v4571_v16  ;;  %v260_v48 = vld [vmem:[%s5250_s11 + $0x78] sm:$0xff]  ;;  %v261_v50 = vld [vmem:[%s5250_s11 + $0x80] sm:$0xff]  ;;  %v262_v52 = vld [vmem:[%s5250_s11 + $0x88] sm:$0xff] }
  0x1f   : > { %v332_v49 = vld [vmem:[%s5250_s11 + $0x2b8] sm:$0xff]  ;;  %v333_v51 = vld [vmem:[%s5250_s11 + $0x2c0] sm:$0xff]  ;;  %v334_v53 = vld [vmem:[%s5250_s11 + $0x2c8] sm:$0xff] }
  0x20   : > { %v263_v54 = vld [vmem:[%s5250_s11 + $0x90] sm:$0xff]  ;;  %v264_v56 = vld [vmem:[%s5250_s11 + $0x98] sm:$0xff]  ;;  %v265_v58 = vld [vmem:[%s5250_s11 + $0xa0] sm:$0xff] }
  0x21   : > { %4574 = vmatpush3.bf16.msra.mxu0 %v4571_v16  ;;  %4589 = vmatpush3.bf16.msra.mxu1 %v4571_v16  ;;  %v335_v55 = vld [vmem:[%s5250_s11 + $0x2d0] sm:$0xff]  ;;  %v336_v57 = vld [vmem:[%s5250_s11 + $0x2d8] sm:$0xff]  ;;  %v337_v59 = vld [vmem:[%s5250_s11 + $0x2e0] sm:$0xff] }
  0x22   : > { %4576 = vmatprep.subr.bf16.mxu0 %v4575_v19  ;;  %4584 = vmatprep.subr.bf16.mxu1 %v4575_v19  ;;  %v266_v60 = vld [vmem:[%s5250_s11 + $0xa8] sm:$0xff]  ;;  %v267_v62 = vld [vmem:[%s5250_s11 + $0xb0] sm:$0xff]  ;;  %v268_v0 = vld [vmem:[%s5250_s11 + $0xb8] sm:$0xff] }
  0x23   : > { %v338_v61 = vld [vmem:[%s5250_s11 + $0x2e8] sm:$0xff]  ;;  %v339_v63 = vld [vmem:[%s5250_s11 + $0x2f0] sm:$0xff]  ;;  %v340_v1 = vld [vmem:[%s5250_s11 + $0x2f8] sm:$0xff] }
  0x24   : > { %v269_v2 = vld [vmem:[%s5250_s11 + $0xc0] sm:$0xff]  ;;  %v270_v4 = vld [vmem:[%s5250_s11 + $0xc8] sm:$0xff]  ;;  %v271_v6 = vld [vmem:[%s5250_s11 + $0xd0] sm:$0xff] }
  0x25   : > { %4578 = vmatpush3.bf16.msra.mxu0 %v4575_v19  ;;  %4590 = vmatpush3.bf16.msra.mxu1 %v4575_v19  ;;  %v341_v3 = vld [vmem:[%s5250_s11 + $0x300] sm:$0xff]  ;;  %v342_v5 = vld [vmem:[%s5250_s11 + $0x308] sm:$0xff]  ;;  %v343_v7 = vld [vmem:[%s5250_s11 + $0x310] sm:$0xff] }
  0x26   : > { %v272_v8 = vld [vmem:[%s5250_s11 + $0xd8] sm:$0xff]  ;;  %v273_v10 = vld [vmem:[%s5250_s11 + $0xe0] sm:$0xff]  ;;  %v274_v12 = vld [vmem:[%s5250_s11 + $0xe8] sm:$0xff] }
  0x27   : > { %v344_v9 = vld [vmem:[%s5250_s11 + $0x318] sm:$0xff]  ;;  %v345_v11 = vld [vmem:[%s5250_s11 + $0x320] sm:$0xff]  ;;  %v346_v13 = vld [vmem:[%s5250_s11 + $0x328] sm:$0xff] }
  0x28   : > { %4340 = vmatmul.mubr.msk.f32.vlgmr.msra.gmra.mrb[0].mxu0 %vm545_vm0, %v246_v20  ;;  %4448 = vmatmul.mubr.msk.f32.vlgmr.msra.gmra.mrb[0].mxu1 %vm545_vm0, %v318_v21  ;;  %v275_v14 = vld [vmem:[%s5250_s11 + $0xf0] sm:$0xff]  ;;  %v276_v16 = vld [vmem:[%s5250_s11 + $0xf8] sm:$0xff]  ;;  %v277_v18 = vld [vmem:[%s5250_s11 + $0x100] sm:$0xff] }
  0x29   : > { %4342 = vmatprep.mubr.msk.f32.mxu0 %vm545_vm0, %v247_v22  ;;  %4450 = vmatprep.mubr.msk.f32.mxu1 %vm545_vm0, %v319_v23  ;;  %v347_v15 = vld [vmem:[%s5250_s11 + $0x330] sm:$0xff]  ;;  %v348_v17 = vld [vmem:[%s5250_s11 + $0x338] sm:$0xff]  ;;  %v349_v19 = vld [vmem:[%s5250_s11 + $0x340] sm:$0xff] }
  0x2a   : > { %v278_v20 = vld [vmem:[%s5250_s11 + $0x108] sm:$0xff]  ;;  %v279_v22 = vld [vmem:[%s5250_s11 + $0x110] sm:$0xff] }
  0x2b   : > { %v350_v21 = vld [vmem:[%s5250_s11 + $0x348] sm:$0xff]  ;;  %v351_v23 = vld [vmem:[%s5250_s11 + $0x350] sm:$0xff] }
  0x2c   : > { %4343 = vmatmul.mubr.msk.f32.gmra.mrb[2].mxu0 %vm545_vm0, %v248_v24  ;;  %4451 = vmatmul.mubr.msk.f32.gmra.mrb[2].mxu1 %vm545_vm0, %v320_v25  ;;  %v280_v24 = vld [vmem:[%s5250_s11 + $0x118] sm:$0xff] }
  0x2d   : > { %4345 = vmatprep.mubr.msk.f32.mxu0 %vm545_vm0, %v249_v26  ;;  %4453 = vmatprep.mubr.msk.f32.mxu1 %vm545_vm0, %v321_v27  ;;  %v352_v25 = vld [vmem:[%s5250_s11 + $0x358] sm:$0xff]  ;;  %v281_v26 = vld [vmem:[%s5250_s11 + $0x120] sm:$0xff] }
  0x2e   : > { %v353_v27 = vld [vmem:[%s5250_s11 + $0x360] sm:$0xff] }
  0x30   : > { %4346 = vmatmul.mubr.msk.f32.gmra.mrb[4].mxu0 %vm545_vm0, %v250_v28  ;;  %4454 = vmatmul.mubr.msk.f32.gmra.mrb[4].mxu1 %vm545_vm0, %v322_v29  ;;  %v282_v28 = vld [vmem:[%s5250_s11 + $0x128] sm:$0xff] }
  0x31   : > { %4348 = vmatprep.mubr.msk.f32.mxu0 %vm545_vm0, %v251_v30  ;;  %4456 = vmatprep.mubr.msk.f32.mxu1 %vm545_vm0, %v323_v31  ;;  %v354_v29 = vld [vmem:[%s5250_s11 + $0x368] sm:$0xff]  ;;  %v283_v30 = vld [vmem:[%s5250_s11 + $0x130] sm:$0xff] }
  0x32   : > { %v355_v31 = vld [vmem:[%s5250_s11 + $0x370] sm:$0xff] }
  0x34   : > { %4349 = vmatmul.mubr.msk.f32.gmra.mrb[6].mxu0 %vm545_vm0, %v252_v32  ;;  %4457 = vmatmul.mubr.msk.f32.gmra.mrb[6].mxu1 %vm545_vm0, %v324_v33  ;;  %v284_v32 = vld [vmem:[%s5250_s11 + $0x138] sm:$0xff] }
  0x35   : > { %4351 = vmatprep.mubr.msk.f32.mxu0 %vm545_vm0, %v253_v34  ;;  %4459 = vmatprep.mubr.msk.f32.mxu1 %vm545_vm0, %v325_v35  ;;  %v356_v33 = vld [vmem:[%s5250_s11 + $0x378] sm:$0xff]  ;;  %v285_v34 = vld [vmem:[%s5250_s11 + $0x140] sm:$0xff] }
  0x36   : > { %v357_v35 = vld [vmem:[%s5250_s11 + $0x380] sm:$0xff] }
  0x38   : > { %4352 = vmatmul.mubr.msk.f32.gmra.mrb[8].mxu0 %vm545_vm0, %v254_v36  ;;  %4460 = vmatmul.mubr.msk.f32.gmra.mrb[8].mxu1 %vm545_vm0, %v326_v37  ;;  %v286_v36 = vld [vmem:[%s5250_s11 + $0x148] sm:$0xff] }
  0x39   : > { %4354 = vmatprep.mubr.msk.f32.mxu0 %vm545_vm0, %v255_v38  ;;  %4462 = vmatprep.mubr.msk.f32.mxu1 %vm545_vm0, %v327_v39  ;;  %v358_v37 = vld [vmem:[%s5250_s11 + $0x388] sm:$0xff]  ;;  %v287_v38 = vld [vmem:[%s5250_s11 + $0x150] sm:$0xff] }
  0x3a   : > { %v359_v39 = vld [vmem:[%s5250_s11 + $0x390] sm:$0xff] }
  0x3c   : > { %4355 = vmatmul.mubr.msk.f32.gmra.mrb[10].mxu0 %vm545_vm0, %v256_v40  ;;  %4463 = vmatmul.mubr.msk.f32.gmra.mrb[10].mxu1 %vm545_vm0, %v328_v41  ;;  %v288_v40 = vld [vmem:[%s5250_s11 + $0x158] sm:$0xff] }
  0x3d   : > { %4357 = vmatprep.mubr.msk.f32.mxu0 %vm545_vm0, %v257_v42  ;;  %4465 = vmatprep.mubr.msk.f32.mxu1 %vm545_vm0, %v329_v43  ;;  %v360_v41 = vld [vmem:[%s5250_s11 + $0x398] sm:$0xff]  ;;  %v289_v42 = vld [vmem:[%s5250_s11 + $0x160] sm:$0xff] }
  0x3e   : > { %v361_v43 = vld [vmem:[%s5250_s11 + $0x3a0] sm:$0xff] }
  0x40   : > { %4358 = vmatmul.mubr.msk.f32.gmra.mrb[12].mxu0 %vm545_vm0, %v258_v44  ;;  %4466 = vmatmul.mubr.msk.f32.gmra.mrb[12].mxu1 %vm545_vm0, %v330_v45  ;;  %v290_v44 = vld [vmem:[%s5250_s11 + $0x168] sm:$0xff] }
  0x41   : > { %4360 = vmatprep.mubr.msk.f32.mxu0 %vm545_vm0, %v259_v46  ;;  %4468 = vmatprep.mubr.msk.f32.mxu1 %vm545_vm0, %v331_v47  ;;  %v362_v45 = vld [vmem:[%s5250_s11 + $0x3a8] sm:$0xff]  ;;  %v291_v46 = vld [vmem:[%s5250_s11 + $0x170] sm:$0xff] }
  0x42   : > { %v363_v47 = vld [vmem:[%s5250_s11 + $0x3b0] sm:$0xff] }
  0x44   : > { %4361 = vmatmul.mubr.msk.f32.gmra.mrb[14].mxu0 %vm545_vm0, %v260_v48  ;;  %4469 = vmatmul.mubr.msk.f32.gmra.mrb[14].mxu1 %vm545_vm0, %v332_v49  ;;  %v292_v48 = vld [vmem:[%s5250_s11 + $0x178] sm:$0xff] }
  0x45   : > { %4363 = vmatprep.mubr.msk.f32.mxu0 %vm545_vm0, %v261_v50  ;;  %4471 = vmatprep.mubr.msk.f32.mxu1 %vm545_vm0, %v333_v51  ;;  %v364_v49 = vld [vmem:[%s5250_s11 + $0x3b8] sm:$0xff]  ;;  %v293_v50 = vld [vmem:[%s5250_s11 + $0x180] sm:$0xff] }
  0x46   : > { %v365_v51 = vld [vmem:[%s5250_s11 + $0x3c0] sm:$0xff] }
  0x48   : > { %4364 = vmatmul.mubr.msk.f32.gmra.mrb[16].mxu0 %vm545_vm0, %v262_v52  ;;  %4472 = vmatmul.mubr.msk.f32.gmra.mrb[16].mxu1 %vm545_vm0, %v334_v53  ;;  %v294_v52 = vld [vmem:[%s5250_s11 + $0x188] sm:$0xff] }
  0x49   : > { %4366 = vmatprep.mubr.msk.f32.mxu0 %vm545_vm0, %v263_v54  ;;  %4474 = vmatprep.mubr.msk.f32.mxu1 %vm545_vm0, %v335_v55  ;;  %v366_v53 = vld [vmem:[%s5250_s11 + $0x3c8] sm:$0xff]  ;;  %v295_v54 = vld [vmem:[%s5250_s11 + $0x190] sm:$0xff] }
  0x4a   : > { %v367_v55 = vld [vmem:[%s5250_s11 + $0x3d0] sm:$0xff] }
  0x4c   : > { %4367 = vmatmul.mubr.msk.f32.gmra.mrb[18].mxu0 %vm545_vm0, %v264_v56  ;;  %4475 = vmatmul.mubr.msk.f32.gmra.mrb[18].mxu1 %vm545_vm0, %v336_v57  ;;  %v296_v56 = vld [vmem:[%s5250_s11 + $0x198] sm:$0xff] }
  0x4d   : > { %4369 = vmatprep.mubr.msk.f32.mxu0 %vm545_vm0, %v265_v58  ;;  %4477 = vmatprep.mubr.msk.f32.mxu1 %vm545_vm0, %v337_v59  ;;  %v368_v57 = vld [vmem:[%s5250_s11 + $0x3d8] sm:$0xff]  ;;  %v297_v58 = vld [vmem:[%s5250_s11 + $0x1a0] sm:$0xff] }
  0x4e   : > { %v369_v59 = vld [vmem:[%s5250_s11 + $0x3e0] sm:$0xff] }
  0x50   : > { %4370 = vmatmul.mubr.msk.f32.gmra.mrb[20].mxu0 %vm545_vm0, %v266_v60  ;;  %4478 = vmatmul.mubr.msk.f32.gmra.mrb[20].mxu1 %vm545_vm0, %v338_v61  ;;  %v298_v60 = vld [vmem:[%s5250_s11 + $0x1a8] sm:$0xff] }
  0x51   : > { %4372 = vmatprep.mubr.msk.f32.mxu0 %vm545_vm0, %v267_v62  ;;  %4480 = vmatprep.mubr.msk.f32.mxu1 %vm545_vm0, %v339_v63  ;;  %v370_v61 = vld [vmem:[%s5250_s11 + $0x3e8] sm:$0xff]  ;;  %v299_v62 = vld [vmem:[%s5250_s11 + $0x1b0] sm:$0xff] }
  0x52   : > { %v371_v63 = vld [vmem:[%s5250_s11 + $0x3f0] sm:$0xff] }
  0x54   : > { %4373 = vmatmul.mubr.msk.f32.gmra.mrb[22].mxu0 %vm545_vm0, %v268_v0  ;;  %4481 = vmatmul.mubr.msk.f32.gmra.mrb[22].mxu1 %vm545_vm0, %v340_v1  ;;  %v300_v0 = vld [vmem:[%s5250_s11 + $0x1b8] sm:$0xff] }
  0x55   : > { %4375 = vmatprep.mubr.msk.f32.mxu0 %vm545_vm0, %v269_v2  ;;  %4483 = vmatprep.mubr.msk.f32.mxu1 %vm545_vm0, %v341_v3  ;;  %v372_v1 = vld [vmem:[%s5250_s11 + $0x3f8] sm:$0xff]  ;;  %v301_v2 = vld [vmem:[%s5250_s11 + $0x1c0] sm:$0xff] }
  0x56   : > { %v373_v3 = vld [vmem:[%s5250_s11 + $0x400] sm:$0xff] }
  0x58   : > { %4376 = vmatmul.mubr.msk.f32.gmra.mrb[24].mxu0 %vm545_vm0, %v270_v4  ;;  %4484 = vmatmul.mubr.msk.f32.gmra.mrb[24].mxu1 %vm545_vm0, %v342_v5  ;;  %v302_v4 = vld [vmem:[%s5250_s11 + $0x1c8] sm:$0xff] }
  0x59   : > { %4378 = vmatprep.mubr.msk.f32.mxu0 %vm545_vm0, %v271_v6  ;;  %4486 = vmatprep.mubr.msk.f32.mxu1 %vm545_vm0, %v343_v7  ;;  %v374_v5 = vld [vmem:[%s5250_s11 + $0x408] sm:$0xff]  ;;  %v303_v6 = vld [vmem:[%s5250_s11 + $0x1d0] sm:$0xff] }
  0x5a   : > { %v375_v7 = vld [vmem:[%s5250_s11 + $0x410] sm:$0xff] }
  0x5c   : > { %4379 = vmatmul.mubr.msk.f32.gmra.mrb[26].mxu0 %vm545_vm0, %v272_v8  ;;  %4487 = vmatmul.mubr.msk.f32.gmra.mrb[26].mxu1 %vm545_vm0, %v344_v9  ;;  %v304_v8 = vld [vmem:[%s5250_s11 + $0x1d8] sm:$0xff] }
  0x5d   : > { %4381 = vmatprep.mubr.msk.f32.mxu0 %vm545_vm0, %v273_v10  ;;  %4489 = vmatprep.mubr.msk.f32.mxu1 %vm545_vm0, %v345_v11  ;;  %v376_v9 = vld [vmem:[%s5250_s11 + $0x418] sm:$0xff]  ;;  %v305_v10 = vld [vmem:[%s5250_s11 + $0x1e0] sm:$0xff]  ;;  %v5186_v11 = vmov 0  }
  0x5e   : > { %4601 = vset.pattern.permute.xlu1 %v5186_v11  ;;  %4600 = vset.pattern.permute.xlu0 %v5186_v11 }
  0x60   : > { %4382 = vmatmul.mubr.msk.f32.gmra.mrb[28].mxu0 %vm545_vm0, %v274_v12  ;;  %4490 = vmatmul.mubr.msk.f32.gmra.mrb[28].mxu1 %vm545_vm0, %v346_v13  ;;  %v377_v12 = vld [vmem:[%s5250_s11 + $0x420] sm:$0xff]  ;;  %v306_v13 = vld [vmem:[%s5250_s11 + $0x1e8] sm:$0xff] }
  0x61   : > { %4384 = vmatprep.mubr.msk.f32.mxu0 %vm545_vm0, %v275_v14  ;;  %4492 = vmatprep.mubr.msk.f32.mxu1 %vm545_vm0, %v347_v15  ;;  %v378_v14 = vld [vmem:[%s5250_s11 + $0x428] sm:$0xff]  ;;  %v307_v15 = vld [vmem:[%s5250_s11 + $0x1f0] sm:$0xff] }
  0x64   : > { %4385 = vmatmul.mubr.msk.f32.gmra.mrb[30].mxu0 %vm545_vm0, %v276_v16  ;;  %4493 = vmatmul.mubr.msk.f32.gmra.mrb[30].mxu1 %vm545_vm0, %v348_v17  ;;  %v308_v16 = vld [vmem:[%s5250_s11 + $0x1f8] sm:$0xff]  ;;  %v379_v17 = vld [vmem:[%s5250_s11 + $0x430] sm:$0xff] }
  0x65   : > { %4387 = vmatprep.mubr.msk.f32.mxu0 %vm545_vm0, %v277_v18  ;;  %4495 = vmatprep.mubr.msk.f32.mxu1 %vm545_vm0, %v349_v19  ;;  %v380_v18 = vld [vmem:[%s5250_s11 + $0x438] sm:$0xff]  ;;  %v309_v19 = vld [vmem:[%s5250_s11 + $0x200] sm:$0xff] }
  0x68   : > { %4388 = vmatmul.mubr.msk.f32.gmra.mrb[32].mxu0 %vm545_vm0, %v278_v20  ;;  %4496 = vmatmul.mubr.msk.f32.gmra.mrb[32].mxu1 %vm545_vm0, %v350_v21  ;;  %v310_v20 = vld [vmem:[%s5250_s11 + $0x208] sm:$0xff]  ;;  %v381_v21 = vld [vmem:[%s5250_s11 + $0x440] sm:$0xff] }
  0x69   : > { %4390 = vmatprep.mubr.msk.f32.mxu0 %vm545_vm0, %v279_v22  ;;  %4498 = vmatprep.mubr.msk.f32.mxu1 %vm545_vm0, %v351_v23  ;;  %v382_v22 = vld [vmem:[%s5250_s11 + $0x448] sm:$0xff]  ;;  %v311_v23 = vld [vmem:[%s5250_s11 + $0x210] sm:$0xff] }
  0x6c   : > { %4391 = vmatmul.mubr.msk.f32.gmra.mrb[34].mxu0 %vm545_vm0, %v280_v24  ;;  %4499 = vmatmul.mubr.msk.f32.gmra.mrb[34].mxu1 %vm545_vm0, %v352_v25  ;;  %v312_v24 = vld [vmem:[%s5250_s11 + $0x218] sm:$0xff]  ;;  %v383_v25 = vld [vmem:[%s5250_s11 + $0x450] sm:$0xff] }
  0x6d   : > { %4393 = vmatprep.mubr.msk.f32.mxu0 %vm545_vm0, %v281_v26  ;;  %4501 = vmatprep.mubr.msk.f32.mxu1 %vm545_vm0, %v353_v27  ;;  %v384_v26 = vld [vmem:[%s5250_s11 + $0x458] sm:$0xff]  ;;  %v313_v27 = vld [vmem:[%s5250_s11 + $0x220] sm:$0xff] }
  0x70   : > { %4394 = vmatmul.mubr.msk.f32.gmra.mrb[36].mxu0 %vm545_vm0, %v282_v28  ;;  %4502 = vmatmul.mubr.msk.f32.gmra.mrb[36].mxu1 %vm545_vm0, %v354_v29  ;;  %v314_v28 = vld [vmem:[%s5250_s11 + $0x228] sm:$0xff]  ;;  %v385_v29 = vld [vmem:[%s5250_s11 + $0x460] sm:$0xff] }
  0x71   : > { %4396 = vmatprep.mubr.msk.f32.mxu0 %vm545_vm0, %v283_v30  ;;  %4504 = vmatprep.mubr.msk.f32.mxu1 %vm545_vm0, %v355_v31  ;;  %v386_v30 = vld [vmem:[%s5250_s11 + $0x468] sm:$0xff]  ;;  %v315_v31 = vld [vmem:[%s5250_s11 + $0x230] sm:$0xff] }
  0x74   : > { %4397 = vmatmul.mubr.msk.f32.gmra.mrb[38].mxu0 %vm545_vm0, %v284_v32  ;;  %4505 = vmatmul.mubr.msk.f32.gmra.mrb[38].mxu1 %vm545_vm0, %v356_v33  ;;  %v316_v32 = vld [vmem:[%s5250_s11 + $0x238] sm:$0xff]  ;;  %v387_v33 = vld [vmem:[%s5250_s11 + $0x470] sm:$0xff] }
  0x75   : > { %4399 = vmatprep.mubr.msk.f32.mxu0 %vm545_vm0, %v285_v34  ;;  %4507 = vmatprep.mubr.msk.f32.mxu1 %vm545_vm0, %v357_v35  ;;  %v388_v34 = vld [vmem:[%s5250_s11 + $0x478] sm:$0xff]  ;;  %v402_v35 = vld [vmem:[%s5556_s23 + $0x8] sm:$0xff] }
  0x78   : > { %4400 = vmatmul.mubr.msk.f32.gmra.mrb[40].mxu0 %vm545_vm0, %v286_v36  ;;  %4508 = vmatmul.mubr.msk.f32.gmra.mrb[40].mxu1 %vm545_vm0, %v358_v37  ;;  %v474_v36 = vld [vmem:[%s5556_s23 + $0x248] sm:$0xff]  ;;  %v401_v37 = vld [vmem:[%s5556_s23] sm:$0xff] }
  0x79   : > { %4402 = vmatprep.mubr.msk.f32.mxu0 %vm545_vm0, %v287_v38  ;;  %4510 = vmatprep.mubr.msk.f32.mxu1 %vm545_vm0, %v359_v39  ;;  %v473_v38 = vld [vmem:[%s5556_s23 + $0x240] sm:$0xff] }
  0x7c   : > { %4403 = vmatmul.mubr.msk.f32.gmra.mrb[42].mxu0 %vm545_vm0, %v288_v40  ;;  %4511 = vmatmul.mubr.msk.f32.gmra.mrb[42].mxu1 %vm545_vm0, %v360_v41 }
  0x7d   : > { %4405 = vmatprep.mubr.msk.f32.mxu0 %vm545_vm0, %v289_v42  ;;  %4513 = vmatprep.mubr.msk.f32.mxu1 %vm545_vm0, %v361_v43 }
  0x80   : > { %4406 = vmatmul.mubr.msk.f32.gmra.mrb[44].mxu0 %vm545_vm0, %v290_v44  ;;  %4514 = vmatmul.mubr.msk.f32.gmra.mrb[44].mxu1 %vm545_vm0, %v362_v45 }
  0x81   : > { %4408 = vmatprep.mubr.msk.f32.mxu0 %vm545_vm0, %v291_v46  ;;  %4516 = vmatprep.mubr.msk.f32.mxu1 %vm545_vm0, %v363_v47  ;;  %v404_v47 = vld [vmem:[%s5556_s23 + $0x18] sm:$0xff] }
  0x84   : > { %4409 = vmatmul.mubr.msk.f32.gmra.mrb[46].mxu0 %vm545_vm0, %v292_v48  ;;  %4517 = vmatmul.mubr.msk.f32.gmra.mrb[46].mxu1 %vm545_vm0, %v364_v49  ;;  %v476_v48 = vld [vmem:[%s5556_s23 + $0x258] sm:$0xff] }
  0x85   : > { %4411 = vmatprep.mubr.msk.f32.mxu0 %vm545_vm0, %v293_v50  ;;  %4519 = vmatprep.mubr.msk.f32.mxu1 %vm545_vm0, %v365_v51  ;;  %v403_v51 = vld [vmem:[%s5556_s23 + $0x10] sm:$0xff] }
  0x88   : > { %4412 = vmatmul.mubr.msk.f32.gmra.mrb[48].mxu0 %vm545_vm0, %v294_v52  ;;  %4520 = vmatmul.mubr.msk.f32.gmra.mrb[48].mxu1 %vm545_vm0, %v366_v53  ;;  %v475_v52 = vld [vmem:[%s5556_s23 + $0x250] sm:$0xff] }
  0x89   : > { %4414 = vmatprep.mubr.msk.f32.mxu0 %vm545_vm0, %v295_v54  ;;  %4522 = vmatprep.mubr.msk.f32.mxu1 %vm545_vm0, %v367_v55 }
  0x8c   : > { %4415 = vmatmul.mubr.msk.f32.gmra.mrb[50].mxu0 %vm545_vm0, %v296_v56  ;;  %4523 = vmatmul.mubr.msk.f32.gmra.mrb[50].mxu1 %vm545_vm0, %v368_v57 }
  0x8d   : > { %4417 = vmatprep.mubr.msk.f32.mxu0 %vm545_vm0, %v297_v58  ;;  %4525 = vmatprep.mubr.msk.f32.mxu1 %vm545_vm0, %v369_v59 }
  0x90   : > { %4418 = vmatmul.mubr.msk.f32.gmra.mrb[52].mxu0 %vm545_vm0, %v298_v60  ;;  %4526 = vmatmul.mubr.msk.f32.gmra.mrb[52].mxu1 %vm545_vm0, %v370_v61 }
  0x91   : > { %4420 = vmatprep.mubr.msk.f32.mxu0 %vm545_vm0, %v299_v62  ;;  %4528 = vmatprep.mubr.msk.f32.mxu1 %vm545_vm0, %v371_v63  ;;  %v406_v63 = vld [vmem:[%s5556_s23 + $0x28] sm:$0xff] }
  0x94   : > { %4421 = vmatmul.mubr.msk.f32.gmra.mrb[54].mxu0 %vm545_vm0, %v300_v0  ;;  %4529 = vmatmul.mubr.msk.f32.gmra.mrb[54].mxu1 %vm545_vm0, %v372_v1  ;;  %v478_v0 = vld [vmem:[%s5556_s23 + $0x268] sm:$0xff] }
  0x95   : > { %4423 = vmatprep.mubr.msk.f32.mxu0 %vm545_vm0, %v301_v2  ;;  %4531 = vmatprep.mubr.msk.f32.mxu1 %vm545_vm0, %v373_v3  ;;  %v405_v3 = vld [vmem:[%s5556_s23 + $0x20] sm:$0xff] }
  0x98   : > { %4424 = vmatmul.mubr.msk.f32.gmra.mrb[56].mxu0 %vm545_vm0, %v302_v4  ;;  %4532 = vmatmul.mubr.msk.f32.gmra.mrb[56].mxu1 %vm545_vm0, %v374_v5  ;;  %v477_v4 = vld [vmem:[%s5556_s23 + $0x260] sm:$0xff] }
  0x99   : > { %4426 = vmatprep.mubr.msk.f32.mxu0 %vm545_vm0, %v303_v6  ;;  %4534 = vmatprep.mubr.msk.f32.mxu1 %vm545_vm0, %v375_v7 }
  0x9c   : > { %4427 = vmatmul.mubr.msk.f32.gmra.mrb[58].mxu0 %vm545_vm0, %v304_v8  ;;  %4535 = vmatmul.mubr.msk.f32.gmra.mrb[58].mxu1 %vm545_vm0, %v376_v9 }
  0x9d   : > { %4429 = vmatprep.mubr.msk.f32.mxu0 %vm545_vm0, %v305_v10  ;;  %4537 = vmatprep.mubr.msk.f32.mxu1 %vm545_vm0, %v377_v12 }
  0xa0   : > { %4430 = vmatmul.mubr.msk.f32.gmra.mrb[60].mxu0 %vm545_vm0, %v306_v13  ;;  %4538 = vmatmul.mubr.msk.f32.gmra.mrb[60].mxu1 %vm545_vm0, %v378_v14 }
  0xa1   : > { %4432 = vmatprep.mubr.msk.f32.mxu0 %vm545_vm0, %v307_v15  ;;  %4540 = vmatprep.mubr.msk.f32.mxu1 %vm545_vm0, %v379_v17  ;;  %v408_v15 = vld [vmem:[%s5556_s23 + $0x38] sm:$0xff] }
  0xa4   : > { %4433 = vmatmul.mubr.msk.f32.gmra.mrb[62].mxu0 %vm545_vm0, %v308_v16  ;;  %4541 = vmatmul.mubr.msk.f32.gmra.mrb[62].mxu1 %vm545_vm0, %v380_v18 }
  0xa5   : > { %4435 = vmatprep.mubr.msk.f32.mxu0 %vm545_vm0, %v309_v19  ;;  %4543 = vmatprep.mubr.msk.f32.mxu1 %vm545_vm0, %v381_v21 }
  0xa8   : > { %4436 = vmatmul.mubr.msk.f32.gmra.mrb[64].mxu0 %vm545_vm0, %v310_v20  ;;  %4544 = vmatmul.mubr.msk.f32.gmra.mrb[64].mxu1 %vm545_vm0, %v382_v22 }
  0xa9   : > { %4438 = vmatprep.mubr.msk.f32.mxu0 %vm545_vm0, %v311_v23  ;;  %4546 = vmatprep.mubr.msk.f32.mxu1 %vm545_vm0, %v383_v25 }
  0xac   : > { %4439 = vmatmul.mubr.msk.f32.gmra.mrb[66].mxu0 %vm545_vm0, %v312_v24  ;;  %4547 = vmatmul.mubr.msk.f32.gmra.mrb[66].mxu1 %vm545_vm0, %v384_v26 }
  0xad   : > { %4441 = vmatprep.mubr.msk.f32.mxu0 %vm545_vm0, %v313_v27  ;;  %4549 = vmatprep.mubr.msk.f32.mxu1 %vm545_vm0, %v385_v29 }
  0xb0   : > { %4442 = vmatmul.mubr.msk.f32.gmra.mrb[68].mxu0 %vm545_vm0, %v314_v28  ;;  %4550 = vmatmul.mubr.msk.f32.gmra.mrb[68].mxu1 %vm545_vm0, %v386_v30 }
  0xb1   : > { %4444 = vmatprep.mubr.msk.f32.mxu0 %vm545_vm0, %v315_v31  ;;  %4552 = vmatprep.mubr.msk.f32.mxu1 %vm545_vm0, %v387_v33 }
  0xb4   : > { %4445 = vmatmul.mubr.msk.f32.gmra.mrb[70].mxu0 %vm545_vm0, %v316_v32  ;;  %4553 = vmatmul.mubr.msk.f32.gmra.mrb[70].mxu1 %vm545_vm0, %v388_v34 }
  0xfb   : > { %v4341_v39 = vpop.f32.mrb[0].mxu0  ;;  %v4449_v40 = vpop.f32.mrb[0].mxu1 }
  0xfc   : > { %v1050_v41 = vadd.f32 %v4341_v39, %v402_v35  ;;  %v1410_v42 = vadd.f32 %v4449_v40, %v474_v36  ;;  %v1044_v43 = vpop.f32.mrb[1].mxu0  ;;  %v1404_v44 = vpop.f32.mrb[1].mxu1 }
  0xfd   : > { %v1045_v45 = vadd.f32 %v1044_v43, %v401_v37  ;;  %v1405_v46 = vadd.f32 %v1404_v44, %v473_v38 }
  0xfe   : > { %v4014_v49 = vmul.f32 -1.442695, %v1050_v41  ;;  %v4086_v50 = vmul.f32 -1.442695, %v1410_v42  ;;  %v407_v41 = vld [vmem:[%s5556_s23 + $0x30] sm:$0xff] }
  0xff   : > { %v4013_v53 = vmul.f32 -1.442695, %v1045_v45  ;;  %v4085_v54 = vmul.f32 -1.442695, %v1405_v46  ;;  %v4344_v55 = vpop.f32.mrb[2].mxu0  ;;  %v4452_v56 = vpop.f32.mrb[2].mxu1 }
 0x100   : > { %4602 = vpow2.f32 %v4014_v49  ;;  %v1060_v57 = vadd.f32 %v4344_v55, %v404_v47  ;;  %v1054_v58 = vpop.f32.mrb[3].mxu0  ;;  %v1420_v59 = vadd.f32 %v4452_v56, %v476_v48  ;;  %v1414_v60 = vpop.f32.mrb[3].mxu1  ;;  %v480_v45 = vld [vmem:[%s5556_s23 + $0x278] sm:$0xff]  ;;  %v410_v55 = vld [vmem:[%s5556_s23 + $0x48] sm:$0xff] }
 0x101   : > { %4604 = vpow2.f32 %v4086_v50  ;;  %v1055_v61 = vadd.f32 %v1054_v58, %v403_v51  ;;  %v1415_v62 = vadd.f32 %v1414_v60, %v475_v52  ;;  %v479_v50 = vld [vmem:[%s5556_s23 + $0x270] sm:$0xff] }
 0x102   : > { %4606 = vpow2.f32 %v4013_v53  ;;  %v4016_v1 = vmul.f32 -1.442695, %v1060_v57  ;;  %v4088_v2 = vmul.f32 -1.442695, %v1420_v59  ;;  %v409_v59 = vld [vmem:[%s5556_s23 + $0x40] sm:$0xff] }
 0x103   : > { %4608 = vpow2.f32 %v4085_v54  ;;  %v4015_v5 = vmul.f32 -1.442695, %v1055_v61  ;;  %v4087_v6 = vmul.f32 -1.442695, %v1415_v62  ;;  %v4347_v7 = vpop.f32.mrb[4].mxu0  ;;  %v4455_v8 = vpop.f32.mrb[4].mxu1 }
 0x104   : > { %4610 = vpow2.f32 %v4016_v1  ;;  %v1070_v9 = vadd.f32 %v4347_v7, %v406_v63  ;;  %v1064_v10 = vpop.f32.mrb[5].mxu0  ;;  %v1430_v11 = vadd.f32 %v4455_v8, %v478_v0  ;;  %v1424_v12 = vpop.f32.mrb[5].mxu1  ;;  %v482_v0 = vld [vmem:[%s5556_s23 + $0x288] sm:$0xff] }
 0x105   : > { %4612 = vpow2.f32 %v4015_v5  ;;  %v1065_v13 = vadd.f32 %v1064_v10, %v405_v3  ;;  %v1425_v14 = vadd.f32 %v1424_v12, %v477_v4  ;;  %v412_v12 = vld [vmem:[%s5556_s23 + $0x58] sm:$0xff] }
 0x106   : > { %4614 = vpow2.f32 %v4088_v2  ;;  %v4018_v16 = vmul.f32 -1.442695, %v1070_v9  ;;  %v4090_v17 = vmul.f32 -1.442695, %v1430_v11 }
 0x107   : > { %4616 = vpow2.f32 %v4087_v6  ;;  %v4017_v18 = vmul.f32 -1.442695, %v1065_v13  ;;  %v4089_v19 = vmul.f32 -1.442695, %v1425_v14  ;;  %v4350_v20 = vpop.f32.mrb[6].mxu0  ;;  %v4458_v21 = vpop.f32.mrb[6].mxu1 }
 0x108   : > { %4618 = vpow2.f32 %v4018_v16  ;;  %v1080_v22 = vadd.f32 %v4350_v20, %v408_v15  ;;  %v1074_v23 = vpop.f32.mrb[7].mxu0  ;;  %v1434_v24 = vpop.f32.mrb[7].mxu1  ;;  %v1440_v58 = vadd.f32 %v4458_v21, %v480_v45  ;;  %v481_v6 = vld [vmem:[%s5556_s23 + $0x280] sm:$0xff] }
 0x109   : > { %4620 = vpow2.f32 %v4017_v18  ;;  %v1075_v54 = vadd.f32 %v1074_v23, %v407_v41  ;;  %v1435_v63 = vadd.f32 %v1434_v24, %v479_v50 }
 0x10a   : > { %v4603_v25 = vpop.eup %4602  ;;  %4622 = vpow2.f32 %v4090_v17  ;;  %v4020_v26 = vmul.f32 -1.442695, %v1080_v22  ;;  %v4092_v15 = vmul.f32 -1.442695, %v1440_v58  ;;  %v411_v17 = vld [vmem:[%s5556_s23 + $0x50] sm:$0xff]  ;;  %v484_v22 = vld [vmem:[%s5556_s23 + $0x298] sm:$0xff] }
 0x10b   : > { %v4605_v27 = vpop.eup %4604  ;;  %v2196_v28 = vadd.f32 1.0, %v4603_v25  ;;  %4624 = vpow2.f32 %v4089_v19  ;;  %v4353_v29 = vpop.f32.mrb[8].mxu0  ;;  %v4019_v10 = vmul.f32 -1.442695, %v1075_v54  ;;  %v4091_v20 = vmul.f32 -1.442695, %v1435_v63 }
 0x10c   : > { %v4607_v30 = vpop.eup %4606  ;;  %v2268_v31 = vadd.f32 1.0, %v4605_v27  ;;  %4626 = vpow2.f32 %v4020_v26  ;;  %v1084_v32 = vpop.f32.mrb[9].mxu0  ;;  %v1090_v5 = vadd.f32 %v4353_v29, %v410_v55 }
 0x10d   : > { %v4461_v33 = vpop.f32.mrb[8].mxu1  ;;  %v4609_v34 = vpop.eup %4608  ;;  %4628 = vrcp.f32 %v2196_v28  ;;  %v2195_v35 = vadd.f32 1.0, %v4607_v30  ;;  %v1085_v11 = vadd.f32 %v1084_v32, %v409_v59  ;;  %v483_v28 = vld [vmem:[%s5556_s23 + $0x290] sm:$0xff] }
 0x10e   : > { %v1444_v36 = vpop.f32.mrb[9].mxu1  ;;  %v4611_v37 = vpop.eup %4610  ;;  %4630 = vrcp.f32 %v2268_v31  ;;  %v2267_v38 = vadd.f32 1.0, %v4609_v34  ;;  %v1450_v16 = vadd.f32 %v4461_v33, %v482_v0  ;;  %v4022_v26 = vmul.f32 -1.442695, %v1090_v5  ;;  %v414_v33 = vld [vmem:[%s5556_s23 + $0x68] sm:$0xff] }
 0x10f   : > { %v4613_v39 = vpop.eup %4612  ;;  %4632 = vrcp.f32 %v2195_v35  ;;  %v2198_v40 = vadd.f32 1.0, %v4611_v37  ;;  %v4356_v42 = vpop.f32.mrb[10].mxu0  ;;  %v1445_v21 = vadd.f32 %v1444_v36, %v481_v6  ;;  %v4021_v31 = vmul.f32 -1.442695, %v1085_v11  ;;  %v413_v37 = vld [vmem:[%s5556_s23 + $0x60] sm:$0xff] }
 0x110   : > { %v4615_v43 = vpop.eup %4614  ;;  %4634 = vrcp.f32 %v2267_v38  ;;  %v2197_v44 = vadd.f32 1.0, %v4613_v39  ;;  %v1094_v46 = vpop.f32.mrb[11].mxu0  ;;  %v1100_v27 = vadd.f32 %v4356_v42, %v412_v12  ;;  %v4094_v35 = vmul.f32 -1.442695, %v1450_v16 }
 0x111   : > { %v5573_v47 = vpop.f32.mrb[10].mxu1  ;;  %v4617_v48 = vpop.eup %4616  ;;  %4636 = vrcp.f32 %v2198_v40  ;;  %v2270_v49 = vadd.f32 1.0, %v4615_v43  ;;  %v1095_v32 = vadd.f32 %v1094_v46, %v411_v17  ;;  %v4093_v41 = vmul.f32 -1.442695, %v1445_v21  ;;  %v486_v21 = vld [vmem:[%s5556_s23 + $0x2a8] sm:$0xff] }
 0x112   : > { %v5576_v51 = vpop.f32.mrb[11].mxu1  ;;  %v4619_v52 = vpop.eup %4618  ;;  %4638 = vrcp.f32 %v2197_v44  ;;  %v2269_v53 = vadd.f32 1.0, %v4617_v48  ;;  %v1460_v36 = vadd.f32 %v5573_v47, %v484_v22  ;;  %v4024_v46 = vmul.f32 -1.442695, %v1100_v27  ;;  %v485_v27 = vld [vmem:[%s5556_s23 + $0x2a0] sm:$0xff] }
 0x113   : > { %v4621_v56 = vpop.eup %4620  ;;  %4640 = vrcp.f32 %v2270_v49  ;;  %v2200_v57 = vadd.f32 1.0, %v4619_v52  ;;  %v5580_v60 = vpop.f32.mrb[12].mxu0  ;;  %v1455_v42 = vadd.f32 %v5576_v51, %v483_v28  ;;  %v4023_v49 = vmul.f32 -1.442695, %v1095_v32 }
 0x114   : > { %v4623_v61 = vpop.eup %4622  ;;  %4642 = vrcp.f32 %v2269_v53  ;;  %v2199_v62 = vadd.f32 1.0, %v4621_v56  ;;  %v5583_v1 = vpop.f32.mrb[13].mxu0  ;;  %v1110_v47 = vadd.f32 %v5580_v60, %v414_v33  ;;  %v4096_v53 = vmul.f32 -1.442695, %v1460_v36  ;;  %v415_v36 = vld [vmem:[%s5556_s23 + $0x70] sm:$0xff] }
 0x115   : > { %v5585_v2 = vpop.f32.mrb[12].mxu1  ;;  %v4625_v3 = vpop.eup %4624  ;;  %4644 = vrcp.f32 %v2200_v57  ;;  %v2272_v4 = vadd.f32 1.0, %v4623_v61  ;;  %v1105_v50 = vadd.f32 %v5583_v1, %v413_v37  ;;  %v4095_v56 = vmul.f32 -1.442695, %v1455_v42 }
 0x116   : > { %v5588_v7 = vpop.f32.mrb[13].mxu1  ;;  %v4627_v8 = vpop.eup %4626  ;;  %4646 = vrcp.f32 %v2199_v62  ;;  %v2271_v9 = vadd.f32 1.0, %v4625_v3  ;;  %v4026_v60 = vmul.f32 -1.442695, %v1110_v47 }
 0x117   : > { %v4629_v13 = vpop.eup %4628  ;;  %4648 = vrcp.f32 %v2272_v4  ;;  %v2202_v14 = vadd.f32 1.0, %v4627_v8  ;;  %v5592_v18 = vpop.f32.mrb[14].mxu0  ;;  %v4025_v62 = vmul.f32 -1.442695, %v1105_v50  ;;  %v487_v50 = vld [vmem:[%s5556_s23 + $0x2b0] sm:$0xff] }
 0x118   : > { %v4631_v19 = vpop.eup %4630  ;;  %4650 = vrcp.f32 %v2271_v9  ;;  %2778 = vperm.xlu0 %4600, %v4629_v13   ;;  %v5595_v23 = vpop.f32.mrb[15].mxu0 }
 0x119   : > { %v5597_v24 = vpop.f32.mrb[14].mxu1  ;;  %v4633_v25 = vpop.eup %4632  ;;  %4652 = vrcp.f32 %v2202_v14  ;;  %3138 = vperm.xlu1 %4601, %v4631_v19  }
 0x11a   : > { %v5600_v29 = vpop.f32.mrb[15].mxu1  ;;  %v4635_v30 = vpop.eup %4634  ;;  %4654 = vpow2.f32 %v4019_v10 }
 0x11b   : > { %v4637_v34 = vpop.eup %4636  ;;  %4656 = vpow2.f32 %v4092_v15  ;;  %v5605_v38 = vpop.f32.mrb[16].mxu0 }
 0x11c   : > { %v5607_v39 = vpop.f32.mrb[16].mxu1  ;;  %v4639_v40 = vpop.eup %4638  ;;  %4658 = vpow2.f32 %v4091_v20  ;;  %2773 = vperm.xlu0 %4600, %v4633_v25  }
 0x11d   : > { %v5610_v43 = vpop.f32.mrb[17].mxu0  ;;  %v5612_v44 = vpop.f32.mrb[17].mxu1  ;;  %4660 = vpow2.f32 %v4022_v26  ;;  %2788 = vperm.xlu1 %4601, %v4637_v34  }
 0x11e   : > { %v4641_v45 = vpop.eup %4640  ;;  %4662 = vpow2.f32 %v4021_v31  ;;  %v416_v31 = vld [vmem:[%s5556_s23 + $0x78] sm:$0xff] }
 0x11f   : > { %v4643_v48 = vpop.eup %4642  ;;  %4664 = vpow2.f32 %v4094_v35  ;;  %v5616_v54 = vpop.f32.mrb[18].mxu0  ;;  %v1470_v35 = vadd.f32 %v5585_v2, %v486_v21  ;;  %v1120_v2 = vadd.f32 %v5592_v18, %v416_v31  ;;  %v419_v31 = vld [vmem:[%s5556_s23 + $0x90] sm:$0xff] }
 0x120   : > { %v4645_v52 = vpop.eup %4644  ;;  %v5618_v51 = vpop.f32.mrb[18].mxu1  ;;  %4666 = vpow2.f32 %v4093_v41  ;;  %3133 = vperm.xlu0 %4600, %v4635_v30  }
 0x121   : > { %v4647_v55 = vpop.eup %4646  ;;  %v5620_v57 = vpop.f32.mrb[19].mxu0  ;;  %3148 = vperm.xlu1 %4601, %v4641_v45   ;;  %4668 = vpow2.f32 %v4024_v46  ;;  %v1465_v45 = vadd.f32 %v5588_v7, %v485_v27  ;;  %v488_v46 = vld [vmem:[%s5556_s23 + $0x2b8] sm:$0xff] }
 0x122   : > { %v5622_v58 = vpop.f32.mrb[19].mxu1  ;;  %v4649_v59 = vpop.eup %4648  ;;  %4670 = vpow2.f32 %v4023_v49 }
 0x123   : > { %v4651_v61 = vpop.eup %4650  ;;  %4672 = vpow2.f32 %v4096_v53  ;;  %v5626_v0 = vpop.f32.mrb[20].mxu0 }
 0x124   : > { %v5624_v63 = vpop.eup %4652  ;;  %v5628_v1 = vpop.f32.mrb[20].mxu1  ;;  %3143 = vperm.xlu0 %4600, %v4643_v48   ;;  %4674 = vpow2.f32 %v4095_v56  ;;  %v418_v56 = vld [vmem:[%s5556_s23 + $0x88] sm:$0xff] }
 0x125   : > { %v4655_v3 = vpop.eup %4654  ;;  %v5630_v4 = vpop.f32.mrb[21].mxu0  ;;  %2783 = vperm.xlu1 %4601, %v4639_v40   ;;  %4676 = vpow2.f32 %v4026_v60 }
 0x126   : > { %v5632_v5 = vpop.f32.mrb[21].mxu1  ;;  %v4657_v6 = vpop.eup %4656  ;;  %v2201_v8 = vadd.f32 1.0, %v4655_v3  ;;  %4678 = vpow2.f32 %v4025_v62  ;;  %v1480_v62 = vadd.f32 %v5597_v24, %v488_v46  ;;  %v417_v3 = vld [vmem:[%s5556_s23 + $0x80] sm:$0xff]  ;;  %v4028_v24 = vmul.f32 -1.442695, %v1120_v2 }
 0x127   : > { %v4659_v9 = vpop.eup %4658  ;;  %v2274_v10 = vadd.f32 1.0, %v4657_v6  ;;  %v5634_v13 = vpop.f32.mrb[22].mxu0 }
 0x128   : > { %v4661_v11 = vpop.eup %4660  ;;  %4680 = vrcp.f32 %v2201_v8  ;;  %v2273_v12 = vadd.f32 1.0, %v4659_v9  ;;  %2793 = vperm.xlu0 %4600, %v4647_v55   ;;  %v5636_v16 = vpop.f32.mrb[23].mxu0  ;;  %v1115_v55 = vadd.f32 %v5595_v23, %v415_v36  ;;  %v4097_v23 = vmul.f32 -1.442695, %v1465_v45  ;;  %v492_v36 = vld [vmem:[%s5556_s23 + $0x2d8] sm:$0xff] }
 0x129   : > { %v4663_v14 = vpop.eup %4662  ;;  %4682 = vrcp.f32 %v2274_v10  ;;  %v2204_v15 = vadd.f32 1.0, %v4661_v11  ;;  %v5638_v17 = vpop.f32.mrb[22].mxu1  ;;  %2798 = vperm.xlu1 %4601, %v4645_v52   ;;  %v1475_v10 = vadd.f32 %v5600_v29, %v487_v50  ;;  %v490_v11 = vld [vmem:[%s5556_s23 + $0x2c8] sm:$0xff] }
 0x12a   : > { %v4665_v19 = vpop.eup %4664  ;;  %4684 = vrcp.f32 %v2273_v12  ;;  %v2203_v20 = vadd.f32 1.0, %v4663_v14  ;;  %v5641_v22 = vpop.f32.mrb[23].mxu1  ;;  %v4027_v21 = vmul.f32 -1.442695, %v1115_v55 }
 0x12b   : > { %v4667_v25 = vpop.eup %4666  ;;  %4686 = vrcp.f32 %v2204_v15  ;;  %v2276_v26 = vadd.f32 1.0, %v4665_v19  ;;  %v5645_v32 = vpop.f32.mrb[24].mxu0  ;;  %v1130_v15 = vadd.f32 %v5605_v38, %v418_v56  ;;  %v489_v19 = vld [vmem:[%s5556_s23 + $0x2c0] sm:$0xff] }
 0x12c   : > { %v4669_v28 = vpop.eup %4668  ;;  %4688 = vrcp.f32 %v2203_v20  ;;  %v2275_v30 = vadd.f32 1.0, %v4667_v25  ;;  %3153 = vperm.xlu0 %4600, %v4651_v61   ;;  %v5649_v37 = vpop.f32.mrb[25].mxu0  ;;  %v4098_v61 = vmul.f32 -1.442695, %v1470_v35  ;;  %v1125_v25 = vadd.f32 %v5610_v43, %v417_v3 }
 0x12d   : > { %v4671_v33 = vpop.eup %4670  ;;  %4690 = vrcp.f32 %v2276_v26  ;;  %v2206_v34 = vadd.f32 1.0, %v4669_v28  ;;  %v5651_v40 = vpop.f32.mrb[24].mxu1  ;;  %3158 = vperm.xlu1 %4601, %v4649_v59   ;;  %v4100_v28 = vmul.f32 -1.442695, %v1480_v62  ;;  %v4099_v43 = vmul.f32 -1.442695, %v1475_v10 }
 0x12e   : > { %v4673_v41 = vpop.eup %4672  ;;  %4692 = vrcp.f32 %v2275_v30  ;;  %v2205_v42 = vadd.f32 1.0, %v4671_v33  ;;  %v5655_v47 = vpop.f32.mrb[25].mxu1  ;;  %v1490_v30 = vadd.f32 %v5607_v39, %v490_v11  ;;  %v1485_v35 = vadd.f32 %v5612_v44, %v489_v19 }
 0x12f   : > { %v4675_v48 = vpop.eup %4674  ;;  %4694 = vrcp.f32 %v2206_v34  ;;  %v2278_v49 = vadd.f32 1.0, %v4673_v41  ;;  %v5661_v59 = vpop.f32.mrb[26].mxu0  ;;  %v4029_v39 = vmul.f32 -1.442695, %v1125_v25  ;;  %v1500_v44 = vadd.f32 %v5618_v51, %v492_v36 }
 0x130   : > { %v4677_v52 = vpop.eup %4676  ;;  %4696 = vrcp.f32 %v2205_v42  ;;  %v2277_v53 = vadd.f32 1.0, %v4675_v48  ;;  %v5665_v6 = vpop.f32.mrb[27].mxu0  ;;  %v4030_v42 = vmul.f32 -1.442695, %v1130_v15  ;;  %v1135_v48 = vadd.f32 %v5620_v57, %v419_v31 }
 0x131   : > { %v4679_v7 = vpop.eup %4678  ;;  %4698 = vrcp.f32 %v2278_v49  ;;  %v2208_v60 = vadd.f32 1.0, %v4677_v52  ;;  %v5667_v18 = vpop.f32.mrb[26].mxu1  ;;  %2808 = vperm.xlu1 %4601, %v5624_v63   ;;  %v420_v63 = vld [vmem:[%s5556_s23 + $0x98] sm:$0xff]  ;;  %v4102_v52 = vmul.f32 -1.442695, %v1490_v30 }
 0x132   : > { %v4681_v8 = vpop.eup %4680  ;;  %4700 = vrcp.f32 %v2277_v53  ;;  %v2207_v9 = vadd.f32 1.0, %v4679_v7  ;;  %v5672_v12 = vpop.f32.mrb[27].mxu1  ;;  %v1140_v45 = vadd.f32 %v5616_v54, %v420_v63  ;;  %v4101_v54 = vmul.f32 -1.442695, %v1485_v35  ;;  %v491_v35 = vld [vmem:[%s5556_s23 + $0x2d0] sm:$0xff] }
 0x133   : > { %v4683_v14 = vpop.eup %4682  ;;  %4702 = vrcp.f32 %v2208_v60  ;;  %2803 = vperm.xlu0 %4600, %v4681_v8   ;;  %v5678_v26 = vpop.f32.mrb[28].mxu0  ;;  %v4104_v8 = vmul.f32 -1.442695, %v1500_v44 }
 0x134   : > { %v4685_v20 = vpop.eup %4684  ;;  %4704 = vrcp.f32 %v2207_v9  ;;  %v5680_v29 = vpop.f32.mrb[28].mxu1  ;;  %v4032_v57 = vmul.f32 -1.442695, %v1140_v45  ;;  %v422_v45 = vld [vmem:[%s5556_s23 + $0xa8] sm:$0xff] }
 0x135   : > { %v4687_v27 = vpop.eup %4686  ;;  %4706 = vpow2.f32 %v4098_v61  ;;  %v5684_v33 = vpop.f32.mrb[29].mxu0  ;;  %3168 = vperm.xlu1 %4601, %v4683_v14   ;;  %v4031_v61 = vmul.f32 -1.442695, %v1135_v48 }
 0x136   : > { %v5686_v38 = vpop.f32.mrb[29].mxu1  ;;  %v4689_v34 = vpop.eup %4688  ;;  %4708 = vpow2.f32 %v4097_v23 }
 0x137   : > { %v4691_v41 = vpop.eup %4690  ;;  %4710 = vpow2.f32 %v4028_v24  ;;  %3163 = vperm.xlu0 %4600, %v4685_v20   ;;  %v5692_v49 = vpop.f32.mrb[30].mxu0 }
 0x138   : > { %v4693_v46 = vpop.eup %4692  ;;  %4712 = vpow2.f32 %v4027_v21  ;;  %v5694_v2 = vpop.f32.mrb[30].mxu1 }
 0x139   : > { %v4695_v50 = vpop.eup %4694  ;;  %4714 = vpow2.f32 %v4100_v28  ;;  %v5697_v53 = vpop.f32.mrb[31].mxu0  ;;  %2818 = vperm.xlu1 %4601, %v4687_v27  }
 0x13a   : > { %v5699_v55 = vpop.f32.mrb[31].mxu1  ;;  %v4697_v56 = vpop.eup %4696  ;;  %4716 = vpow2.f32 %v4099_v43 }
 0x13b   : > { %v4699_v7 = vpop.eup %4698  ;;  %2813 = vperm.xlu0 %4600, %v4689_v34   ;;  %4718 = vpow2.f32 %v4030_v42  ;;  %v5701_v62 = vpop.f32.mrb[32].mxu0 }
 0x13c   : > { %v4701_v60 = vpop.eup %4700  ;;  %4720 = vpow2.f32 %v4029_v39  ;;  %v5703_v3 = vpop.f32.mrb[32].mxu1 }
 0x13d   : > { %v5705_v51 = vpop.eup %4702  ;;  %4722 = vpow2.f32 %v4102_v52  ;;  %v5707_v9 = vpop.f32.mrb[33].mxu0  ;;  %3178 = vperm.xlu1 %4601, %v4691_v41   ;;  %v421_v52 = vld [vmem:[%s5556_s23 + $0xa0] sm:$0xff] }
 0x13e   : > { %v5709_v23 = vpop.f32.mrb[33].mxu1  ;;  %v5711_v10 = vpop.eup %4704  ;;  %4724 = vpow2.f32 %v4101_v54 }
 0x13f   : > { %v4707_v11 = vpop.eup %4706  ;;  %3173 = vperm.xlu0 %4600, %v4693_v46   ;;  %4726 = vpow2.f32 %v4032_v57  ;;  %v5713_v15 = vpop.f32.mrb[34].mxu0  ;;  %v1495_v57 = vadd.f32 %v5622_v58, %v491_v35 }
 0x140   : > { %v4709_v14 = vpop.eup %4708  ;;  %v2280_v24 = vadd.f32 1.0, %v4707_v11  ;;  %4728 = vpow2.f32 %v4031_v61  ;;  %v5715_v21 = vpop.f32.mrb[35].mxu0  ;;  %v494_v61 = vld [vmem:[%s5556_s23 + $0x2e8] sm:$0xff] }
 0x141   : > { %v4711_v19 = vpop.eup %4710  ;;  %v2279_v20 = vadd.f32 1.0, %v4709_v14  ;;  %4730 = vpow2.f32 %v4104_v8  ;;  %v5717_v25 = vpop.f32.mrb[34].mxu1  ;;  %2828 = vperm.xlu1 %4601, %v4695_v50   ;;  %v1150_v14 = vadd.f32 %v5626_v0, %v422_v45  ;;  %v1510_v0 = vadd.f32 %v5628_v1, %v494_v61  ;;  %v496_v45 = vld [vmem:[%s5556_s23 + $0x2f8] sm:$0xff] }
 0x142   : > { %v4713_v63 = vpop.eup %4712  ;;  %4732 = vrcp.f32 %v2280_v24  ;;  %v2210_v27 = vadd.f32 1.0, %v4711_v19  ;;  %v5719_v28 = vpop.f32.mrb[35].mxu1  ;;  %v493_v24 = vld [vmem:[%s5556_s23 + $0x2e0] sm:$0xff] }
 0x143   : > { %v4715_v30 = vpop.eup %4714  ;;  %4734 = vrcp.f32 %v2279_v20  ;;  %v2209_v31 = vadd.f32 1.0, %v4713_v63  ;;  %2823 = vperm.xlu0 %4600, %v4697_v56   ;;  %v5722_v36 = vpop.f32.mrb[36].mxu0  ;;  %v1145_v63 = vadd.f32 %v5630_v4, %v421_v52  ;;  %v495_v52 = vld [vmem:[%s5556_s23 + $0x2f0] sm:$0xff] }
 0x144   : > { %v4717_v34 = vpop.eup %4716  ;;  %4736 = vrcp.f32 %v2210_v27  ;;  %v2282_v43 = vadd.f32 1.0, %v4715_v30  ;;  %v5725_v46 = vpop.f32.mrb[37].mxu0  ;;  %v424_v27 = vld [vmem:[%s5556_s23 + $0xb8] sm:$0xff] }
 0x145   : > { %v4719_v41 = vpop.eup %4718  ;;  %4738 = vrcp.f32 %v2209_v31  ;;  %v2281_v42 = vadd.f32 1.0, %v4717_v34  ;;  %v5727_v39 = vpop.f32.mrb[36].mxu1  ;;  %3188 = vperm.xlu1 %4601, %v4699_v7   ;;  %v423_v34 = vld [vmem:[%s5556_s23 + $0xb0] sm:$0xff]  ;;  %v1160_v1 = vadd.f32 %v5634_v13, %v424_v27  ;;  %v4033_v61 = vmul.f32 -1.442695, %v1145_v63  ;;  %v498_v27 = vld [vmem:[%s5556_s23 + $0x308] sm:$0xff] }
 0x146   : > { %v4721_v48 = vpop.eup %4720  ;;  %4740 = vrcp.f32 %v2282_v43  ;;  %v2212_v50 = vadd.f32 1.0, %v4719_v41  ;;  %v5730_v44 = vpop.f32.mrb[37].mxu1  ;;  %v4103_v41 = vmul.f32 -1.442695, %v1495_v57  ;;  %v1155_v57 = vadd.f32 %v5636_v16, %v423_v34 }
 0x147   : > { %v4723_v56 = vpop.eup %4722  ;;  %4742 = vrcp.f32 %v2281_v42  ;;  %v2211_v54 = vadd.f32 1.0, %v4721_v48  ;;  %3183 = vperm.xlu0 %4600, %v4701_v60   ;;  %v5736_v19 = vpop.f32.mrb[38].mxu0  ;;  %v1505_v42 = vadd.f32 %v5632_v5, %v493_v24  ;;  %v1520_v13 = vadd.f32 %v5638_v17, %v496_v45  ;;  %v425_v24 = vld [vmem:[%s5556_s23 + $0xc0] sm:$0xff] }
 0x148   : > { %v4725_v8 = vpop.eup %4724  ;;  %4744 = vrcp.f32 %v2212_v50  ;;  %v2284_v11 = vadd.f32 1.0, %v4723_v56  ;;  %v5740_v60 = vpop.f32.mrb[39].mxu0  ;;  %v1515_v63 = vadd.f32 %v5641_v22, %v495_v52  ;;  %v4035_v45 = vmul.f32 -1.442695, %v1155_v57 }
 0x149   : > { %v4727_v7 = vpop.eup %4726  ;;  %4746 = vrcp.f32 %v2211_v54  ;;  %v2283_v20 = vadd.f32 1.0, %v4725_v8  ;;  %v5742_v58 = vpop.f32.mrb[38].mxu1  ;;  %2838 = vperm.xlu1 %4601, %v5705_v51   ;;  %v4034_v51 = vmul.f32 -1.442695, %v1150_v14  ;;  %v4106_v14 = vmul.f32 -1.442695, %v1510_v0 }
 0x14a   : > { %v4729_v30 = vpop.eup %4728  ;;  %4748 = vrcp.f32 %v2284_v11  ;;  %v2214_v31 = vadd.f32 1.0, %v4727_v7  ;;  %v5747_v43 = vpop.f32.mrb[39].mxu1  ;;  %v4105_v16 = vmul.f32 -1.442695, %v1505_v42 }
 0x14b   : > { %v4731_v35 = vpop.eup %4730  ;;  %4750 = vrcp.f32 %v2283_v20  ;;  %v2213_v4 = vadd.f32 1.0, %v4729_v30  ;;  %2833 = vperm.xlu0 %4600, %v5711_v10   ;;  %v5754_v56 = vpop.f32.mrb[40].mxu0  ;;  %v426_v10 = vld [vmem:[%s5556_s23 + $0xc8] sm:$0xff] }
 0x14c   : > { %v4733_v48 = vpop.eup %4732  ;;  %4752 = vrcp.f32 %v2214_v31  ;;  %v2286_v50 = vadd.f32 1.0, %v4731_v35  ;;  %v5758_v8 = vpop.f32.mrb[41].mxu0  ;;  %v4036_v31 = vmul.f32 -1.442695, %v1160_v1  ;;  %v1170_v34 = vadd.f32 %v5645_v32, %v426_v10  ;;  %v497_v35 = vld [vmem:[%s5556_s23 + $0x300] sm:$0xff] }
 0x14d   : > { %v4735_v54 = vpop.eup %4734  ;;  %4754 = vrcp.f32 %v2213_v4  ;;  %v5760_v5 = vpop.f32.mrb[40].mxu1  ;;  %3198 = vperm.xlu1 %4601, %v4733_v48   ;;  %v1530_v32 = vadd.f32 %v5651_v40, %v498_v27  ;;  %v4107_v1 = vmul.f32 -1.442695, %v1515_v63  ;;  %v1525_v52 = vadd.f32 %v5655_v47, %v497_v35 }
 0x14e   : > { %v4737_v11 = vpop.eup %4736  ;;  %4756 = vrcp.f32 %v2286_v50  ;;  %v5764_v7 = vpop.f32.mrb[41].mxu1  ;;  %v4108_v50 = vmul.f32 -1.442695, %v1520_v13 }
 0x14f   : > { %v4739_v20 = vpop.eup %4738  ;;  %4758 = vpow2.f32 %v4103_v41  ;;  %3193 = vperm.xlu0 %4600, %v4735_v54   ;;  %v5770_v4 = vpop.f32.mrb[42].mxu0  ;;  %v1165_v41 = vadd.f32 %v5649_v37, %v425_v24  ;;  %v4110_v24 = vmul.f32 -1.442695, %v1530_v32  ;;  %v4109_v47 = vmul.f32 -1.442695, %v1525_v52 }
 0x150   : > { %v4741_v30 = vpop.eup %4740  ;;  %4760 = vpow2.f32 %v4034_v51  ;;  %v5772_v0 = vpop.f32.mrb[42].mxu1 }
 0x151   : > { %v4743_v17 = vpop.eup %4742  ;;  %4762 = vpow2.f32 %v4033_v61  ;;  %v5775_v48 = vpop.f32.mrb[43].mxu0  ;;  %2848 = vperm.xlu1 %4601, %v4737_v11   ;;  %v4038_v61 = vmul.f32 -1.442695, %v1170_v34 }
 0x152   : > { %v5777_v42 = vpop.f32.mrb[43].mxu1  ;;  %v4745_v22 = vpop.eup %4744  ;;  %4764 = vpow2.f32 %v4106_v14  ;;  %v4037_v14 = vmul.f32 -1.442695, %v1165_v41 }
 0x153   : > { %v4747_v51 = vpop.eup %4746  ;;  %4766 = vpow2.f32 %v4105_v16  ;;  %2843 = vperm.xlu0 %4600, %v4739_v20   ;;  %v5781_v37 = vpop.f32.mrb[44].mxu0 }
 0x154   : > { %v4749_v54 = vpop.eup %4748  ;;  %4768 = vpow2.f32 %v4036_v31  ;;  %v5783_v57 = vpop.f32.mrb[44].mxu1 }
 0x155   : > { %v4751_v10 = vpop.eup %4750  ;;  %4770 = vpow2.f32 %v4035_v45  ;;  %v5785_v11 = vpop.f32.mrb[45].mxu0  ;;  %3208 = vperm.xlu1 %4601, %v4741_v30  }
 0x156   : > { %v5787_v13 = vpop.f32.mrb[45].mxu1  ;;  %v4753_v40 = vpop.eup %4752  ;;  %4772 = vpow2.f32 %v4108_v50 }
 0x157   : > { %v4755_v20 = vpop.eup %4754  ;;  %3203 = vperm.xlu0 %4600, %v4743_v17   ;;  %4774 = vpow2.f32 %v4107_v1  ;;  %v5791_v63 = vpop.f32.mrb[46].mxu0 }
 0x158   : > { %v5789_v16 = vpop.eup %4756  ;;  %4776 = vpow2.f32 %v4038_v61  ;;  %v5793_v27 = vpop.f32.mrb[46].mxu1 }
 0x159   : > { %v4759_v31 = vpop.eup %4758  ;;  %4778 = vpow2.f32 %v4037_v14  ;;  %v5795_v34 = vpop.f32.mrb[47].mxu0  ;;  %2858 = vperm.xlu1 %4601, %v4745_v22  }
 0x15a   : > { %v5797_v35 = vpop.f32.mrb[47].mxu1  ;;  %v4761_v30 = vpop.eup %4760  ;;  %v2285_v45 = vadd.f32 1.0, %v4759_v31  ;;  %4780 = vpow2.f32 %v4110_v24 }
 0x15b   : > { %v4763_v17 = vpop.eup %4762  ;;  %v2216_v41 = vadd.f32 1.0, %v4761_v30  ;;  %2853 = vperm.xlu0 %4600, %v4747_v51   ;;  %4782 = vpow2.f32 %v4109_v47  ;;  %v5799_v1 = vpop.f32.mrb[48].mxu0  ;;  %v428_v51 = vld [vmem:[%s5556_s23 + $0xd8] sm:$0xff] }
 0x15c   : > { %v4765_v50 = vpop.eup %4764  ;;  %4784 = vrcp.f32 %v2285_v45  ;;  %v2215_v32 = vadd.f32 1.0, %v4763_v17  ;;  %6583 = vst [vmem:[#allocation2_spill] sm:$0xff] %v5799_v1  ;;  %v5801_v14 = vpop.f32.mrb[49].mxu0  ;;  %v427_v17 = vld [vmem:[%s5556_s23 + $0xd0] sm:$0xff] }
 0x15d   : > { %v4767_v52 = vpop.eup %4766  ;;  %4786 = vrcp.f32 %v2216_v41  ;;  %v2288_v61 = vadd.f32 1.0, %v4765_v50  ;;  %6584 = vst [vmem:[#allocation3_spill] sm:$0xff] %v5801_v14  ;;  %v5803_v31 = vpop.f32.mrb[48].mxu1  ;;  %3218 = vperm.xlu1 %4601, %v4749_v54   ;;  %v500_v14 = vld [vmem:[%s5556_s23 + $0x318] sm:$0xff]  ;;  %v1180_v54 = vadd.f32 %v5661_v59, %v428_v51 }
 0x15e   : > { %6585 = vst [vmem:[#allocation4_spill] sm:$0xff] %v5803_v31  ;;  %v4769_v22 = vpop.eup %4768  ;;  %4788 = vrcp.f32 %v2215_v32  ;;  %v2287_v24 = vadd.f32 1.0, %v4767_v52  ;;  %v5806_v47 = vpop.f32.mrb[49].mxu1  ;;  %v499_v52 = vld [vmem:[%s5556_s23 + $0x310] sm:$0xff]  ;;  %v1540_v51 = vadd.f32 %v5667_v18, %v500_v14 }
 0x15f   : > { %6586 = vst [vmem:[#allocation5_spill] sm:$0xff] %v5806_v47  ;;  %v4771_v30 = vpop.eup %4770  ;;  %4790 = vrcp.f32 %v2288_v61  ;;  %v2218_v45 = vadd.f32 1.0, %v4769_v22  ;;  %3213 = vperm.xlu0 %4600, %v4751_v10   ;;  %v5810_v1 = vpop.f32.mrb[50].mxu0 }
 0x160   : > { %v4773_v41 = vpop.eup %4772  ;;  %4792 = vrcp.f32 %v2287_v24  ;;  %v2217_v50 = vadd.f32 1.0, %v4771_v30  ;;  %6587 = vst [vmem:[#allocation6_spill] sm:$0xff] %v5810_v1  ;;  %v5814_v47 = vpop.f32.mrb[51].mxu0  ;;  %v1175_v24 = vadd.f32 %v5665_v6, %v427_v17  ;;  %v430_v30 = vld [vmem:[%s5556_s23 + $0xe8] sm:$0xff] }
 0x161   : > { %v4775_v31 = vpop.eup %4774  ;;  %4794 = vrcp.f32 %v2218_v45  ;;  %v2290_v32 = vadd.f32 1.0, %v4773_v41  ;;  %6588 = vst [vmem:[#allocation7_spill] sm:$0xff] %v5814_v47  ;;  %v5816_v61 = vpop.f32.mrb[50].mxu1  ;;  %2868 = vperm.xlu1 %4601, %v4753_v40   ;;  %v429_v41 = vld [vmem:[%s5556_s23 + $0xe0] sm:$0xff] }
 0x162   : > { %6589 = vst [vmem:[#allocation8_spill] sm:$0xff] %v5816_v61  ;;  %v4777_v10 = vpop.eup %4776  ;;  %4796 = vrcp.f32 %v2217_v50  ;;  %v2289_v22 = vadd.f32 1.0, %v4775_v31  ;;  %v5820_v1 = vpop.f32.mrb[51].mxu1  ;;  %v1535_v50 = vadd.f32 %v5672_v12, %v499_v52  ;;  %v502_v31 = vld [vmem:[%s5556_s23 + $0x328] sm:$0xff]  ;;  %v4039_v12 = vmul.f32 -1.442695, %v1175_v24 }
 0x163   : > { %6590 = vst [vmem:[#allocation9_spill] sm:$0xff] %v5820_v1  ;;  %v4779_v45 = vpop.eup %4778  ;;  %4798 = vrcp.f32 %v2290_v32  ;;  %v2220_v59 = vadd.f32 1.0, %v4777_v10  ;;  %2863 = vperm.xlu0 %4600, %v4755_v20   ;;  %v5826_v40 = vpop.f32.mrb[52].mxu0  ;;  %v4040_v1 = vmul.f32 -1.442695, %v1180_v54  ;;  %v1190_v32 = vadd.f32 %v5678_v26, %v430_v30  ;;  %v501_v10 = vld [vmem:[%s5556_s23 + $0x320] sm:$0xff] }
 0x164   : > { %v4781_v47 = vpop.eup %4780  ;;  %4800 = vrcp.f32 %v2289_v22  ;;  %v2219_v61 = vadd.f32 1.0, %v4779_v45  ;;  %v5830_v20 = vpop.f32.mrb[53].mxu0  ;;  %v1185_v52 = vadd.f32 %v5684_v33, %v429_v41  ;;  %v432_v45 = vld [vmem:[%s5556_s23 + $0xf8] sm:$0xff]  ;;  %v4112_v26 = vmul.f32 -1.442695, %v1540_v51  ;;  %v503_v51 = vld [vmem:[%s5556_s23 + $0x330] sm:$0xff] }
 0x165   : > { %v4783_v6 = vpop.eup %4782  ;;  %4802 = vrcp.f32 %v2220_v59  ;;  %v2292_v17 = vadd.f32 1.0, %v4781_v47  ;;  %v5832_v18 = vpop.f32.mrb[52].mxu1  ;;  %3228 = vperm.xlu1 %4601, %v5789_v16   ;;  %v1550_v30 = vadd.f32 %v5680_v29, %v502_v31  ;;  %v431_v59 = vld [vmem:[%s5556_s23 + $0xf0] sm:$0xff]  ;;  %v1545_v24 = vadd.f32 %v5686_v38, %v501_v10  ;;  %v504_v16 = vld [vmem:[%s5556_s23 + $0x338] sm:$0xff]  ;;  %v434_v10 = vld [vmem:[%s5556_s23 + $0x108] sm:$0xff] }
 0x166   : > { %6591 = vst [vmem:[#allocation10_spill] sm:$0xff] %v5832_v18  ;;  %v4785_v14 = vpop.eup %4784  ;;  %4804 = vrcp.f32 %v2219_v61  ;;  %v2291_v22 = vadd.f32 1.0, %v4783_v6  ;;  %v5837_v47 = vpop.f32.mrb[53].mxu1  ;;  %v4111_v61 = vmul.f32 -1.442695, %v1535_v50  ;;  %v1195_v50 = vadd.f32 %v5697_v53, %v431_v59 }
 0x167   : > { %6592 = vst [vmem:[#allocation11_spill] sm:$0xff] %v5837_v47  ;;  %v4787_v54 = vpop.eup %4786  ;;  %4806 = vrcp.f32 %v2292_v17  ;;  %3223 = vperm.xlu0 %4600, %v4785_v14   ;;  %v5843_v6 = vpop.f32.mrb[54].mxu0  ;;  %v4042_v17 = vmul.f32 -1.442695, %v1190_v32  ;;  %v1200_v14 = vadd.f32 %v5692_v49, %v432_v45  ;;  %v4041_v38 = vmul.f32 -1.442695, %v1185_v52 }
 0x168   : > { %v4789_v18 = vpop.eup %4788  ;;  %4808 = vrcp.f32 %v2291_v22  ;;  %v5845_v33 = vpop.f32.mrb[54].mxu1  ;;  %v4113_v49 = vmul.f32 -1.442695, %v1545_v24  ;;  %v1555_v45 = vadd.f32 %v5699_v55, %v503_v51  ;;  %v1210_v53 = vadd.f32 %v5701_v62, %v434_v10 }
 0x169   : > { %6593 = vst [vmem:[#allocation12_spill] sm:$0xff] %v5845_v33  ;;  %v4791_v41 = vpop.eup %4790  ;;  %4810 = vpow2.f32 %v4040_v1  ;;  %v5849_v47 = vpop.f32.mrb[55].mxu0  ;;  %2878 = vperm.xlu1 %4601, %v4787_v54   ;;  %v4114_v33 = vmul.f32 -1.442695, %v1550_v30  ;;  %v1560_v1 = vadd.f32 %v5694_v2, %v504_v16  ;;  %v4044_v52 = vmul.f32 -1.442695, %v1200_v14 }
 0x16a   : > { %6594 = vst [vmem:[#allocation13_spill] sm:$0xff] %v5849_v47  ;;  %v5851_v29 = vpop.f32.mrb[55].mxu1  ;;  %v4793_v31 = vpop.eup %4792  ;;  %4812 = vpow2.f32 %v4039_v12  ;;  %v4043_v2 = vmul.f32 -1.442695, %v1195_v50 }
 0x16b   : > { %6595 = vst [vmem:[#allocation14_spill] sm:$0xff] %v5851_v29  ;;  %v4795_v22 = vpop.eup %4794  ;;  %4814 = vpow2.f32 %v4112_v26  ;;  %2873 = vperm.xlu0 %4600, %v4789_v18   ;;  %v5857_v47 = vpop.f32.mrb[56].mxu0  ;;  %v4116_v55 = vmul.f32 -1.442695, %v1560_v1 }
 0x16c   : > { %v4797_v32 = vpop.eup %4796  ;;  %4816 = vpow2.f32 %v4111_v61  ;;  %v5859_v29 = vpop.f32.mrb[56].mxu1  ;;  %v4115_v61 = vmul.f32 -1.442695, %v1555_v45 }
 0x16d   : > { %v4799_v12 = vpop.eup %4798  ;;  %4818 = vpow2.f32 %v4042_v17  ;;  %v5862_v54 = vpop.f32.mrb[57].mxu0  ;;  %3238 = vperm.xlu1 %4601, %v4791_v41   ;;  %v4046_v17 = vmul.f32 -1.442695, %v1210_v53 }
 0x16e   : > { %v5864_v18 = vpop.f32.mrb[57].mxu1  ;;  %v4801_v26 = vpop.eup %4800  ;;  %4820 = vpow2.f32 %v4041_v38 }
 0x16f   : > { %v4803_v30 = vpop.eup %4802  ;;  %3233 = vperm.xlu0 %4600, %v4793_v31   ;;  %4822 = vpow2.f32 %v4114_v33  ;;  %v5866_v24 = vpop.f32.mrb[58].mxu0 }
 0x170   : > { %v4805_v59 = vpop.eup %4804  ;;  %4824 = vpow2.f32 %v4113_v49  ;;  %v5868_v16 = vpop.f32.mrb[58].mxu1 }
 0x171   : > { %v5870_v62 = vpop.eup %4806  ;;  %4826 = vpow2.f32 %v4044_v52  ;;  %v5872_v14 = vpop.f32.mrb[59].mxu0  ;;  %2888 = vperm.xlu1 %4601, %v4795_v22  }
 0x172   : > { %v5874_v51 = vpop.f32.mrb[59].mxu1  ;;  %v5876_v41 = vpop.eup %4808  ;;  %4828 = vpow2.f32 %v4043_v2 }
 0x173   : > { %v4811_v33 = vpop.eup %4810  ;;  %2883 = vperm.xlu0 %4600, %v4797_v32   ;;  %4830 = vpow2.f32 %v4116_v55  ;;  %v5878_v50 = vpop.f32.mrb[60].mxu0 }
 0x174   : > { %v4813_v31 = vpop.eup %4812  ;;  %v2222_v38 = vadd.f32 1.0, %v4811_v33  ;;  %4832 = vpow2.f32 %v4115_v61  ;;  %v5880_v49 = vpop.f32.mrb[61].mxu0 }
 0x175   : > { %v4815_v10 = vpop.eup %4814  ;;  %v2221_v1 = vadd.f32 1.0, %v4813_v31  ;;  %4834 = vpow2.f32 %v4046_v17  ;;  %6596 = vst [vmem:[#allocation15_spill] sm:$0xff] %v5880_v49  ;;  %v5882_v45 = vpop.f32.mrb[60].mxu1  ;;  %3248 = vperm.xlu1 %4601, %v4799_v12   ;;  %v433_v17 = vld [vmem:[%s5556_s23 + $0x100] sm:$0xff]  ;;  %v508_v49 = vld [vmem:[%s5556_s23 + $0x358] sm:$0xff] }
 0x176   : > { %6597 = vst [vmem:[#allocation16_spill] sm:$0xff] %v5882_v45  ;;  %v4817_v52 = vpop.eup %4816  ;;  %4836 = vrcp.f32 %v2222_v38  ;;  %v2294_v22 = vadd.f32 1.0, %v4815_v10  ;;  %v5884_v32 = vpop.f32.mrb[61].mxu1  ;;  %v506_v45 = vld [vmem:[%s5556_s23 + $0x348] sm:$0xff] }
 0x177   : > { %6598 = vst [vmem:[#allocation17_spill] sm:$0xff] %v5884_v32  ;;  %v4819_v53 = vpop.eup %4818  ;;  %4838 = vrcp.f32 %v2221_v1  ;;  %v2293_v2 = vadd.f32 1.0, %v4817_v52  ;;  %3243 = vperm.xlu0 %4600, %v4801_v26   ;;  %v5887_v33 = vpop.f32.mrb[62].mxu0  ;;  %v505_v1 = vld [vmem:[%s5556_s23 + $0x340] sm:$0xff] }
 0x178   : > { %v4821_v55 = vpop.eup %4820  ;;  %4840 = vrcp.f32 %v2294_v22  ;;  %v2224_v61 = vadd.f32 1.0, %v4819_v53  ;;  %6599 = vst [vmem:[#allocation18_spill] sm:$0xff] %v5887_v33  ;;  %v5890_v10 = vpop.f32.mrb[63].mxu0 }
 0x179   : > { %v4823_v31 = vpop.eup %4822  ;;  %4842 = vrcp.f32 %v2293_v2  ;;  %v2223_v38 = vadd.f32 1.0, %v4821_v55  ;;  %6600 = vst [vmem:[#allocation19_spill] sm:$0xff] %v5890_v10  ;;  %v5892_v12 = vpop.f32.mrb[62].mxu1  ;;  %2898 = vperm.xlu1 %4601, %v4803_v30   ;;  %v1205_v2 = vadd.f32 %v5707_v9, %v433_v17  ;;  %v436_v55 = vld [vmem:[%s5556_s23 + $0x118] sm:$0xff]  ;;  %v1570_v10 = vadd.f32 %v5703_v3, %v506_v45  ;;  %v507_v17 = vld [vmem:[%s5556_s23 + $0x350] sm:$0xff] }
 0x17a   : > { %6601 = vst [vmem:[#allocation20_spill] sm:$0xff] %v5892_v12  ;;  %v4825_v32 = vpop.eup %4824  ;;  %4844 = vrcp.f32 %v2224_v61  ;;  %v2296_v26 = vadd.f32 1.0, %v4823_v31  ;;  %v5895_v52 = vpop.f32.mrb[63].mxu1  ;;  %v435_v61 = vld [vmem:[%s5556_s23 + $0x110] sm:$0xff] }
 0x17b   : > { %6602 = vst [vmem:[#allocation21_spill] sm:$0xff] %v5895_v52  ;;  %v4827_v22 = vpop.eup %4826  ;;  %4846 = vrcp.f32 %v2223_v38  ;;  %v2295_v53 = vadd.f32 1.0, %v4825_v32  ;;  %2893 = vperm.xlu0 %4600, %v4805_v59   ;;  %v1565_v52 = vadd.f32 %v5709_v23, %v505_v1  ;;  %v5903_v38 = vpop.f32.mrb[64].mxu0  ;;  %v1220_v32 = vadd.f32 %v5713_v15, %v436_v55  ;;  %v438_v1 = vld [vmem:[%s5556_s23 + $0x128] sm:$0xff] }
 0x17c   : > { %v4829_v33 = vpop.eup %4828  ;;  %4848 = vrcp.f32 %v2296_v26  ;;  %v2226_v12 = vadd.f32 1.0, %v4827_v22  ;;  %v5908_v3 = vpop.f32.mrb[65].mxu0  ;;  %v4045_v23 = vmul.f32 -1.442695, %v1205_v2  ;;  %v1215_v26 = vadd.f32 %v5715_v21, %v435_v61  ;;  %v510_v2 = vld [vmem:[%s5556_s23 + $0x368] sm:$0xff] }
 0x17d   : > { %v4831_v31 = vpop.eup %4830  ;;  %4850 = vrcp.f32 %v2295_v53  ;;  %v2225_v30 = vadd.f32 1.0, %v4829_v33  ;;  %3258 = vperm.xlu1 %4601, %v5870_v62   ;;  %v4118_v22 = vmul.f32 -1.442695, %v1570_v10  ;;  %v1580_v15 = vadd.f32 %v5717_v25, %v508_v49  ;;  %v437_v53 = vld [vmem:[%s5556_s23 + $0x120] sm:$0xff] }
 0x17e   : > { %v4833_v59 = vpop.eup %4832  ;;  %4852 = vrcp.f32 %v2226_v12  ;;  %v2298_v9 = vadd.f32 1.0, %v4831_v31  ;;  %v4117_v31 = vmul.f32 -1.442695, %v1565_v52  ;;  %v4048_v21 = vmul.f32 -1.442695, %v1220_v32  ;;  %v509_v10 = vld [vmem:[%s5556_s23 + $0x360] sm:$0xff] }
 0x17f   : > { %v4835_v45 = vpop.eup %4834  ;;  %4854 = vrcp.f32 %v2225_v30  ;;  %v2297_v33 = vadd.f32 1.0, %v4833_v59  ;;  %3253 = vperm.xlu0 %4600, %v5876_v41   ;;  %v1575_v30 = vadd.f32 %v5719_v28, %v507_v17  ;;  %v5917_v59 = vpop.f32.mrb[64].mxu1  ;;  %v1230_v61 = vadd.f32 %v5722_v36, %v438_v1  ;;  %v440_v28 = vld [vmem:[%s5556_s23 + $0x138] sm:$0xff] }
 0x180   : > { %v4837_v12 = vpop.eup %4836  ;;  %4856 = vrcp.f32 %v2298_v9  ;;  %v2228_v62 = vadd.f32 1.0, %v4835_v45  ;;  %v5921_v9 = vpop.f32.mrb[65].mxu1  ;;  %v4047_v49 = vmul.f32 -1.442695, %v1215_v26  ;;  %v1225_v52 = vadd.f32 %v5725_v46, %v437_v53 }
 0x181   : > { %v4839_v55 = vpop.eup %4838  ;;  %4858 = vrcp.f32 %v2297_v33  ;;  %2908 = vperm.xlu1 %4601, %v4837_v12   ;;  %6603 = vst [vmem:[#allocation22_spill] sm:$0xff] %v5921_v9  ;;  %v4120_v45 = vmul.f32 -1.442695, %v1580_v15  ;;  %v1590_v33 = vadd.f32 %v5727_v39, %v510_v2  ;;  %v4119_v32 = vmul.f32 -1.442695, %v1575_v30  ;;  %v5928_v1 = vpop.f32.mrb[66].mxu0 }
 0x182   : > { %v4841_v41 = vpop.eup %4840  ;;  %4860 = vrcp.f32 %v2228_v62  ;;  %v439_v62 = vld [vmem:[%s5556_s23 + $0x130] sm:$0xff]  ;;  %v1585_v36 = vadd.f32 %v5730_v44, %v509_v10  ;;  %v1240_v46 = vadd.f32 %v5736_v19, %v440_v28  ;;  %v5931_v26 = vpop.f32.mrb[67].mxu0  ;;  %v4049_v39 = vmul.f32 -1.442695, %v1225_v52 }
 0x183   : > { %v4843_v25 = vpop.eup %4842  ;;  %4862 = vpow2.f32 %v4045_v23  ;;  %2903 = vperm.xlu0 %4600, %v4839_v55   ;;  %v4050_v23 = vmul.f32 -1.442695, %v1230_v61  ;;  %v1235_v15 = vadd.f32 %v5740_v60, %v439_v62  ;;  %v4122_v55 = vmul.f32 -1.442695, %v1590_v33  ;;  %v5934_v30 = vpop.f32.mrb[66].mxu1 }
 0x184   : > { %v4845_v17 = vpop.eup %4844  ;;  %4864 = vpow2.f32 %v4118_v22  ;;  %v4052_v19 = vmul.f32 -1.442695, %v1240_v46 }
 0x185   : > { %v4847_v12 = vpop.eup %4846  ;;  %4866 = vpow2.f32 %v4117_v31  ;;  %3268 = vperm.xlu1 %4601, %v4841_v41   ;;  %v4121_v31 = vmul.f32 -1.442695, %v1585_v36  ;;  %v5936_v41 = vpop.f32.mrb[67].mxu1  ;;  %v4051_v61 = vmul.f32 -1.442695, %v1235_v15 }
 0x186   : > { %v4849_v9 = vpop.eup %4848  ;;  %4868 = vpow2.f32 %v4048_v21  ;;  %v5946_v46 = vpop.f32.mrb[68].mxu1 }
 0x187   : > { %v4851_v22 = vpop.eup %4850  ;;  %4870 = vpow2.f32 %v4047_v49  ;;  %3263 = vperm.xlu0 %4600, %v4843_v25   ;;  %v5940_v25 = vpop.f32.mrb[68].mxu0 }
 0x188   : > { %v4853_v53 = vpop.eup %4852  ;;  %4872 = vpow2.f32 %v4120_v45  ;;  %v5942_v28 = vpop.f32.mrb[69].mxu0 }
 0x189   : > { %v4855_v44 = vpop.eup %4854  ;;  %4874 = vpow2.f32 %v4119_v32  ;;  %2918 = vperm.xlu1 %4601, %v4845_v17   ;;  %v5948_v15 = vpop.f32.mrb[69].mxu1 }
 0x18a   : > { %v4857_v2 = vpop.eup %4856  ;;  %4876 = vpow2.f32 %v4050_v23  ;;  %v511_v23 = vld [vmem:[%s5556_s23 + $0x370] sm:$0xff] }
 0x18b   : > { %v4859_v21 = vpop.eup %4858  ;;  %2913 = vperm.xlu0 %4600, %v4847_v12   ;;  %4878 = vpow2.f32 %v4049_v39  ;;  %v512_v12 = vld [vmem:[%s5556_s23 + $0x378] sm:$0xff] }
 0x18c   : > { %v5938_v10 = vpop.eup %4860  ;;  %4880 = vpow2.f32 %v4122_v55 }
 0x18d   : > { %v4863_v60 = vpop.eup %4862  ;;  %4882 = vpow2.f32 %v4121_v31  ;;  %3278 = vperm.xlu1 %4601, %v4849_v9   ;;  %v1600_v31 = vadd.f32 %v5742_v58, %v512_v12 }
 0x18e   : > { %v4865_v49 = vpop.eup %4864  ;;  %v2227_v52 = vadd.f32 1.0, %v4863_v60  ;;  %4884 = vpow2.f32 %v4052_v19  ;;  %v442_v60 = vld [vmem:[%s5556_s23 + $0x148] sm:$0xff] }
 0x18f   : > { %v4867_v17 = vpop.eup %4866  ;;  %v2300_v45 = vadd.f32 1.0, %v4865_v49  ;;  %3273 = vperm.xlu0 %4600, %v4851_v22   ;;  %4886 = vpow2.f32 %v4051_v61 }
 0x190   : > { %v4869_v33 = vpop.eup %4868  ;;  %4888 = vrcp.f32 %v2227_v52  ;;  %v2299_v62 = vadd.f32 1.0, %v4867_v17  ;;  %v5960_v17 = vpop.f32.mrb[70].mxu0 }
 0x191   : > { %v4871_v32 = vpop.eup %4870  ;;  %4890 = vrcp.f32 %v2300_v45  ;;  %v2230_v36 = vadd.f32 1.0, %v4869_v33  ;;  %2928 = vperm.xlu1 %4601, %v4853_v53   ;;  %v1595_v53 = vadd.f32 %v5747_v43, %v511_v23  ;;  %v2628_v33 = vld [vmem:[%s5955_s26 + $0x8] sm:$0xff]  ;;  %v5964_v12 = vpop.f32.mrb[71].mxu0 }
 0x192   : > { %v4873_v9 = vpop.eup %4872  ;;  %4892 = vrcp.f32 %v2299_v62  ;;  %v2229_v39 = vadd.f32 1.0, %v4871_v32  ;;  %v514_v62 = vld [vmem:[%s5556_s23 + $0x388] sm:$0xff]  ;;  %6604 = vst [vmem:[#allocation23_spill] sm:$0xff] %v5964_v12 }
 0x193   : > { %v4875_v22 = vpop.eup %4874  ;;  %4894 = vrcp.f32 %v2230_v36  ;;  %v2302_v55 = vadd.f32 1.0, %v4873_v9  ;;  %2923 = vperm.xlu0 %4600, %v4855_v44   ;;  %v441_v44 = vld [vmem:[%s5556_s23 + $0x140] sm:$0xff]  ;;  %v4124_v36 = vmul.f32 -1.442695, %v1600_v31  ;;  %v2700_v23 = vld [vmem:[%s5955_s26 + $0x248] sm:$0xff]  ;;  %v1250_v9 = vadd.f32 %v5754_v56, %v442_v60 }
 0x194   : > { %v4877_v19 = vpop.eup %4876  ;;  %4896 = vrcp.f32 %v2229_v39  ;;  %v2301_v61 = vadd.f32 1.0, %v4875_v22  ;;  %v513_v39 = vld [vmem:[%s5556_s23 + $0x380] sm:$0xff] }
 0x195   : > { %v4879_v49 = vpop.eup %4878  ;;  %4898 = vrcp.f32 %v2302_v55  ;;  %v2232_v52 = vadd.f32 1.0, %v4877_v19  ;;  %3288 = vperm.xlu1 %4601, %v4857_v2   ;;  %v4123_v55 = vmul.f32 -1.442695, %v1595_v53  ;;  %v443_v53 = vld [vmem:[%s5556_s23 + $0x150] sm:$0xff] }
 0x196   : > { %v4881_v58 = vpop.eup %4880  ;;  %4900 = vrcp.f32 %v2301_v61  ;;  %v2231_v45 = vadd.f32 1.0, %v4879_v49  ;;  %v1245_v61 = vadd.f32 %v5758_v8, %v441_v44  ;;  %v2627_v8 = vld [vmem:[%s5955_s26] sm:$0xff]  ;;  %v1605_v44 = vadd.f32 %v5764_v7, %v513_v39 }
 0x197   : > { %v4883_v43 = vpop.eup %4882  ;;  %4902 = vrcp.f32 %v2232_v52  ;;  %v2304_v32 = vadd.f32 1.0, %v4881_v58  ;;  %3283 = vperm.xlu0 %4600, %v4859_v21   ;;  %v2779_v19 = vpop.permute.xlu0 %2778  ;;  %v444_v21 = vld [vmem:[%s5556_s23 + $0x158] sm:$0xff]  ;;  %v1610_v52 = vadd.f32 %v5760_v5, %v514_v62  ;;  %v4054_v62 = vmul.f32 -1.442695, %v1250_v9 }
 0x198   : > { %v4885_v22 = vpop.eup %4884  ;;  %4904 = vrcp.f32 %v2231_v45  ;;  %v2303_v2 = vadd.f32 1.0, %v4883_v43  ;;  %v3139_v60 = vpop.permute.xlu1 %3138  ;;  %v3492_v49 = vmul.f32 %v2779_v19, %v2628_v33  ;;  %v4053_v7 = vmul.f32 -1.442695, %v1245_v61 }
 0x199   : > { %v4887_v31 = vpop.eup %4886  ;;  %4906 = vrcp.f32 %v2304_v32  ;;  %v2234_v56 = vadd.f32 1.0, %v4885_v22  ;;  %v5979_v58 = vpop.f32.mrb[70].mxu1  ;;  %v3564_v12 = vmul.f32 %v3139_v60, %v2700_v23  ;;  %2938 = vperm.xlu1 %4601, %v5938_v10   ;;  %v516_v32 = vld [vmem:[%s5556_s23 + $0x398] sm:$0xff]  ;;  %v1260_v23 = vadd.f32 %v5770_v4, %v444_v21  ;;  %v445_v21 = vld [vmem:[%s5556_s23 + $0x160] sm:$0xff] }
 0x19a   : > { %v4889_v45 = vpop.eup %4888  ;;  %4908 = vrcp.f32 %v2303_v2  ;;  %v2233_v43 = vadd.f32 1.0, %v4887_v31  ;;  %v5985_v33 = vpop.f32.mrb[71].mxu1  ;;  %3637 = vst.msk [vmem:[%s5973_s29 + $0x8] sm:$0xff] %vm3635_vm1, %v3492_v49  ;;  %v2630_v22 = vld [vmem:[%s5955_s26 + $0x18] sm:$0xff]  ;;  %v515_v2 = vld [vmem:[%s5556_s23 + $0x390] sm:$0xff]  ;;  %v1255_v39 = vadd.f32 %v5775_v48, %v443_v53  ;;  %v446_v31 = vld [vmem:[%s5556_s23 + $0x168] sm:$0xff]  ;;  %v1620_v4 = vadd.f32 %v5772_v0, %v516_v32 }
 0x19b   : > { %6605 = vst [vmem:[#allocation24_spill] sm:$0xff] %v5985_v33  ;;  %v4891_v5 = vpop.eup %4890  ;;  %4910 = vrcp.f32 %v2234_v56  ;;  %2933 = vperm.xlu0 %4600, %v4889_v45   ;;  %3709 = vst.msk [vmem:[%s5973_s29 + $0x248] sm:$0xff] %vm3635_vm1, %v3564_v12  ;;  %v2774_v10 = vpop.permute.xlu0 %2773  ;;  %v4126_v49 = vmul.f32 -1.442695, %v1610_v52  ;;  %v4125_v61 = vmul.f32 -1.442695, %v1605_v44  ;;  %v1615_v48 = vadd.f32 %v5777_v42, %v515_v2 }
 0x19c   : > { %v4893_v19 = vpop.eup %4892  ;;  %4912 = vrcp.f32 %v2233_v43  ;;  %v2789_v9 = vpop.permute.xlu1 %2788  ;;  %v3491_v60 = vmul.f32 %v2774_v10, %v2627_v8  ;;  %v2699_v43 = vld [vmem:[%s5955_s26 + $0x240] sm:$0xff]  ;;  %v518_v53 = vld [vmem:[%s5556_s23 + $0x3a8] sm:$0xff]  ;;  %v4056_v52 = vmul.f32 -1.442695, %v1260_v23  ;;  %v1270_v0 = vadd.f32 %v5781_v37, %v446_v31 }
 0x19d   : > { %v4895_v56 = vpop.eup %4894  ;;  %4914 = vpow2.f32 %v4124_v36  ;;  %v3494_v12 = vmul.f32 %v2789_v9, %v2630_v22  ;;  %3298 = vperm.xlu1 %4601, %v4891_v5   ;;  %v2702_v36 = vld [vmem:[%s5955_s26 + $0x258] sm:$0xff]  ;;  %v4055_v44 = vmul.f32 -1.442695, %v1255_v39  ;;  %v1265_v42 = vadd.f32 %v5785_v11, %v445_v21  ;;  %v2629_v11 = vld [vmem:[%s5955_s26 + $0x10] sm:$0xff] }
 0x19e   : > { %v4897_v45 = vpop.eup %4896  ;;  %4916 = vpow2.f32 %v4123_v55  ;;  %3636 = vst.msk [vmem:[%s5973_s29] sm:$0xff] %vm3635_vm1, %v3491_v60  ;;  %v4128_v22 = vmul.f32 -1.442695, %v1620_v4  ;;  %v1630_v23 = vadd.f32 %v5783_v57, %v518_v53  ;;  %v4058_v39 = vmul.f32 -1.442695, %v1270_v0 }
 0x19f   : > { %v4899_v33 = vpop.eup %4898  ;;  %4918 = vpow2.f32 %v4054_v62  ;;  %3293 = vperm.xlu0 %4600, %v4893_v19   ;;  %3639 = vst.msk [vmem:[%s5973_s29 + $0x18] sm:$0xff] %vm3635_vm1, %v3494_v12  ;;  %v3134_v55 = vpop.permute.xlu0 %3133  ;;  %v2701_v19 = vld [vmem:[%s5955_s26 + $0x250] sm:$0xff]  ;;  %v2631_v12 = vld [vmem:[%s5955_s26 + $0x20] sm:$0xff] }
 0x1a0   : > { %v4901_v8 = vpop.eup %4900  ;;  %4920 = vpow2.f32 %v4053_v7  ;;  %v3149_v5 = vpop.permute.xlu1 %3148  ;;  %v3563_v62 = vmul.f32 %v3134_v55, %v2699_v43  ;;  %v4127_v7 = vmul.f32 -1.442695, %v1615_v48  ;;  %v4130_v4 = vmul.f32 -1.442695, %v1630_v23  ;;  %v2632_v43 = vld [vmem:[%s5955_s26 + $0x28] sm:$0xff] }
 0x1a1   : > { %v4903_v32 = vpop.eup %4902  ;;  %4922 = vpow2.f32 %v4126_v49  ;;  %v3566_v2 = vmul.f32 %v3149_v5, %v2702_v36  ;;  %2948 = vperm.xlu1 %4601, %v4895_v56   ;;  %v4057_v56 = vmul.f32 -1.442695, %v1265_v42  ;;  %v2703_v5 = vld [vmem:[%s5955_s26 + $0x260] sm:$0xff] }
 0x1a2   : > { %v4905_v37 = vpop.eup %4904  ;;  %4924 = vpow2.f32 %v4125_v61  ;;  %3708 = vst.msk [vmem:[%s5973_s29 + $0x240] sm:$0xff] %vm3635_vm1, %v3563_v62  ;;  %v517_v62 = vld [vmem:[%s5556_s23 + $0x3a0] sm:$0xff] }
 0x1a3   : > { %v6010_v10 = vpop.eup %4906  ;;  %2943 = vperm.xlu0 %4600, %v4897_v45   ;;  %4926 = vpow2.f32 %v4056_v52  ;;  %3711 = vst.msk [vmem:[%s5973_s29 + $0x258] sm:$0xff] %vm3635_vm1, %v3566_v2  ;;  %v3144_v57 = vpop.permute.xlu0 %3143  ;;  %v2704_v2 = vld [vmem:[%s5955_s26 + $0x268] sm:$0xff] }
 0x1a4   : > { %v6015_v31 = vpop.eup %4908  ;;  %4928 = vpow2.f32 %v4055_v44  ;;  %v2784_v60 = vpop.permute.xlu1 %2783  ;;  %v3565_v49 = vmul.f32 %v3144_v57, %v2701_v19 }
 0x1a5   : > { %v6019_v9 = vpop.eup %4910  ;;  %4930 = vpow2.f32 %v4128_v22  ;;  %v3493_v45 = vmul.f32 %v2784_v60, %v2629_v11  ;;  %3308 = vperm.xlu1 %4601, %v4899_v33   ;;  %v1625_v60 = vadd.f32 %v5787_v13, %v517_v62  ;;  %v2634_v13 = vld [vmem:[%s5955_s26 + $0x38] sm:$0xff] }
 0x1a6   : > { %v6021_v21 = vpop.eup %4912  ;;  %4932 = vpow2.f32 %v4127_v7  ;;  %3710 = vst.msk [vmem:[%s5973_s29 + $0x250] sm:$0xff] %vm3635_vm1, %v3565_v49  ;;  %v448_v49 = vld [vmem:[%s5556_s23 + $0x178] sm:$0xff] }
 0x1a7   : > { %v4915_v61 = vpop.eup %4914  ;;  %3303 = vperm.xlu0 %4600, %v4901_v8   ;;  %4934 = vpow2.f32 %v4058_v39  ;;  %3638 = vst.msk [vmem:[%s5973_s29 + $0x10] sm:$0xff] %vm3635_vm1, %v3493_v45  ;;  %v2794_v36 = vpop.permute.xlu0 %2793 }
 0x1a8   : > { %v4917_v48 = vpop.eup %4916  ;;  %v2306_v53 = vadd.f32 1.0, %v4915_v61  ;;  %4936 = vpow2.f32 %v4057_v56  ;;  %v2799_v33 = vpop.permute.xlu1 %2798  ;;  %v3495_v55 = vmul.f32 %v2794_v36, %v2631_v12  ;;  %v447_v12 = vld [vmem:[%s5556_s23 + $0x170] sm:$0xff] }
 0x1a9   : > { %v4919_v52 = vpop.eup %4918  ;;  %v2305_v0 = vadd.f32 1.0, %v4917_v48  ;;  %4938 = vpow2.f32 %v4130_v4  ;;  %v3496_v42 = vmul.f32 %v2799_v33, %v2632_v43  ;;  %2958 = vperm.xlu1 %4601, %v4903_v32   ;;  %v520_v48 = vld [vmem:[%s5556_s23 + $0x3b8] sm:$0xff] }
 0x1aa   : > { %v4921_v44 = vpop.eup %4920  ;;  %4940 = vrcp.f32 %v2306_v53  ;;  %v2236_v8 = vadd.f32 1.0, %v4919_v52  ;;  %3640 = vst.msk [vmem:[%s5973_s29 + $0x20] sm:$0xff] %vm3635_vm1, %v3495_v55  ;;  %v2633_v52 = vld [vmem:[%s5955_s26 + $0x30] sm:$0xff] }
 0x1ab   : > { %v4923_v22 = vpop.eup %4922  ;;  %4942 = vrcp.f32 %v2305_v0  ;;  %v2235_v23 = vadd.f32 1.0, %v4921_v44  ;;  %2953 = vperm.xlu0 %4600, %v4905_v37   ;;  %3641 = vst.msk [vmem:[%s5973_s29 + $0x28] sm:$0xff] %vm3635_vm1, %v3496_v42  ;;  %v3154_v11 = vpop.permute.xlu0 %3153  ;;  %v1280_v0 = vadd.f32 %v5791_v63, %v448_v49  ;;  %v4129_v44 = vmul.f32 -1.442695, %v1625_v60  ;;  %v450_v42 = vld [vmem:[%s5556_s23 + $0x188] sm:$0xff]  ;;  %v6606_v60 = vld [vmem:[#allocation2_spill] sm:$0xff] }
 0x1ac   : > { %v4925_v19 = vpop.eup %4924  ;;  %4944 = vrcp.f32 %v2236_v8  ;;  %v2308_v7 = vadd.f32 1.0, %v4923_v22  ;;  %v3159_v57 = vpop.permute.xlu1 %3158  ;;  %v3567_v56 = vmul.f32 %v3154_v11, %v2703_v5  ;;  %v1640_v63 = vadd.f32 %v5793_v27, %v520_v48  ;;  %v2706_v11 = vld [vmem:[%s5955_s26 + $0x278] sm:$0xff] }
 0x1ad   : > { %v4927_v39 = vpop.eup %4926  ;;  %4946 = vrcp.f32 %v2235_v23  ;;  %v2307_v32 = vadd.f32 1.0, %v4925_v19  ;;  %v3568_v45 = vmul.f32 %v3159_v57, %v2704_v2  ;;  %3318 = vperm.xlu1 %4601, %v6010_v10   ;;  %v519_v10 = vld [vmem:[%s5556_s23 + $0x3b0] sm:$0xff]  ;;  %v449_v2 = vld [vmem:[%s5556_s23 + $0x180] sm:$0xff]  ;;  %v4060_v27 = vmul.f32 -1.442695, %v1280_v0 }
 0x1ae   : > { %v4929_v37 = vpop.eup %4928  ;;  %4948 = vrcp.f32 %v2308_v7  ;;  %v2238_v4 = vadd.f32 1.0, %v4927_v39  ;;  %3712 = vst.msk [vmem:[%s5973_s29 + $0x260] sm:$0xff] %vm3635_vm1, %v3567_v56  ;;  %v1635_v39 = vadd.f32 %v5797_v35, %v519_v10  ;;  %v2705_v56 = vld [vmem:[%s5955_s26 + $0x270] sm:$0xff]  ;;  %v1290_v49 = vadd.f32 %v6606_v60, %v450_v42  ;;  %v6607_v35 = vld [vmem:[#allocation3_spill] sm:$0xff] }
 0x1af   : > { %v4931_v61 = vpop.eup %4930  ;;  %4950 = vrcp.f32 %v2307_v32  ;;  %v2237_v43 = vadd.f32 1.0, %v4929_v37  ;;  %3313 = vperm.xlu0 %4600, %v6015_v31   ;;  %3713 = vst.msk [vmem:[%s5973_s29 + $0x268] sm:$0xff] %vm3635_vm1, %v3568_v45  ;;  %v1275_v31 = vadd.f32 %v5795_v34, %v447_v12  ;;  %v522_v32 = vld [vmem:[%s5556_s23 + $0x3c8] sm:$0xff]  ;;  %v521_v37 = vld [vmem:[%s5556_s23 + $0x3c0] sm:$0xff]  ;;  %v1285_v12 = vadd.f32 %v6607_v35, %v449_v2  ;;  %v451_v0 = vld [vmem:[%s5556_s23 + $0x190] sm:$0xff] }
 0x1b0   : > { %v4933_v53 = vpop.eup %4932  ;;  %4952 = vrcp.f32 %v2238_v4  ;;  %v2310_v36 = vadd.f32 1.0, %v4931_v61  ;;  %v2809_v8 = vpop.permute.xlu1 %2808  ;;  %v452_v61 = vld [vmem:[%s5556_s23 + $0x198] sm:$0xff] }
 0x1b1   : > { %v4935_v33 = vpop.eup %4934  ;;  %4954 = vrcp.f32 %v2237_v43  ;;  %v2309_v55 = vadd.f32 1.0, %v4933_v53  ;;  %v3498_v22 = vmul.f32 %v2809_v8, %v2634_v13  ;;  %2968 = vperm.xlu1 %4601, %v6019_v9   ;;  %v4132_v53 = vmul.f32 -1.442695, %v1640_v63  ;;  %v2636_v8 = vld [vmem:[%s5955_s26 + $0x48] sm:$0xff]  ;;  %v6610_v63 = vld [vmem:[#allocation6_spill] sm:$0xff] }
 0x1b2   : > { %v4937_v5 = vpop.eup %4936  ;;  %4956 = vrcp.f32 %v2310_v36  ;;  %v2240_v62 = vadd.f32 1.0, %v4935_v33  ;;  %v2804_v23 = vpop.permute.xlu0 %2803  ;;  %v6608_v36 = vld [vmem:[#allocation4_spill] sm:$0xff]  ;;  %v1300_v2 = vadd.f32 %v6610_v63, %v452_v61  ;;  %v2707_v61 = vld [vmem:[%s5955_s26 + $0x280] sm:$0xff] }
 0x1b3   : > { %v4939_v19 = vpop.eup %4938  ;;  %4958 = vrcp.f32 %v2309_v55  ;;  %v2239_v7 = vadd.f32 1.0, %v4937_v5  ;;  %v3497_v34 = vmul.f32 %v2804_v23, %v2633_v52  ;;  %2963 = vperm.xlu0 %4600, %v6021_v21   ;;  %3643 = vst.msk [vmem:[%s5973_s29 + $0x38] sm:$0xff] %vm3635_vm1, %v3498_v22  ;;  %v4059_v21 = vmul.f32 -1.442695, %v1275_v31  ;;  %v6609_v31 = vld [vmem:[#allocation5_spill] sm:$0xff]  ;;  %v2635_v22 = vld [vmem:[%s5955_s26 + $0x40] sm:$0xff] }
 0x1b4   : > { %v4941_v57 = vpop.eup %4940  ;;  %4960 = vrcp.f32 %v2240_v62  ;;  %v2312_v9 = vadd.f32 1.0, %v4939_v19  ;;  %v3169_v45 = vpop.permute.xlu1 %3168  ;;  %v1650_v52 = vadd.f32 %v6608_v36, %v522_v32  ;;  %v4131_v55 = vmul.f32 -1.442695, %v1635_v39  ;;  %v524_v5 = vld [vmem:[%s5556_s23 + $0x3d8] sm:$0xff]  ;;  %v523_v19 = vld [vmem:[%s5556_s23 + $0x3d0] sm:$0xff] }
 0x1b5   : > { %v4943_v4 = vpop.eup %4942  ;;  %4962 = vrcp.f32 %v2239_v7  ;;  %3642 = vst.msk [vmem:[%s5973_s29 + $0x30] sm:$0xff] %vm3635_vm1, %v3497_v34  ;;  %v3570_v13 = vmul.f32 %v3169_v45, %v2706_v11  ;;  %3328 = vperm.xlu1 %4601, %v4941_v57   ;;  %v1645_v42 = vadd.f32 %v6609_v31, %v521_v37  ;;  %v4062_v23 = vmul.f32 -1.442695, %v1290_v49  ;;  %v6611_v11 = vld [vmem:[#allocation7_spill] sm:$0xff]  ;;  %v6613_v45 = vld [vmem:[#allocation9_spill] sm:$0xff] }
 0x1b6   : > { %v4945_v43 = vpop.eup %4944  ;;  %4964 = vrcp.f32 %v2312_v9  ;;  %v3164_v48 = vpop.permute.xlu0 %3163  ;;  %v4061_v34 = vmul.f32 -1.442695, %v1285_v12  ;;  %v1295_v39 = vadd.f32 %v6611_v11, %v451_v0  ;;  %v1655_v35 = vadd.f32 %v6613_v45, %v523_v19  ;;  %v2710_v11 = vld [vmem:[%s5955_s26 + $0x298] sm:$0xff]  ;;  %v453_v45 = vld [vmem:[%s5556_s23 + $0x1a0] sm:$0xff] }
 0x1b7   : > { %v4947_v10 = vpop.eup %4946  ;;  %4966 = vpow2.f32 %v4129_v44  ;;  %v3569_v33 = vmul.f32 %v3164_v48, %v2705_v56  ;;  %3323 = vperm.xlu0 %4600, %v4943_v4   ;;  %3715 = vst.msk [vmem:[%s5973_s29 + $0x278] sm:$0xff] %vm3635_vm1, %v3570_v13  ;;  %v6612_v56 = vld [vmem:[#allocation8_spill] sm:$0xff]  ;;  %v2708_v4 = vld [vmem:[%s5955_s26 + $0x288] sm:$0xff]  ;;  %v4064_v13 = vmul.f32 -1.442695, %v1300_v2 }
 0x1b8   : > { %v4949_v62 = vpop.eup %4948  ;;  %4968 = vpow2.f32 %v4060_v27  ;;  %v2819_v44 = vpop.permute.xlu1 %2818  ;;  %v4134_v27 = vmul.f32 -1.442695, %v1650_v52  ;;  %v1660_v60 = vadd.f32 %v6612_v56, %v524_v5  ;;  %v4135_v31 = vmul.f32 -1.442695, %v1655_v35  ;;  %v2637_v5 = vld [vmem:[%s5955_s26 + $0x50] sm:$0xff] }
 0x1b9   : > { %v4951_v7 = vpop.eup %4950  ;;  %4970 = vpow2.f32 %v4059_v21  ;;  %3714 = vst.msk [vmem:[%s5973_s29 + $0x270] sm:$0xff] %vm3635_vm1, %v3569_v33  ;;  %v3500_v57 = vmul.f32 %v2819_v44, %v2636_v8  ;;  %2978 = vperm.xlu1 %4601, %v4945_v43   ;;  %v4133_v21 = vmul.f32 -1.442695, %v1645_v42  ;;  %v2638_v8 = vld [vmem:[%s5955_s26 + $0x58] sm:$0xff] }
 0x1ba   : > { %v4953_v32 = vpop.eup %4952  ;;  %4972 = vpow2.f32 %v4132_v53  ;;  %v2814_v9 = vpop.permute.xlu0 %2813  ;;  %v4063_v53 = vmul.f32 -1.442695, %v1295_v39 }
 0x1bb   : > { %v4955_v49 = vpop.eup %4954  ;;  %4974 = vpow2.f32 %v4131_v55  ;;  %v3499_v37 = vmul.f32 %v2814_v9, %v2635_v22  ;;  %2973 = vperm.xlu0 %4600, %v4947_v10   ;;  %3645 = vst.msk [vmem:[%s5973_s29 + $0x48] sm:$0xff] %vm3635_vm1, %v3500_v57  ;;  %v4136_v10 = vmul.f32 -1.442695, %v1660_v60  ;;  %v2709_v9 = vld [vmem:[%s5955_s26 + $0x290] sm:$0xff]  ;;  %v454_v60 = vld [vmem:[%s5556_s23 + $0x1a8] sm:$0xff] }
 0x1bc   : > { %v4957_v12 = vpop.eup %4956  ;;  %4976 = vpow2.f32 %v4062_v23  ;;  %v3179_v48 = vpop.permute.xlu1 %3178 }
 0x1bd   : > { %v4959_v43 = vpop.eup %4958  ;;  %3644 = vst.msk [vmem:[%s5973_s29 + $0x40] sm:$0xff] %vm3635_vm1, %v3499_v37  ;;  %4978 = vpow2.f32 %v4061_v34  ;;  %v3572_v52 = vmul.f32 %v3179_v48, %v2708_v4  ;;  %3338 = vperm.xlu1 %4601, %v4949_v62   ;;  %v2640_v48 = vld [vmem:[%s5955_s26 + $0x68] sm:$0xff] }
 0x1be   : > { %v6089_v36 = vpop.eup %4960  ;;  %v3174_v0 = vpop.permute.xlu0 %3173  ;;  %4980 = vpow2.f32 %v4134_v27 }
 0x1bf   : > { %v6091_v33 = vpop.eup %4962  ;;  %v3571_v55 = vmul.f32 %v3174_v0, %v2707_v61  ;;  %3333 = vperm.xlu0 %4600, %v4951_v7   ;;  %4982 = vpow2.f32 %v4133_v21  ;;  %3717 = vst.msk [vmem:[%s5973_s29 + $0x288] sm:$0xff] %vm3635_vm1, %v3572_v52  ;;  %v2639_v0 = vld [vmem:[%s5955_s26 + $0x60] sm:$0xff] }
 0x1c0   : > { %v6094_v42 = vpop.eup %4964  ;;  %4984 = vpow2.f32 %v4064_v13  ;;  %v2829_v62 = vpop.permute.xlu1 %2828 }
 0x1c1   : > { %v4967_v22 = vpop.eup %4966  ;;  %3716 = vst.msk [vmem:[%s5973_s29 + $0x280] sm:$0xff] %vm3635_vm1, %v3571_v55  ;;  %4986 = vpow2.f32 %v4063_v53  ;;  %v3502_v2 = vmul.f32 %v2829_v62, %v2638_v8  ;;  %2988 = vperm.xlu1 %4601, %v4953_v32   ;;  %v526_v55 = vld [vmem:[%s5556_s23 + $0x3e8] sm:$0xff] }
 0x1c2   : > { %v4969_v23 = vpop.eup %4968  ;;  %v2311_v63 = vadd.f32 1.0, %v4967_v22  ;;  %v2824_v19 = vpop.permute.xlu0 %2823  ;;  %4988 = vpow2.f32 %v4136_v10  ;;  %v1310_v10 = vadd.f32 %v5826_v40, %v454_v60  ;;  %v456_v40 = vld [vmem:[%s5556_s23 + $0x1b8] sm:$0xff] }
 0x1c3   : > { %v4971_v7 = vpop.eup %4970  ;;  %v2242_v44 = vadd.f32 1.0, %v4969_v23  ;;  %v3501_v34 = vmul.f32 %v2824_v19, %v2637_v5  ;;  %2983 = vperm.xlu0 %4600, %v4955_v49   ;;  %4990 = vpow2.f32 %v4135_v31  ;;  %3647 = vst.msk [vmem:[%s5973_s29 + $0x58] sm:$0xff] %vm3635_vm1, %v3502_v2  ;;  %v525_v5 = vld [vmem:[%s5556_s23 + $0x3e0] sm:$0xff] }
 0x1c4   : > { %v4973_v39 = vpop.eup %4972  ;;  %4992 = vrcp.f32 %v2311_v63  ;;  %v2241_v57 = vadd.f32 1.0, %v4971_v7  ;;  %v3189_v32 = vpop.permute.xlu1 %3188 }
 0x1c5   : > { %v4975_v27 = vpop.eup %4974  ;;  %4994 = vrcp.f32 %v2242_v44  ;;  %v2314_v56 = vadd.f32 1.0, %v4973_v39  ;;  %3646 = vst.msk [vmem:[%s5973_s29 + $0x50] sm:$0xff] %vm3635_vm1, %v3501_v34  ;;  %v3574_v4 = vmul.f32 %v3189_v32, %v2710_v11  ;;  %3348 = vperm.xlu1 %4601, %v4957_v12   ;;  %v6614_v44 = vld [vmem:[#allocation10_spill] sm:$0xff]  ;;  %v455_v11 = vld [vmem:[%s5556_s23 + $0x1b0] sm:$0xff]  ;;  %v528_v32 = vld [vmem:[%s5556_s23 + $0x3f8] sm:$0xff] }
 0x1c6   : > { %v4977_v37 = vpop.eup %4976  ;;  %4996 = vrcp.f32 %v2241_v57  ;;  %v2313_v49 = vadd.f32 1.0, %v4975_v27  ;;  %v3184_v21 = vpop.permute.xlu0 %3183  ;;  %v1670_v34 = vadd.f32 %v6614_v44, %v526_v55  ;;  %v6615_v27 = vld [vmem:[#allocation11_spill] sm:$0xff]  ;;  %v2642_v55 = vld [vmem:[%s5955_s26 + $0x78] sm:$0xff] }
 0x1c7   : > { %v4979_v35 = vpop.eup %4978  ;;  %4998 = vrcp.f32 %v2314_v56  ;;  %v2244_v61 = vadd.f32 1.0, %v4977_v37  ;;  %v3573_v13 = vmul.f32 %v3184_v21, %v2709_v9  ;;  %3343 = vperm.xlu0 %4600, %v4959_v43   ;;  %3719 = vst.msk [vmem:[%s5973_s29 + $0x298] sm:$0xff] %vm3635_vm1, %v3574_v4  ;;  %v1305_v43 = vadd.f32 %v5830_v20, %v453_v45  ;;  %v2712_v20 = vld [vmem:[%s5955_s26 + $0x2a8] sm:$0xff]  ;;  %v2711_v9 = vld [vmem:[%s5955_s26 + $0x2a0] sm:$0xff]  ;;  %v527_v21 = vld [vmem:[%s5556_s23 + $0x3f0] sm:$0xff] }
 0x1c8   : > { %v4981_v53 = vpop.eup %4980  ;;  %5000 = vrcp.f32 %v2313_v49  ;;  %v2243_v52 = vadd.f32 1.0, %v4979_v35  ;;  %v2839_v31 = vpop.permute.xlu1 %2838  ;;  %v1665_v56 = vadd.f32 %v6615_v27, %v525_v5  ;;  %v1320_v4 = vadd.f32 %v5843_v6, %v456_v40  ;;  %v2641_v5 = vld [vmem:[%s5955_s26 + $0x70] sm:$0xff]  ;;  %v2714_v27 = vld [vmem:[%s5955_s26 + $0x2b8] sm:$0xff] }
 0x1c9   : > { %v4983_v12 = vpop.eup %4982  ;;  %5002 = vrcp.f32 %v2244_v61  ;;  %v2316_v8 = vadd.f32 1.0, %v4981_v53  ;;  %3718 = vst.msk [vmem:[%s5973_s29 + $0x290] sm:$0xff] %vm3635_vm1, %v3573_v13  ;;  %v3504_v23 = vmul.f32 %v2839_v31, %v2640_v48  ;;  %2998 = vperm.xlu1 %4601, %v6089_v36   ;;  %v4066_v36 = vmul.f32 -1.442695, %v1310_v10  ;;  %v6616_v48 = vld [vmem:[#allocation13_spill] sm:$0xff]  ;;  %v457_v31 = vld [vmem:[%s5556_s23 + $0x1c0] sm:$0xff] }
 0x1ca   : > { %v4985_v22 = vpop.eup %4984  ;;  %5004 = vrcp.f32 %v2243_v52  ;;  %v2315_v62 = vadd.f32 1.0, %v4983_v12  ;;  %v2834_v63 = vpop.permute.xlu0 %2833  ;;  %v1315_v53 = vadd.f32 %v6616_v48, %v455_v11  ;;  %v458_v52 = vld [vmem:[%s5556_s23 + $0x1c8] sm:$0xff]  ;;  %v4138_v6 = vmul.f32 -1.442695, %v1670_v34  ;;  %v6617_v12 = vld [vmem:[#allocation12_spill] sm:$0xff] }
 0x1cb   : > { %v4987_v2 = vpop.eup %4986  ;;  %5006 = vrcp.f32 %v2316_v8  ;;  %v2246_v19 = vadd.f32 1.0, %v4985_v22  ;;  %v3503_v7 = vmul.f32 %v2834_v63, %v2639_v0  ;;  %2993 = vperm.xlu0 %4600, %v6091_v33   ;;  %3649 = vst.msk [vmem:[%s5973_s29 + $0x68] sm:$0xff] %vm3635_vm1, %v3504_v23  ;;  %v4065_v33 = vmul.f32 -1.442695, %v1305_v43  ;;  %v6618_v22 = vld [vmem:[#allocation14_spill] sm:$0xff]  ;;  %v530_v23 = vld [vmem:[%s5556_s23 + $0x408] sm:$0xff] }
 0x1cc   : > { %v4989_v39 = vpop.eup %4988  ;;  %5008 = vrcp.f32 %v2315_v62  ;;  %v2245_v57 = vadd.f32 1.0, %v4987_v2  ;;  %v3199_v49 = vpop.permute.xlu1 %3198  ;;  %v1680_v8 = vadd.f32 %v6617_v12, %v528_v32  ;;  %v1675_v62 = vadd.f32 %v6618_v22, %v527_v21  ;;  %v2644_v48 = vld [vmem:[%s5955_s26 + $0x88] sm:$0xff] }
 0x1cd   : > { %v4991_v60 = vpop.eup %4990  ;;  %5010 = vrcp.f32 %v2246_v19  ;;  %v2318_v37 = vadd.f32 1.0, %v4989_v39  ;;  %3648 = vst.msk [vmem:[%s5973_s29 + $0x60] sm:$0xff] %vm3635_vm1, %v3503_v7  ;;  %v3576_v61 = vmul.f32 %v3199_v49, %v2712_v20  ;;  %3358 = vperm.xlu1 %4601, %v6094_v42   ;;  %v4137_v42 = vmul.f32 -1.442695, %v1665_v56  ;;  %v529_v7 = vld [vmem:[%s5556_s23 + $0x400] sm:$0xff] }
 0x1ce   : > { %v4993_v45 = vpop.eup %4992  ;;  %5012 = vrcp.f32 %v2245_v57  ;;  %v2317_v35 = vadd.f32 1.0, %v4991_v60  ;;  %v3194_v13 = vpop.permute.xlu0 %3193  ;;  %v4068_v2 = vmul.f32 -1.442695, %v1320_v4  ;;  %v1330_v19 = vadd.f32 %v5857_v47, %v458_v52  ;;  %v460_v57 = vld [vmem:[%s5556_s23 + $0x1d8] sm:$0xff]  ;;  %v2713_v60 = vld [vmem:[%s5955_s26 + $0x2b0] sm:$0xff] }
 0x1cf   : > { %v4995_v0 = vpop.eup %4994  ;;  %5014 = vrcp.f32 %v2318_v37  ;;  %v3575_v10 = vmul.f32 %v3194_v13, %v2711_v9  ;;  %3353 = vperm.xlu0 %4600, %v4993_v45   ;;  %3721 = vst.msk [vmem:[%s5973_s29 + $0x2a8] sm:$0xff] %vm3635_vm1, %v3576_v61  ;;  %v4067_v11 = vmul.f32 -1.442695, %v1315_v53  ;;  %v1325_v39 = vadd.f32 %v5862_v54, %v457_v31 }
 0x1d0   : > { %v4997_v43 = vpop.eup %4996  ;;  %5016 = vrcp.f32 %v2317_v35  ;;  %v2849_v40 = vpop.permute.xlu1 %2848  ;;  %v4140_v56 = vmul.f32 -1.442695, %v1680_v8  ;;  %v1690_v47 = vadd.f32 %v5859_v29, %v530_v23  ;;  %v4139_v37 = vmul.f32 -1.442695, %v1675_v62  ;;  %v2715_v23 = vld [vmem:[%s5955_s26 + $0x2c0] sm:$0xff] }
 0x1d1   : > { %v4999_v63 = vpop.eup %4998  ;;  %5018 = vpow2.f32 %v4066_v36  ;;  %3720 = vst.msk [vmem:[%s5973_s29 + $0x2a0] sm:$0xff] %vm3635_vm1, %v3575_v10  ;;  %v3506_v44 = vmul.f32 %v2849_v40, %v2642_v55  ;;  %3008 = vperm.xlu1 %4601, %v4995_v0   ;;  %v4070_v4 = vmul.f32 -1.442695, %v1330_v19  ;;  %v1340_v21 = vadd.f32 %v5866_v24, %v460_v57  ;;  %v2643_v24 = vld [vmem:[%s5955_s26 + $0x80] sm:$0xff] }
 0x1d2   : > { %v5001_v20 = vpop.eup %5000  ;;  %5020 = vpow2.f32 %v4065_v33  ;;  %v2844_v34 = vpop.permute.xlu0 %2843  ;;  %v1685_v33 = vadd.f32 %v5864_v18, %v529_v7  ;;  %v4069_v61 = vmul.f32 -1.442695, %v1325_v39  ;;  %v4142_v53 = vmul.f32 -1.442695, %v1690_v47 }
 0x1d3   : > { %v5003_v36 = vpop.eup %5002  ;;  %5022 = vpow2.f32 %v4138_v6  ;;  %v3505_v9 = vmul.f32 %v2844_v34, %v2641_v5  ;;  %3003 = vperm.xlu0 %4600, %v4997_v43   ;;  %3651 = vst.msk [vmem:[%s5973_s29 + $0x78] sm:$0xff] %vm3635_vm1, %v3506_v44  ;;  %v4072_v55 = vmul.f32 -1.442695, %v1340_v21  ;;  %v2716_v5 = vld [vmem:[%s5955_s26 + $0x2c8] sm:$0xff]  ;;  %v459_v34 = vld [vmem:[%s5556_s23 + $0x1d0] sm:$0xff] }
 0x1d4   : > { %v5005_v32 = vpop.eup %5004  ;;  %5024 = vpow2.f32 %v4137_v42  ;;  %v3209_v54 = vpop.permute.xlu1 %3208  ;;  %v4141_v0 = vmul.f32 -1.442695, %v1685_v33  ;;  %v532_v33 = vld [vmem:[%s5556_s23 + $0x418] sm:$0xff] }
 0x1d5   : > { %v5007_v49 = vpop.eup %5006  ;;  %3650 = vst.msk [vmem:[%s5973_s29 + $0x70] sm:$0xff] %vm3635_vm1, %v3505_v9  ;;  %5026 = vpow2.f32 %v4068_v2  ;;  %v3578_v45 = vmul.f32 %v3209_v54, %v2714_v27  ;;  %3368 = vperm.xlu1 %4601, %v4999_v63  }
 0x1d6   : > { %v5009_v29 = vpop.eup %5008  ;;  %5028 = vpow2.f32 %v4067_v11  ;;  %v3204_v35 = vpop.permute.xlu0 %3203 }
 0x1d7   : > { %v6160_v13 = vpop.eup %5010  ;;  %v3577_v18 = vmul.f32 %v3204_v35, %v2713_v60  ;;  %3363 = vperm.xlu0 %4600, %v5001_v20   ;;  %5030 = vpow2.f32 %v4140_v56  ;;  %3723 = vst.msk [vmem:[%s5973_s29 + $0x2b8] sm:$0xff] %vm3635_vm1, %v3578_v45  ;;  %v2645_v56 = vld [vmem:[%s5955_s26 + $0x90] sm:$0xff] }
 0x1d8   : > { %v6163_v52 = vpop.eup %5012  ;;  %5032 = vpow2.f32 %v4139_v37  ;;  %v2859_v6 = vpop.permute.xlu1 %2858  ;;  %v1335_v37 = vadd.f32 %v5872_v14, %v459_v34  ;;  %v2718_v14 = vld [vmem:[%s5955_s26 + $0x2d8] sm:$0xff]  ;;  %v2647_v34 = vld [vmem:[%s5955_s26 + $0xa0] sm:$0xff] }
 0x1d9   : > { %v6168_v10 = vpop.eup %5014  ;;  %3722 = vst.msk [vmem:[%s5973_s29 + $0x2b0] sm:$0xff] %vm3635_vm1, %v3577_v18  ;;  %5034 = vpow2.f32 %v4070_v4  ;;  %v3508_v8 = vmul.f32 %v2859_v6, %v2644_v48  ;;  %3018 = vperm.xlu1 %4601, %v5003_v36   ;;  %v2646_v36 = vld [vmem:[%s5955_s26 + $0x98] sm:$0xff]  ;;  %v462_v18 = vld [vmem:[%s5556_s23 + $0x1e8] sm:$0xff] }
 0x1da   : > { %v6172_v12 = vpop.eup %5016  ;;  %v2854_v31 = vpop.permute.xlu0 %2853  ;;  %5036 = vpow2.f32 %v4069_v61 }
 0x1db   : > { %v5019_v43 = vpop.eup %5018  ;;  %v3507_v42 = vmul.f32 %v2854_v31, %v2643_v24  ;;  %3013 = vperm.xlu0 %4600, %v5005_v32   ;;  %5038 = vpow2.f32 %v4142_v53  ;;  %3653 = vst.msk [vmem:[%s5973_s29 + $0x88] sm:$0xff] %vm3635_vm1, %v3508_v8  ;;  %v2717_v24 = vld [vmem:[%s5955_s26 + $0x2d0] sm:$0xff]  ;;  %v4071_v8 = vmul.f32 -1.442695, %v1335_v37 }
 0x1dc   : > { %v5021_v22 = vpop.eup %5020  ;;  %v2248_v62 = vadd.f32 1.0, %v5019_v43  ;;  %5040 = vpow2.f32 %v4141_v0  ;;  %v3219_v2 = vpop.permute.xlu1 %3218  ;;  %v1700_v0 = vadd.f32 %v5868_v16, %v532_v33  ;;  %v534_v43 = vld [vmem:[%s5556_s23 + $0x428] sm:$0xff] }
 0x1dd   : > { %v5023_v63 = vpop.eup %5022  ;;  %v2247_v40 = vadd.f32 1.0, %v5021_v22  ;;  %3652 = vst.msk [vmem:[%s5973_s29 + $0x80] sm:$0xff] %vm3635_vm1, %v3507_v42  ;;  %5042 = vpow2.f32 %v4072_v55  ;;  %v3580_v20 = vmul.f32 %v3219_v2, %v2716_v5  ;;  %3378 = vperm.xlu1 %4601, %v5007_v49   ;;  %v2648_v2 = vld [vmem:[%s5955_s26 + $0xa8] sm:$0xff] }
 0x1de   : > { %v5025_v19 = vpop.eup %5024  ;;  %5044 = vrcp.f32 %v2248_v62  ;;  %v2320_v7 = vadd.f32 1.0, %v5023_v63  ;;  %v3214_v44 = vpop.permute.xlu0 %3213  ;;  %v1350_v62 = vadd.f32 %v5878_v50, %v462_v18  ;;  %v4144_v50 = vmul.f32 -1.442695, %v1700_v0 }
 0x1df   : > { %v5027_v11 = vpop.eup %5026  ;;  %5046 = vrcp.f32 %v2247_v40  ;;  %v2319_v39 = vadd.f32 1.0, %v5025_v19  ;;  %v3579_v57 = vmul.f32 %v3214_v44, %v2715_v23  ;;  %3373 = vperm.xlu0 %4600, %v5009_v29   ;;  %3725 = vst.msk [vmem:[%s5973_s29 + $0x2c8] sm:$0xff] %vm3635_vm1, %v3580_v20  ;;  %v531_v29 = vld [vmem:[%s5556_s23 + $0x410] sm:$0xff]  ;;  %v533_v23 = vld [vmem:[%s5556_s23 + $0x420] sm:$0xff]  ;;  %v6619_v19 = vld [vmem:[#allocation15_spill] sm:$0xff] }
 0x1e0   : > { %v5029_v9 = vpop.eup %5028  ;;  %5048 = vrcp.f32 %v2320_v7  ;;  %v2250_v27 = vadd.f32 1.0, %v5027_v11  ;;  %v2869_v60 = vpop.permute.xlu1 %2868  ;;  %v1695_v31 = vadd.f32 %v5874_v51, %v531_v29  ;;  %v464_v20 = vld [vmem:[%s5556_s23 + $0x1f8] sm:$0xff]  ;;  %v6620_v11 = vld [vmem:[#allocation16_spill] sm:$0xff]  ;;  %v4074_v33 = vmul.f32 -1.442695, %v1350_v62 }
 0x1e1   : > { %v5031_v47 = vpop.eup %5030  ;;  %5050 = vrcp.f32 %v2319_v39  ;;  %v2249_v32 = vadd.f32 1.0, %v5029_v9  ;;  %3724 = vst.msk [vmem:[%s5973_s29 + $0x2c0] sm:$0xff] %vm3635_vm1, %v3579_v57  ;;  %v3510_v4 = vmul.f32 %v2869_v60, %v2646_v36  ;;  %3028 = vperm.xlu1 %4601, %v6160_v13   ;;  %v461_v13 = vld [vmem:[%s5556_s23 + $0x1e0] sm:$0xff]  ;;  %v1710_v39 = vadd.f32 %v6620_v11, %v534_v43  ;;  %v463_v57 = vld [vmem:[%s5556_s23 + $0x1f0] sm:$0xff] }
 0x1e2   : > { %v5033_v49 = vpop.eup %5032  ;;  %5052 = vrcp.f32 %v2250_v27  ;;  %v2322_v54 = vadd.f32 1.0, %v5031_v47  ;;  %v2864_v21 = vpop.permute.xlu0 %2863  ;;  %v1345_v7 = vadd.f32 %v6619_v19, %v461_v13  ;;  %v6621_v27 = vld [vmem:[#allocation17_spill] sm:$0xff]  ;;  %v466_v13 = vld [vmem:[%s5556_s23 + $0x208] sm:$0xff] }
 0x1e3   : > { %v5035_v45 = vpop.eup %5034  ;;  %5054 = vrcp.f32 %v2249_v32  ;;  %v2321_v35 = vadd.f32 1.0, %v5033_v49  ;;  %v3509_v61 = vmul.f32 %v2864_v21, %v2645_v56  ;;  %3023 = vperm.xlu0 %4600, %v6163_v52   ;;  %3655 = vst.msk [vmem:[%s5973_s29 + $0x98] sm:$0xff] %vm3635_vm1, %v3510_v4  ;;  %v1705_v56 = vadd.f32 %v6621_v27, %v533_v23  ;;  %v536_v47 = vld [vmem:[%s5556_s23 + $0x438] sm:$0xff]  ;;  %v6622_v49 = vld [vmem:[#allocation18_spill] sm:$0xff]  ;;  %v535_v4 = vld [vmem:[%s5556_s23 + $0x430] sm:$0xff] }
 0x1e4   : > { %v5037_v48 = vpop.eup %5036  ;;  %5056 = vrcp.f32 %v2322_v54  ;;  %v2252_v53 = vadd.f32 1.0, %v5035_v45  ;;  %v3229_v52 = vpop.permute.xlu1 %3228  ;;  %v1360_v54 = vadd.f32 %v6622_v49, %v464_v20  ;;  %v4073_v45 = vmul.f32 -1.442695, %v1345_v7  ;;  %v2650_v23 = vld [vmem:[%s5955_s26 + $0xb8] sm:$0xff] }
 0x1e5   : > { %v5039_v6 = vpop.eup %5038  ;;  %5058 = vrcp.f32 %v2321_v35  ;;  %v2251_v55 = vadd.f32 1.0, %v5037_v48  ;;  %3654 = vst.msk [vmem:[%s5973_s29 + $0x90] sm:$0xff] %vm3635_vm1, %v3509_v61  ;;  %v3582_v22 = vmul.f32 %v3229_v52, %v2718_v14  ;;  %3388 = vperm.xlu1 %4601, %v6168_v10   ;;  %v2720_v35 = vld [vmem:[%s5955_s26 + $0x2e8] sm:$0xff]  ;;  %v2719_v48 = vld [vmem:[%s5955_s26 + $0x2e0] sm:$0xff]  ;;  %v6625_v52 = vld [vmem:[#allocation21_spill] sm:$0xff] }
 0x1e6   : > { %v5041_v42 = vpop.eup %5040  ;;  %5060 = vrcp.f32 %v2252_v53  ;;  %v2324_v5 = vadd.f32 1.0, %v5039_v6  ;;  %v3224_v16 = vpop.permute.xlu0 %3223  ;;  %v6623_v61 = vld [vmem:[#allocation19_spill] sm:$0xff]  ;;  %v4146_v53 = vmul.f32 -1.442695, %v1710_v39 }
 0x1e7   : > { %v5043_v63 = vpop.eup %5042  ;;  %5062 = vrcp.f32 %v2251_v55  ;;  %v2323_v40 = vadd.f32 1.0, %v5041_v42  ;;  %v3581_v51 = vmul.f32 %v3224_v16, %v2717_v24  ;;  %3383 = vperm.xlu0 %4600, %v6172_v12   ;;  %3727 = vst.msk [vmem:[%s5973_s29 + $0x2d8] sm:$0xff] %vm3635_vm1, %v3582_v22  ;;  %v4143_v12 = vmul.f32 -1.442695, %v1695_v31  ;;  %v6624_v24 = vld [vmem:[#allocation20_spill] sm:$0xff] }
 0x1e8   : > { %v5045_v44 = vpop.eup %5044  ;;  %5064 = vrcp.f32 %v2324_v5  ;;  %v2254_v10 = vadd.f32 1.0, %v5043_v63  ;;  %v2879_v9 = vpop.permute.xlu1 %2878  ;;  %v1355_v14 = vadd.f32 %v6623_v61, %v463_v57  ;;  %v1720_v0 = vadd.f32 %v6624_v24, %v536_v47  ;;  %v2722_v57 = vld [vmem:[%s5955_s26 + $0x2f8] sm:$0xff] }
 0x1e9   : > { %v5047_v36 = vpop.eup %5046  ;;  %5066 = vrcp.f32 %v2323_v40  ;;  %3726 = vst.msk [vmem:[%s5973_s29 + $0x2d0] sm:$0xff] %vm3635_vm1, %v3581_v51  ;;  %v3512_v60 = vmul.f32 %v2879_v9, %v2648_v2  ;;  %3038 = vperm.xlu1 %4601, %v5045_v44   ;;  %v1715_v31 = vadd.f32 %v6625_v52, %v535_v4  ;;  %v4076_v22 = vmul.f32 -1.442695, %v1360_v54  ;;  %v2649_v2 = vld [vmem:[%s5955_s26 + $0xb0] sm:$0xff]  ;;  %v2724_v52 = vld [vmem:[%s5955_s26 + $0x308] sm:$0xff] }
 0x1ea   : > { %v5049_v32 = vpop.eup %5048  ;;  %5068 = vrcp.f32 %v2254_v10  ;;  %v2874_v37 = vpop.permute.xlu0 %2873  ;;  %v4075_v63 = vmul.f32 -1.442695, %v1355_v14  ;;  %v1370_v40 = vadd.f32 %v5903_v38, %v466_v13  ;;  %v4148_v19 = vmul.f32 -1.442695, %v1720_v0  ;;  %v465_v10 = vld [vmem:[%s5556_s23 + $0x200] sm:$0xff]  ;;  %v2721_v9 = vld [vmem:[%s5955_s26 + $0x2f0] sm:$0xff] }
 0x1eb   : > { %v5051_v21 = vpop.eup %5050  ;;  %5070 = vpow2.f32 %v4071_v8  ;;  %v3511_v29 = vmul.f32 %v2874_v37, %v2647_v34  ;;  %3033 = vperm.xlu0 %4600, %v5047_v36   ;;  %3657 = vst.msk [vmem:[%s5973_s29 + $0xa8] sm:$0xff] %vm3635_vm1, %v3512_v60  ;;  %v4145_v8 = vmul.f32 -1.442695, %v1705_v56  ;;  %v4147_v44 = vmul.f32 -1.442695, %v1715_v31  ;;  %v538_v13 = vld [vmem:[%s5556_s23 + $0x448] sm:$0xff] }
 0x1ec   : > { %v5053_v18 = vpop.eup %5052  ;;  %5072 = vpow2.f32 %v4144_v50  ;;  %v3239_v55 = vpop.permute.xlu1 %3238  ;;  %v4078_v36 = vmul.f32 -1.442695, %v1370_v40  ;;  %v1365_v27 = vadd.f32 %v5908_v3, %v465_v10  ;;  %v537_v31 = vld [vmem:[%s5556_s23 + $0x440] sm:$0xff]  ;;  %v467_v40 = vld [vmem:[%s5556_s23 + $0x210] sm:$0xff]  ;;  %v540_v10 = vld [vmem:[%s5556_s23 + $0x458] sm:$0xff] }
 0x1ed   : > { %v5055_v6 = vpop.eup %5054  ;;  %5074 = vpow2.f32 %v4143_v12  ;;  %3656 = vst.msk [vmem:[%s5973_s29 + $0xa0] sm:$0xff] %vm3635_vm1, %v3511_v29  ;;  %v3584_v42 = vmul.f32 %v3239_v55, %v2720_v35  ;;  %3398 = vperm.xlu1 %4601, %v5049_v32  }
 0x1ee   : > { %v5057_v43 = vpop.eup %5056  ;;  %5076 = vpow2.f32 %v4074_v33  ;;  %v3234_v5 = vpop.permute.xlu0 %3233  ;;  %v4077_v35 = vmul.f32 -1.442695, %v1365_v27  ;;  %v1375_v27 = vadd.f32 %v5931_v26, %v467_v40 }
 0x1ef   : > { %v5059_v16 = vpop.eup %5058  ;;  %5078 = vpow2.f32 %v4073_v45  ;;  %v3583_v62 = vmul.f32 %v3234_v5, %v2719_v48  ;;  %3393 = vperm.xlu0 %4600, %v5051_v21   ;;  %3729 = vst.msk [vmem:[%s5973_s29 + $0x2e8] sm:$0xff] %vm3635_vm1, %v3584_v42  ;;  %v2652_v21 = vld [vmem:[%s5955_s26 + $0xc8] sm:$0xff]  ;;  %v2651_v45 = vld [vmem:[%s5955_s26 + $0xc0] sm:$0xff] }
 0x1f0   : > { %v5061_v51 = vpop.eup %5060  ;;  %5080 = vpow2.f32 %v4146_v53  ;;  %v2889_v20 = vpop.permute.xlu1 %2888  ;;  %v2723_v5 = vld [vmem:[%s5955_s26 + $0x300] sm:$0xff] }
 0x1f1   : > { %v5063_v7 = vpop.eup %5062  ;;  %3728 = vst.msk [vmem:[%s5973_s29 + $0x2e0] sm:$0xff] %vm3635_vm1, %v3583_v62  ;;  %5082 = vpow2.f32 %v4145_v8  ;;  %v3514_v34 = vmul.f32 %v2889_v20, %v2650_v23  ;;  %3048 = vperm.xlu1 %4601, %v5053_v18   ;;  %v6626_v20 = vld [vmem:[#allocation22_spill] sm:$0xff] }
 0x1f2   : > { %v6239_v50 = vpop.eup %5064  ;;  %v2884_v38 = vpop.permute.xlu0 %2883  ;;  %5084 = vpow2.f32 %v4076_v22  ;;  %v468_v22 = vld [vmem:[%s5556_s23 + $0x218] sm:$0xff] }
 0x1f3   : > { %v6241_v11 = vpop.eup %5066  ;;  %v3513_v39 = vmul.f32 %v2884_v38, %v2649_v2  ;;  %3043 = vperm.xlu0 %4600, %v5055_v6   ;;  %5086 = vpow2.f32 %v4075_v63  ;;  %3659 = vst.msk [vmem:[%s5973_s29 + $0xb8] sm:$0xff] %vm3635_vm1, %v3514_v34  ;;  %v1730_v63 = vadd.f32 %v5917_v59, %v538_v13  ;;  %v2654_v59 = vld [vmem:[%s5955_s26 + $0xd8] sm:$0xff] }
 0x1f4   : > { %v6244_v12 = vpop.eup %5068  ;;  %5088 = vpow2.f32 %v4148_v19  ;;  %v3249_v47 = vpop.permute.xlu1 %3248 }
 0x1f5   : > { %v5071_v56 = vpop.eup %5070  ;;  %3658 = vst.msk [vmem:[%s5973_s29 + $0xb0] sm:$0xff] %vm3635_vm1, %v3513_v39  ;;  %5090 = vpow2.f32 %v4147_v44  ;;  %v3586_v37 = vmul.f32 %v3249_v47, %v2722_v57  ;;  %3408 = vperm.xlu1 %4601, %v5057_v43   ;;  %v1725_v44 = vadd.f32 %v6626_v20, %v537_v31  ;;  %v1380_v57 = vadd.f32 %v5928_v1, %v468_v22 }
 0x1f6   : > { %v5073_v32 = vpop.eup %5072  ;;  %v2253_v60 = vadd.f32 1.0, %v5071_v56  ;;  %v3244_v33 = vpop.permute.xlu0 %3243  ;;  %5092 = vpow2.f32 %v4078_v36  ;;  %v539_v36 = vld [vmem:[%s5556_s23 + $0x450] sm:$0xff]  ;;  %v4150_v47 = vmul.f32 -1.442695, %v1730_v63 }
 0x1f7   : > { %v5075_v49 = vpop.eup %5074  ;;  %v2326_v54 = vadd.f32 1.0, %v5073_v32  ;;  %v3585_v4 = vmul.f32 %v3244_v33, %v2721_v9  ;;  %3403 = vperm.xlu0 %4600, %v5059_v16   ;;  %3731 = vst.msk [vmem:[%s5973_s29 + $0x2f8] sm:$0xff] %vm3635_vm1, %v3586_v37  ;;  %v4149_v37 = vmul.f32 -1.442695, %v1725_v44  ;;  %v1735_v26 = vadd.f32 %v5936_v41, %v539_v36  ;;  %v471_v63 = vld [vmem:[%s5556_s23 + $0x230] sm:$0xff]  ;;  %v544_v36 = vld [vmem:[%s5556_s23 + $0x478] sm:$0xff] }
 0x1f8   : > { %v5077_v3 = vpop.eup %5076  ;;  %5094 = vrcp.f32 %v2253_v60  ;;  %v2325_v29 = vadd.f32 1.0, %v5075_v49  ;;  %v2899_v18 = vpop.permute.xlu1 %2898  ;;  %v470_v60 = vld [vmem:[%s5556_s23 + $0x228] sm:$0xff] }
 0x1f9   : > { %v5079_v61 = vpop.eup %5078  ;;  %5096 = vrcp.f32 %v2326_v54  ;;  %v2256_v14 = vadd.f32 1.0, %v5077_v3  ;;  %3730 = vst.msk [vmem:[%s5973_s29 + $0x2f0] sm:$0xff] %vm3635_vm1, %v3585_v4  ;;  %v3516_v24 = vmul.f32 %v2899_v18, %v2652_v21  ;;  %3058 = vperm.xlu1 %4601, %v5061_v51   ;;  %v469_v54 = vld [vmem:[%s5556_s23 + $0x220] sm:$0xff]  ;;  %v2726_v3 = vld [vmem:[%s5955_s26 + $0x318] sm:$0xff]  ;;  %v4151_v13 = vmul.f32 -1.442695, %v1735_v26 }
 0x1fa   : > { %v5081_v48 = vpop.eup %5080  ;;  %5098 = vrcp.f32 %v2325_v29  ;;  %v2255_v53 = vadd.f32 1.0, %v5079_v61  ;;  %v2894_v0 = vpop.permute.xlu0 %2893  ;;  %v542_v61 = vld [vmem:[%s5556_s23 + $0x468] sm:$0xff]  ;;  %v1385_v18 = vadd.f32 %v5942_v28, %v469_v54 }
 0x1fb   : > { %v5083_v6 = vpop.eup %5082  ;;  %v2328_v55 = vadd.f32 1.0, %v5081_v48  ;;  %v3515_v8 = vmul.f32 %v2894_v0, %v2651_v45  ;;  %3053 = vperm.xlu0 %4600, %v5063_v7   ;;  %3661 = vst.msk [vmem:[%s5973_s29 + $0xc8] sm:$0xff] %vm3635_vm1, %v3516_v24  ;;  %5100 = vpow2.f32 %v4077_v35  ;;  %v4079_v45 = vmul.f32 -1.442695, %v1375_v27  ;;  %v2725_v35 = vld [vmem:[%s5955_s26 + $0x310] sm:$0xff]  ;;  %v541_v48 = vld [vmem:[%s5556_s23 + $0x460] sm:$0xff] }
 0x1fc   : > { %v5085_v43 = vpop.eup %5084  ;;  %v2327_v42 = vadd.f32 1.0, %v5083_v6  ;;  %5102 = vrcp.f32 %v2256_v14  ;;  %v3259_v23 = vpop.permute.xlu1 %3258  ;;  %v1750_v28 = vadd.f32 %v5946_v46, %v542_v61  ;;  %v2729_v61 = vld [vmem:[%s5955_s26 + $0x330] sm:$0xff] }
 0x1fd   : > { %v5087_v16 = vpop.eup %5086  ;;  %v2258_v62 = vadd.f32 1.0, %v5085_v43  ;;  %3660 = vst.msk [vmem:[%s5973_s29 + $0xc0] sm:$0xff] %vm3635_vm1, %v3515_v8  ;;  %5104 = vrcp.f32 %v2255_v53  ;;  %v3588_v19 = vmul.f32 %v3259_v23, %v2724_v52  ;;  %3418 = vperm.xlu1 %4601, %v6239_v50   ;;  %v2653_v50 = vld [vmem:[%s5955_s26 + $0xd0] sm:$0xff]  ;;  %v2656_v52 = vld [vmem:[%s5955_s26 + $0xe8] sm:$0xff]  ;;  %v2655_v43 = vld [vmem:[%s5955_s26 + $0xe0] sm:$0xff] }
 0x1fe   : > { %v5089_v51 = vpop.eup %5088  ;;  %v2257_v2 = vadd.f32 1.0, %v5087_v16  ;;  %v3254_v7 = vpop.permute.xlu0 %3253  ;;  %5106 = vrcp.f32 %v2328_v55  ;;  %v4154_v20 = vmul.f32 -1.442695, %v1750_v28  ;;  %v2660_v28 = vld [vmem:[%s5955_s26 + $0x108] sm:$0xff] }
 0x1ff   : > { %v5091_v34 = vpop.eup %5090  ;;  %v2330_v38 = vadd.f32 1.0, %v5089_v51  ;;  %v3587_v39 = vmul.f32 %v3254_v7, %v2723_v5  ;;  %3413 = vperm.xlu0 %4600, %v6241_v11   ;;  %5108 = vrcp.f32 %v2327_v42  ;;  %3733 = vst.msk [vmem:[%s5973_s29 + $0x308] sm:$0xff] %vm3635_vm1, %v3588_v19  ;;  %v1740_v11 = vadd.f32 %v5934_v30, %v540_v10  ;;  %v2728_v7 = vld [vmem:[%s5955_s26 + $0x328] sm:$0xff] }
 0x200   : > { %v2329_v9 = vadd.f32 1.0, %v5091_v34  ;;  %v5093_v56 = vpop.eup %5092  ;;  %5110 = vrcp.f32 %v2258_v62  ;;  %v2909_v32 = vpop.permute.xlu1 %2908  ;;  %v4080_v30 = vmul.f32 -1.442695, %v1380_v57  ;;  %v1745_v5 = vadd.f32 %v5948_v15, %v541_v48  ;;  %v6627_v34 = vld [vmem:[#allocation23_spill] sm:$0xff] }
 0x201   : > { %3732 = vst.msk [vmem:[%s5973_s29 + $0x300] sm:$0xff] %vm3635_vm1, %v3587_v39  ;;  %5112 = vrcp.f32 %v2257_v2  ;;  %v3518_v33 = vmul.f32 %v2909_v32, %v2654_v59  ;;  %3068 = vperm.xlu1 %4601, %v6244_v12   ;;  %v1390_v12 = vadd.f32 %v5940_v25, %v470_v60  ;;  %v4152_v14 = vmul.f32 -1.442695, %v1740_v11  ;;  %v472_v25 = vld [vmem:[%s5556_s23 + $0x238] sm:$0xff] }
 0x202   : > { %v5095_v1 = vpop.eup %5094  ;;  %v2904_v49 = vpop.permute.xlu0 %2903  ;;  %5114 = vrcp.f32 %v2330_v38  ;;  %v2260_v55 = vadd.f32 1.0, %v5093_v56  ;;  %v4081_v62 = vmul.f32 -1.442695, %v1385_v18  ;;  %v1400_v23 = vadd.f32 %v5960_v17, %v472_v25  ;;  %v2727_v17 = vld [vmem:[%s5955_s26 + $0x320] sm:$0xff]  ;;  %v2658_v32 = vld [vmem:[%s5955_s26 + $0xf8] sm:$0xff] }
 0x203   : > { %v5097_v4 = vpop.eup %5096  ;;  %v3517_v21 = vmul.f32 %v2904_v49, %v2653_v50  ;;  %3063 = vperm.xlu0 %4600, %v5095_v1   ;;  %5116 = vrcp.f32 %v2329_v9  ;;  %3663 = vst.msk [vmem:[%s5973_s29 + $0xd8] sm:$0xff] %vm3635_vm1, %v3518_v33  ;;  %v4082_v42 = vmul.f32 -1.442695, %v1390_v12  ;;  %v4153_v10 = vmul.f32 -1.442695, %v1745_v5  ;;  %v2657_v1 = vld [vmem:[%s5955_s26 + $0xf0] sm:$0xff] }
 0x204   : > { %v5099_v29 = vpop.eup %5098  ;;  %5118 = vpow2.f32 %v4150_v47  ;;  %v3269_v41 = vpop.permute.xlu1 %3268  ;;  %v1395_v38 = vadd.f32 %v6627_v34, %v471_v63  ;;  %v4084_v57 = vmul.f32 -1.442695, %v1400_v23  ;;  %v1760_v33 = vadd.f32 %v5979_v58, %v544_v36 }
 0x205   : > { %3662 = vst.msk [vmem:[%s5973_s29 + $0xd0] sm:$0xff] %vm3635_vm1, %v3517_v21  ;;  %v5101_v53 = vpop.eup %5100  ;;  %5120 = vpow2.f32 %v4149_v37  ;;  %v3590_v24 = vmul.f32 %v3269_v41, %v2726_v3  ;;  %3428 = vperm.xlu1 %4601, %v5097_v4  }
 0x206   : > { %v3264_v0 = vpop.permute.xlu0 %3263  ;;  %v5103_v6 = vpop.eup %5102  ;;  %5122 = vpow2.f32 %v4080_v30  ;;  %v2259_v40 = vadd.f32 1.0, %v5101_v53  ;;  %v4083_v37 = vmul.f32 -1.442695, %v1395_v38  ;;  %v4156_v41 = vmul.f32 -1.442695, %v1760_v33 }
 0x207   : > { %v3589_v8 = vmul.f32 %v3264_v0, %v2725_v35  ;;  %3423 = vperm.xlu0 %4600, %v5099_v29   ;;  %v5105_v31 = vpop.eup %5104  ;;  %5124 = vpow2.f32 %v4079_v45  ;;  %3735 = vst.msk [vmem:[%s5973_s29 + $0x318] sm:$0xff] %vm3635_vm1, %v3590_v24  ;;  %v2730_v35 = vld [vmem:[%s5955_s26 + $0x338] sm:$0xff] }
 0x208   : > { %v5107_v22 = vpop.eup %5106  ;;  %5126 = vpow2.f32 %v4152_v14  ;;  %v2919_v16 = vpop.permute.xlu1 %2918  ;;  %v543_v14 = vld [vmem:[%s5556_s23 + $0x470] sm:$0xff] }
 0x209   : > { %3734 = vst.msk [vmem:[%s5973_s29 + $0x310] sm:$0xff] %vm3635_vm1, %v3589_v8  ;;  %v5109_v46 = vpop.eup %5108  ;;  %5128 = vpow2.f32 %v4151_v13  ;;  %v3520_v51 = vmul.f32 %v2919_v16, %v2656_v52  ;;  %3078 = vperm.xlu1 %4601, %v5103_v6   ;;  %v6628_v8 = vld [vmem:[#allocation24_spill] sm:$0xff] }
 0x20a   : > { %v2914_v2 = vpop.permute.xlu0 %2913  ;;  %v5111_v15 = vpop.eup %5110  ;;  %5130 = vrcp.f32 %v2260_v55  ;;  %v1755_v52 = vadd.f32 %v6628_v8, %v543_v14 }
 0x20b   : > { %v3519_v19 = vmul.f32 %v2914_v2, %v2655_v43  ;;  %3073 = vperm.xlu0 %4600, %v5105_v31   ;;  %v5113_v44 = vpop.eup %5112  ;;  %3665 = vst.msk [vmem:[%s5973_s29 + $0xe8] sm:$0xff] %vm3635_vm1, %v3520_v51  ;;  %5132 = vpow2.f32 %v4082_v42  ;;  %v2659_v43 = vld [vmem:[%s5955_s26 + $0x100] sm:$0xff]  ;;  %v2732_v2 = vld [vmem:[%s5955_s26 + $0x348] sm:$0xff] }
 0x20c   : > { %v5115_v39 = vpop.eup %5114  ;;  %5134 = vpow2.f32 %v4081_v62  ;;  %v3279_v59 = vpop.permute.xlu1 %3278 }
 0x20d   : > { %3664 = vst.msk [vmem:[%s5973_s29 + $0xe0] sm:$0xff] %vm3635_vm1, %v3519_v19  ;;  %v5117_v9 = vpop.eup %5116  ;;  %5136 = vrcp.f32 %v2259_v40  ;;  %v3592_v50 = vmul.f32 %v3279_v59, %v2728_v7  ;;  %3438 = vperm.xlu1 %4601, %v5107_v22   ;;  %v4155_v40 = vmul.f32 -1.442695, %v1755_v52  ;;  %v2731_v19 = vld [vmem:[%s5955_s26 + $0x340] sm:$0xff]  ;;  %v2666_v52 = vld [vmem:[%s5955_s26 + $0x138] sm:$0xff] }
 0x20e   : > { %v3274_v27 = vpop.permute.xlu0 %3273  ;;  %v5119_v56 = vpop.eup %5118  ;;  %5138 = vpow2.f32 %v4154_v20 }
 0x20f   : > { %v3591_v47 = vmul.f32 %v3274_v27, %v2727_v17  ;;  %3433 = vperm.xlu0 %4600, %v5109_v46   ;;  %v5121_v11 = vpop.eup %5120  ;;  %v2332_v60 = vadd.f32 1.0, %v5119_v56  ;;  %3737 = vst.msk [vmem:[%s5973_s29 + $0x328] sm:$0xff] %vm3635_vm1, %v3592_v50  ;;  %5140 = vpow2.f32 %v4153_v10 }
 0x210   : > { %v5123_v49 = vpop.eup %5122  ;;  %v2331_v26 = vadd.f32 1.0, %v5121_v11  ;;  %v2929_v54 = vpop.permute.xlu1 %2928  ;;  %5142 = vpow2.f32 %v4084_v57  ;;  %v2662_v57 = vld [vmem:[%s5955_s26 + $0x118] sm:$0xff] }
 0x211   : > { %3736 = vst.msk [vmem:[%s5973_s29 + $0x320] sm:$0xff] %vm3635_vm1, %v3591_v47  ;;  %v5125_v4 = vpop.eup %5124  ;;  %5144 = vrcp.f32 %v2332_v60  ;;  %v2262_v21 = vadd.f32 1.0, %v5123_v49  ;;  %v3522_v30 = vmul.f32 %v2929_v54, %v2658_v32  ;;  %3088 = vperm.xlu1 %4601, %v5111_v15   ;;  %v2733_v49 = vld [vmem:[%s5955_s26 + $0x350] sm:$0xff] }
 0x212   : > { %v2924_v3 = vpop.permute.xlu0 %2923  ;;  %v5127_v29 = vpop.eup %5126  ;;  %5146 = vrcp.f32 %v2331_v26  ;;  %v2261_v58 = vadd.f32 1.0, %v5125_v4 }
 0x213   : > { %v3521_v45 = vmul.f32 %v2924_v3, %v2657_v1  ;;  %3083 = vperm.xlu0 %4600, %v5113_v44   ;;  %v5129_v12 = vpop.eup %5128  ;;  %3667 = vst.msk [vmem:[%s5973_s29 + $0xf8] sm:$0xff] %vm3635_vm1, %v3522_v30  ;;  %5148 = vpow2.f32 %v4083_v37  ;;  %v2334_v48 = vadd.f32 1.0, %v5127_v29  ;;  %v2734_v37 = vld [vmem:[%s5955_s26 + $0x358] sm:$0xff]  ;;  %v2664_v29 = vld [vmem:[%s5955_s26 + $0x128] sm:$0xff] }
 0x214   : > { %v5131_v18 = vpop.eup %5130  ;;  %5150 = vrcp.f32 %v2262_v21  ;;  %v3289_v53 = vpop.permute.xlu1 %3288  ;;  %v2333_v0 = vadd.f32 1.0, %v5129_v12 }
 0x215   : > { %3666 = vst.msk [vmem:[%s5973_s29 + $0xf0] sm:$0xff] %vm3635_vm1, %v3521_v45  ;;  %v5133_v24 = vpop.eup %5132  ;;  %5152 = vrcp.f32 %v2261_v58  ;;  %v3594_v13 = vmul.f32 %v3289_v53, %v2730_v35  ;;  %3448 = vperm.xlu1 %4601, %v5115_v39   ;;  %v2663_v45 = vld [vmem:[%s5955_s26 + $0x120] sm:$0xff]  ;;  %v2736_v53 = vld [vmem:[%s5955_s26 + $0x368] sm:$0xff] }
 0x216   : > { %v3284_v25 = vpop.permute.xlu0 %3283  ;;  %v5135_v6 = vpop.eup %5134  ;;  %5154 = vpow2.f32 %v4156_v41  ;;  %v2264_v5 = vadd.f32 1.0, %v5133_v24 }
 0x217   : > { %v3593_v55 = vmul.f32 %v3284_v25, %v2729_v61  ;;  %3443 = vperm.xlu0 %4600, %v5117_v9   ;;  %v5137_v31 = vpop.eup %5136  ;;  %3739 = vst.msk [vmem:[%s5973_s29 + $0x338] sm:$0xff] %vm3635_vm1, %v3594_v13  ;;  %5156 = vrcp.f32 %v2334_v48  ;;  %v2263_v62 = vadd.f32 1.0, %v5135_v6  ;;  %v2661_v9 = vld [vmem:[%s5955_s26 + $0x110] sm:$0xff] }
 0x218   : > { %v5139_v42 = vpop.eup %5138  ;;  %v2939_v22 = vpop.permute.xlu1 %2938  ;;  %5158 = vrcp.f32 %v2333_v0  ;;  %v2735_v0 = vld [vmem:[%s5955_s26 + $0x360] sm:$0xff] }
 0x219   : > { %3738 = vst.msk [vmem:[%s5973_s29 + $0x330] sm:$0xff] %vm3635_vm1, %v3593_v55  ;;  %v5141_v16 = vpop.eup %5140  ;;  %v3524_v23 = vmul.f32 %v2939_v22, %v2660_v28  ;;  %3098 = vperm.xlu1 %4601, %v5131_v18   ;;  %5160 = vrcp.f32 %v2264_v5  ;;  %v2336_v20 = vadd.f32 1.0, %v5139_v42 }
 0x21a   : > { %v2934_v63 = vpop.permute.xlu0 %2933  ;;  %v5143_v46 = vpop.eup %5142  ;;  %5162 = vrcp.f32 %v2263_v62  ;;  %v2335_v10 = vadd.f32 1.0, %v5141_v16  ;;  %v2738_v62 = vld [vmem:[%s5955_s26 + $0x378] sm:$0xff] }
 0x21b   : > { %v3523_v51 = vmul.f32 %v2934_v63, %v2659_v43  ;;  %3093 = vperm.xlu0 %4600, %v5137_v31   ;;  %v5145_v15 = vpop.eup %5144  ;;  %3669 = vst.msk [vmem:[%s5973_s29 + $0x108] sm:$0xff] %vm3635_vm1, %v3524_v23  ;;  %5164 = vpow2.f32 %v4155_v40  ;;  %v2266_v50 = vadd.f32 1.0, %v5143_v46  ;;  %v2665_v31 = vld [vmem:[%s5955_s26 + $0x130] sm:$0xff] }
 0x21c   : > { %v5147_v7 = vpop.eup %5146  ;;  %v3299_v44 = vpop.permute.xlu1 %3298  ;;  %5166 = vrcp.f32 %v2336_v20  ;;  %v2737_v23 = vld [vmem:[%s5955_s26 + $0x370] sm:$0xff] }
 0x21d   : > { %3668 = vst.msk [vmem:[%s5973_s29 + $0x100] sm:$0xff] %vm3635_vm1, %v3523_v51  ;;  %v5149_v17 = vpop.eup %5148  ;;  %v3596_v34 = vmul.f32 %v3299_v44, %v2732_v2  ;;  %3458 = vperm.xlu1 %4601, %v5145_v15   ;;  %5168 = vrcp.f32 %v2335_v10  ;;  %v2668_v15 = vld [vmem:[%s5955_s26 + $0x148] sm:$0xff] }
 0x21e   : > { %v3294_v38 = vpop.permute.xlu0 %3293  ;;  %v5151_v39 = vpop.eup %5150  ;;  %v2265_v47 = vadd.f32 1.0, %v5149_v17  ;;  %5170 = vrcp.f32 %v2266_v50  ;;  %v2740_v10 = vld [vmem:[%s5955_s26 + $0x388] sm:$0xff] }
 0x21f   : > { %v3595_v59 = vmul.f32 %v3294_v38, %v2731_v19  ;;  %3453 = vperm.xlu0 %4600, %v5147_v7   ;;  %v5153_v36 = vpop.eup %5152  ;;  %3741 = vst.msk [vmem:[%s5973_s29 + $0x348] sm:$0xff] %vm3635_vm1, %v3596_v34  ;;  %v2667_v19 = vld [vmem:[%s5955_s26 + $0x140] sm:$0xff] }
 0x220   : > { %v2949_v27 = vpop.permute.xlu1 %2948  ;;  %v5155_v56 = vpop.eup %5154  ;;  %5172 = vrcp.f32 %v2265_v47  ;;  %v2739_v34 = vld [vmem:[%s5955_s26 + $0x380] sm:$0xff] }
 0x221   : > { %3740 = vst.msk [vmem:[%s5973_s29 + $0x340] sm:$0xff] %vm3635_vm1, %v3595_v59  ;;  %v3526_v32 = vmul.f32 %v2949_v27, %v2662_v57  ;;  %3108 = vperm.xlu1 %4601, %v5151_v39   ;;  %v5157_v60 = vpop.eup %5156  ;;  %v2338_v26 = vadd.f32 1.0, %v5155_v56 }
 0x222   : > { %v2944_v11 = vpop.permute.xlu0 %2943  ;;  %v5159_v33 = vpop.eup %5158 }
 0x223   : > { %v3525_v1 = vmul.f32 %v2944_v11, %v2661_v9  ;;  %3103 = vperm.xlu0 %4600, %v5153_v36   ;;  %3671 = vst.msk [vmem:[%s5973_s29 + $0x118] sm:$0xff] %vm3635_vm1, %v3526_v32  ;;  %v5161_v30 = vpop.eup %5160  ;;  %5174 = vrcp.f32 %v2338_v26  ;;  %v2670_v36 = vld [vmem:[%s5955_s26 + $0x158] sm:$0xff]  ;;  %v2669_v9 = vld [vmem:[%s5955_s26 + $0x150] sm:$0xff]  ;;  %v2671_v26 = vld [vmem:[%s5955_s26 + $0x160] sm:$0xff] }
 0x224   : > { %v3309_v54 = vpop.permute.xlu1 %3308  ;;  %v5163_v58 = vpop.eup %5162  ;;  %v2742_v32 = vld [vmem:[%s5955_s26 + $0x398] sm:$0xff]  ;;  %v2741_v11 = vld [vmem:[%s5955_s26 + $0x390] sm:$0xff] }
 0x225   : > { %3670 = vst.msk [vmem:[%s5973_s29 + $0x110] sm:$0xff] %vm3635_vm1, %v3525_v1  ;;  %v3598_v4 = vmul.f32 %v3309_v54, %v2734_v37  ;;  %3468 = vperm.xlu1 %4601, %v5157_v60   ;;  %v5165_v35 = vpop.eup %5164 }
 0x226   : > { %v3304_v21 = vpop.permute.xlu0 %3303  ;;  %v2337_v61 = vadd.f32 1.0, %v5165_v35  ;;  %v5167_v18 = vpop.eup %5166 }
 0x227   : > { %v3597_v3 = vmul.f32 %v3304_v21, %v2733_v49  ;;  %3463 = vperm.xlu0 %4600, %v5159_v33   ;;  %3743 = vst.msk [vmem:[%s5973_s29 + $0x358] sm:$0xff] %vm3635_vm1, %v3598_v4  ;;  %v5169_v24 = vpop.eup %5168  ;;  %v2672_v49 = vld [vmem:[%s5955_s26 + $0x168] sm:$0xff] }
 0x228   : > { %v2959_v12 = vpop.permute.xlu1 %2958  ;;  %5176 = vrcp.f32 %v2337_v61  ;;  %v5171_v55 = vpop.eup %5170  ;;  %v2674_v61 = vld [vmem:[%s5955_s26 + $0x178] sm:$0xff] }
 0x229   : > { %3742 = vst.msk [vmem:[%s5973_s29 + $0x350] sm:$0xff] %vm3635_vm1, %v3597_v3  ;;  %v3528_v41 = vmul.f32 %v2959_v12, %v2664_v29  ;;  %3118 = vperm.xlu1 %4601, %v5161_v30   ;;  %v2744_v3 = vld [vmem:[%s5955_s26 + $0x3a8] sm:$0xff]  ;;  %v2743_v29 = vld [vmem:[%s5955_s26 + $0x3a0] sm:$0xff] }
 0x22a   : > { %v2954_v14 = vpop.permute.xlu0 %2953  ;;  %v5173_v28 = vpop.eup %5172 }
 0x22b   : > { %v3527_v48 = vmul.f32 %v2954_v14, %v2663_v45  ;;  %3113 = vperm.xlu0 %4600, %v5163_v58   ;;  %3673 = vst.msk [vmem:[%s5973_s29 + $0x128] sm:$0xff] %vm3635_vm1, %v3528_v41  ;;  %v2673_v41 = vld [vmem:[%s5955_s26 + $0x170] sm:$0xff] }
 0x22c   : > { %v3319_v13 = vpop.permute.xlu1 %3318 }
 0x22d   : > { %3672 = vst.msk [vmem:[%s5973_s29 + $0x120] sm:$0xff] %vm3635_vm1, %v3527_v48  ;;  %v3600_v25 = vmul.f32 %v3319_v13, %v2736_v53  ;;  %3478 = vperm.xlu1 %4601, %v5167_v18   ;;  %v5175_v22 = vpop.eup %5174 }
 0x22e   : > { %v3314_v6 = vpop.permute.xlu0 %3313 }
 0x22f   : > { %v3599_v8 = vmul.f32 %v3314_v6, %v2735_v0  ;;  %3473 = vperm.xlu0 %4600, %v5169_v24   ;;  %3745 = vst.msk [vmem:[%s5973_s29 + $0x368] sm:$0xff] %vm3635_vm1, %v3600_v25  ;;  %v2746_v24 = vld [vmem:[%s5955_s26 + $0x3b8] sm:$0xff]  ;;  %v2745_v0 = vld [vmem:[%s5955_s26 + $0x3b0] sm:$0xff] }
 0x230   : > { %v2969_v43 = vpop.permute.xlu1 %2968 }
 0x231   : > { %3744 = vst.msk [vmem:[%s5973_s29 + $0x360] sm:$0xff] %vm3635_vm1, %v3599_v8  ;;  %v3530_v42 = vmul.f32 %v2969_v43, %v2666_v52  ;;  %3128 = vperm.xlu1 %4601, %v5171_v55   ;;  %v2676_v8 = vld [vmem:[%s5955_s26 + $0x188] sm:$0xff]  ;;  %v2675_v52 = vld [vmem:[%s5955_s26 + $0x180] sm:$0xff] }
 0x232   : > { %v2964_v5 = vpop.permute.xlu0 %2963  ;;  %v5177_v46 = vpop.eup %5176 }
 0x233   : > { %v3529_v16 = vmul.f32 %v2964_v5, %v2665_v31  ;;  %3123 = vperm.xlu0 %4600, %v5173_v28   ;;  %3675 = vst.msk [vmem:[%s5973_s29 + $0x138] sm:$0xff] %vm3635_vm1, %v3530_v42  ;;  %v2748_v5 = vld [vmem:[%s5955_s26 + $0x3c8] sm:$0xff] }
 0x234   : > { %v3329_v63 = vpop.permute.xlu1 %3328 }
 0x235   : > { %3674 = vst.msk [vmem:[%s5973_s29 + $0x130] sm:$0xff] %vm3635_vm1, %v3529_v16  ;;  %v3602_v40 = vmul.f32 %v3329_v63, %v2738_v62  ;;  %3488 = vperm.xlu1 %4601, %v5175_v22   ;;  %v2747_v22 = vld [vmem:[%s5955_s26 + $0x3c0] sm:$0xff] }
 0x236   : > { %v3324_v51 = vpop.permute.xlu0 %3323 }
 0x237   : > { %v3601_v2 = vmul.f32 %v3324_v51, %v2737_v23  ;;  %3483 = vperm.xlu0 %4600, %v5177_v46   ;;  %3747 = vst.msk [vmem:[%s5973_s29 + $0x378] sm:$0xff] %vm3635_vm1, %v3602_v40  ;;  %v2678_v46 = vld [vmem:[%s5955_s26 + $0x198] sm:$0xff]  ;;  %v2677_v40 = vld [vmem:[%s5955_s26 + $0x190] sm:$0xff] }
 0x238   : > { %v2979_v7 = vpop.permute.xlu1 %2978 }
 0x239   : > { %3746 = vst.msk [vmem:[%s5973_s29 + $0x370] sm:$0xff] %vm3635_vm1, %v3601_v2  ;;  %v3532_v20 = vmul.f32 %v2979_v7, %v2668_v15  ;;  %v2750_v7 = vld [vmem:[%s5955_s26 + $0x3d8] sm:$0xff] }
 0x23a   : > { %v2974_v44 = vpop.permute.xlu0 %2973 }
 0x23b   : > { %v3531_v17 = vmul.f32 %v2974_v44, %v2667_v19  ;;  %3677 = vst.msk [vmem:[%s5973_s29 + $0x148] sm:$0xff] %vm3635_vm1, %v3532_v20  ;;  %v2749_v20 = vld [vmem:[%s5955_s26 + $0x3d0] sm:$0xff] }
 0x23c   : > { %v3339_v38 = vpop.permute.xlu1 %3338 }
 0x23d   : > { %3676 = vst.msk [vmem:[%s5973_s29 + $0x140] sm:$0xff] %vm3635_vm1, %v3531_v17  ;;  %v3604_v39 = vmul.f32 %v3339_v38, %v2740_v10  ;;  %v2680_v38 = vld [vmem:[%s5955_s26 + $0x1a8] sm:$0xff] }
 0x23e   : > { %v3334_v59 = vpop.permute.xlu0 %3333 }
 0x23f   : > { %v3603_v57 = vmul.f32 %v3334_v59, %v2739_v34  ;;  %3749 = vst.msk [vmem:[%s5973_s29 + $0x388] sm:$0xff] %vm3635_vm1, %v3604_v39  ;;  %v2679_v39 = vld [vmem:[%s5955_s26 + $0x1a0] sm:$0xff] }
 0x240   : > { %v2989_v50 = vpop.permute.xlu1 %2988 }
 0x241   : > { %3748 = vst.msk [vmem:[%s5973_s29 + $0x380] sm:$0xff] %vm3635_vm1, %v3603_v57  ;;  %v3534_v27 = vmul.f32 %v2989_v50, %v2670_v36  ;;  %v2752_v50 = vld [vmem:[%s5955_s26 + $0x3e8] sm:$0xff] }
 0x242   : > { %v2984_v56 = vpop.permute.xlu0 %2983 }
 0x243   : > { %v3533_v47 = vmul.f32 %v2984_v56, %v2669_v9  ;;  %3679 = vst.msk [vmem:[%s5973_s29 + $0x158] sm:$0xff] %vm3635_vm1, %v3534_v27  ;;  %v2751_v27 = vld [vmem:[%s5955_s26 + $0x3e0] sm:$0xff] }
 0x244   : > { %v3349_v60 = vpop.permute.xlu1 %3348 }
 0x245   : > { %3678 = vst.msk [vmem:[%s5973_s29 + $0x150] sm:$0xff] %vm3635_vm1, %v3533_v47  ;;  %v3606_v1 = vmul.f32 %v3349_v60, %v2742_v32  ;;  %v2682_v60 = vld [vmem:[%s5955_s26 + $0x1b8] sm:$0xff] }
 0x246   : > { %v3344_v37 = vpop.permute.xlu0 %3343 }
 0x247   : > { %v3605_v33 = vmul.f32 %v3344_v37, %v2741_v11  ;;  %3751 = vst.msk [vmem:[%s5973_s29 + $0x398] sm:$0xff] %vm3635_vm1, %v3606_v1  ;;  %v2681_v1 = vld [vmem:[%s5955_s26 + $0x1b0] sm:$0xff] }
 0x248   : > { %v2999_v54 = vpop.permute.xlu1 %2998 }
 0x249   : > { %3750 = vst.msk [vmem:[%s5973_s29 + $0x390] sm:$0xff] %vm3635_vm1, %v3605_v33  ;;  %v3536_v4 = vmul.f32 %v2999_v54, %v2672_v49  ;;  %v2754_v54 = vld [vmem:[%s5955_s26 + $0x3f8] sm:$0xff] }
 0x24a   : > { %v2994_v21 = vpop.permute.xlu0 %2993 }
 0x24b   : > { %v3535_v30 = vmul.f32 %v2994_v21, %v2671_v26  ;;  %3681 = vst.msk [vmem:[%s5973_s29 + $0x168] sm:$0xff] %vm3635_vm1, %v3536_v4  ;;  %v2753_v4 = vld [vmem:[%s5955_s26 + $0x3f0] sm:$0xff] }
 0x24c   : > { %v3359_v58 = vpop.permute.xlu1 %3358 }
 0x24d   : > { %3680 = vst.msk [vmem:[%s5973_s29 + $0x160] sm:$0xff] %vm3635_vm1, %v3535_v30  ;;  %v3608_v45 = vmul.f32 %v3359_v58, %v2744_v3  ;;  %v2684_v58 = vld [vmem:[%s5955_s26 + $0x1c8] sm:$0xff] }
 0x24e   : > { %v3354_v35 = vpop.permute.xlu0 %3353 }
 0x24f   : > { %v3607_v12 = vmul.f32 %v3354_v35, %v2743_v29  ;;  %3753 = vst.msk [vmem:[%s5973_s29 + $0x3a8] sm:$0xff] %vm3635_vm1, %v3608_v45  ;;  %v2683_v45 = vld [vmem:[%s5955_s26 + $0x1c0] sm:$0xff] }
 0x250   : > { %v3009_v14 = vpop.permute.xlu1 %3008 }
 0x251   : > { %3752 = vst.msk [vmem:[%s5973_s29 + $0x3a0] sm:$0xff] %vm3635_vm1, %v3607_v12  ;;  %v3538_v18 = vmul.f32 %v3009_v14, %v2674_v61  ;;  %v2756_v14 = vld [vmem:[%s5955_s26 + $0x408] sm:$0xff] }
 0x252   : > { %v3004_v48 = vpop.permute.xlu0 %3003 }
 0x253   : > { %v3537_v53 = vmul.f32 %v3004_v48, %v2673_v41  ;;  %3683 = vst.msk [vmem:[%s5973_s29 + $0x178] sm:$0xff] %vm3635_vm1, %v3538_v18  ;;  %v2755_v18 = vld [vmem:[%s5955_s26 + $0x400] sm:$0xff] }
 0x254   : > { %v3369_v13 = vpop.permute.xlu1 %3368 }
 0x255   : > { %3682 = vst.msk [vmem:[%s5973_s29 + $0x170] sm:$0xff] %vm3635_vm1, %v3537_v53  ;;  %v3610_v25 = vmul.f32 %v3369_v13, %v2746_v24  ;;  %v2686_v13 = vld [vmem:[%s5955_s26 + $0x1d8] sm:$0xff] }
 0x256   : > { %v3364_v6 = vpop.permute.xlu0 %3363 }
 0x257   : > { %v3609_v55 = vmul.f32 %v3364_v6, %v2745_v0  ;;  %3755 = vst.msk [vmem:[%s5973_s29 + $0x3b8] sm:$0xff] %vm3635_vm1, %v3610_v25  ;;  %v2685_v25 = vld [vmem:[%s5955_s26 + $0x1d0] sm:$0xff] }
 0x258   : > { %v3019_v28 = vpop.permute.xlu1 %3018 }
 0x259   : > { %3754 = vst.msk [vmem:[%s5973_s29 + $0x3b0] sm:$0xff] %vm3635_vm1, %v3609_v55  ;;  %v3540_v31 = vmul.f32 %v3019_v28, %v2676_v8  ;;  %v2758_v28 = vld [vmem:[%s5955_s26 + $0x418] sm:$0xff] }
 0x25a   : > { %v3014_v43 = vpop.permute.xlu0 %3013 }
 0x25b   : > { %v3539_v42 = vmul.f32 %v3014_v43, %v2675_v52  ;;  %3685 = vst.msk [vmem:[%s5973_s29 + $0x188] sm:$0xff] %vm3635_vm1, %v3540_v31  ;;  %v2757_v31 = vld [vmem:[%s5955_s26 + $0x410] sm:$0xff] }
 0x25c   : > { %v3379_v16 = vpop.permute.xlu1 %3378 }
 0x25d   : > { %3684 = vst.msk [vmem:[%s5973_s29 + $0x180] sm:$0xff] %vm3635_vm1, %v3539_v42  ;;  %v3612_v62 = vmul.f32 %v3379_v16, %v2748_v5  ;;  %v2688_v16 = vld [vmem:[%s5955_s26 + $0x1e8] sm:$0xff] }
 0x25e   : > { %v3374_v23 = vpop.permute.xlu0 %3373 }
 0x25f   : > { %v3611_v63 = vmul.f32 %v3374_v23, %v2747_v22  ;;  %3757 = vst.msk [vmem:[%s5973_s29 + $0x3c8] sm:$0xff] %vm3635_vm1, %v3612_v62  ;;  %v2687_v62 = vld [vmem:[%s5955_s26 + $0x1e0] sm:$0xff] }
 0x260   : > { %v3029_v51 = vpop.permute.xlu1 %3028 }
 0x261   : > { %3756 = vst.msk [vmem:[%s5973_s29 + $0x3c0] sm:$0xff] %vm3635_vm1, %v3611_v63  ;;  %v3542_v2 = vmul.f32 %v3029_v51, %v2678_v46  ;;  %v2760_v51 = vld [vmem:[%s5955_s26 + $0x428] sm:$0xff] }
 0x262   : > { %v3024_v15 = vpop.permute.xlu0 %3023 }
 0x263   : > { %v3541_v19 = vmul.f32 %v3024_v15, %v2677_v40  ;;  %3687 = vst.msk [vmem:[%s5973_s29 + $0x198] sm:$0xff] %vm3635_vm1, %v3542_v2  ;;  %v2759_v2 = vld [vmem:[%s5955_s26 + $0x420] sm:$0xff] }
 0x264   : > { %v3389_v44 = vpop.permute.xlu1 %3388 }
 0x265   : > { %3686 = vst.msk [vmem:[%s5973_s29 + $0x190] sm:$0xff] %vm3635_vm1, %v3541_v19  ;;  %v3614_v17 = vmul.f32 %v3389_v44, %v2750_v7  ;;  %v2690_v44 = vld [vmem:[%s5955_s26 + $0x1f8] sm:$0xff] }
 0x266   : > { %v3384_v10 = vpop.permute.xlu0 %3383 }
 0x267   : > { %v3613_v34 = vmul.f32 %v3384_v10, %v2749_v20  ;;  %3759 = vst.msk [vmem:[%s5973_s29 + $0x3d8] sm:$0xff] %vm3635_vm1, %v3614_v17  ;;  %v2689_v17 = vld [vmem:[%s5955_s26 + $0x1f0] sm:$0xff] }
 0x268   : > { %v3039_v59 = vpop.permute.xlu1 %3038 }
 0x269   : > { %3758 = vst.msk [vmem:[%s5973_s29 + $0x3d0] sm:$0xff] %vm3635_vm1, %v3613_v34  ;;  %v3544_v57 = vmul.f32 %v3039_v59, %v2680_v38  ;;  %v2762_v59 = vld [vmem:[%s5955_s26 + $0x438] sm:$0xff] }
 0x26a   : > { %v3034_v36 = vpop.permute.xlu0 %3033 }
 0x26b   : > { %v3543_v9 = vmul.f32 %v3034_v36, %v2679_v39  ;;  %3689 = vst.msk [vmem:[%s5973_s29 + $0x1a8] sm:$0xff] %vm3635_vm1, %v3544_v57  ;;  %v2761_v57 = vld [vmem:[%s5955_s26 + $0x430] sm:$0xff] }
 0x26c   : > { %v3399_v56 = vpop.permute.xlu1 %3398 }
 0x26d   : > { %3688 = vst.msk [vmem:[%s5973_s29 + $0x1a0] sm:$0xff] %vm3635_vm1, %v3543_v9  ;;  %v3616_v47 = vmul.f32 %v3399_v56, %v2752_v50  ;;  %v2692_v56 = vld [vmem:[%s5955_s26 + $0x208] sm:$0xff] }
 0x26e   : > { %v3394_v32 = vpop.permute.xlu0 %3393 }
 0x26f   : > { %v3615_v11 = vmul.f32 %v3394_v32, %v2751_v27  ;;  %3761 = vst.msk [vmem:[%s5973_s29 + $0x3e8] sm:$0xff] %vm3635_vm1, %v3616_v47  ;;  %v2691_v47 = vld [vmem:[%s5955_s26 + $0x200] sm:$0xff] }
 0x270   : > { %v3049_v37 = vpop.permute.xlu1 %3048 }
 0x271   : > { %3760 = vst.msk [vmem:[%s5973_s29 + $0x3e0] sm:$0xff] %vm3635_vm1, %v3615_v11  ;;  %v3546_v33 = vmul.f32 %v3049_v37, %v2682_v60  ;;  %v2764_v37 = vld [vmem:[%s5955_s26 + $0x448] sm:$0xff] }
 0x272   : > { %v3044_v49 = vpop.permute.xlu0 %3043 }
 0x273   : > { %v3545_v26 = vmul.f32 %v3044_v49, %v2681_v1  ;;  %3691 = vst.msk [vmem:[%s5973_s29 + $0x1b8] sm:$0xff] %vm3635_vm1, %v3546_v33  ;;  %v2763_v33 = vld [vmem:[%s5955_s26 + $0x440] sm:$0xff] }
 0x274   : > { %v3409_v21 = vpop.permute.xlu1 %3408 }
 0x275   : > { %3690 = vst.msk [vmem:[%s5973_s29 + $0x1b0] sm:$0xff] %vm3635_vm1, %v3545_v26  ;;  %v3618_v30 = vmul.f32 %v3409_v21, %v2754_v54  ;;  %v2694_v21 = vld [vmem:[%s5955_s26 + $0x218] sm:$0xff] }
 0x276   : > { %v3404_v3 = vpop.permute.xlu0 %3403 }
 0x277   : > { %v3617_v29 = vmul.f32 %v3404_v3, %v2753_v4  ;;  %3763 = vst.msk [vmem:[%s5973_s29 + $0x3f8] sm:$0xff] %vm3635_vm1, %v3618_v30  ;;  %v2693_v30 = vld [vmem:[%s5955_s26 + $0x210] sm:$0xff] }
 0x278   : > { %v3059_v35 = vpop.permute.xlu1 %3058 }
 0x279   : > { %3762 = vst.msk [vmem:[%s5973_s29 + $0x3f0] sm:$0xff] %vm3635_vm1, %v3617_v29  ;;  %v3548_v12 = vmul.f32 %v3059_v35, %v2684_v58  ;;  %v2766_v35 = vld [vmem:[%s5955_s26 + $0x458] sm:$0xff] }
 0x27a   : > { %v3054_v61 = vpop.permute.xlu0 %3053 }
 0x27b   : > { %v3547_v41 = vmul.f32 %v3054_v61, %v2683_v45  ;;  %3693 = vst.msk [vmem:[%s5973_s29 + $0x1c8] sm:$0xff] %vm3635_vm1, %v3548_v12  ;;  %v2765_v12 = vld [vmem:[%s5955_s26 + $0x450] sm:$0xff] }
 0x27c   : > { %v3419_v48 = vpop.permute.xlu1 %3418 }
 0x27d   : > { %3692 = vst.msk [vmem:[%s5973_s29 + $0x1c0] sm:$0xff] %vm3635_vm1, %v3547_v41  ;;  %v3620_v53 = vmul.f32 %v3419_v48, %v2756_v14  ;;  %v2696_v48 = vld [vmem:[%s5955_s26 + $0x228] sm:$0xff] }
 0x27e   : > { %v3414_v24 = vpop.permute.xlu0 %3413 }
 0x27f   : > { %v3619_v0 = vmul.f32 %v3414_v24, %v2755_v18  ;;  %3765 = vst.msk [vmem:[%s5973_s29 + $0x408] sm:$0xff] %vm3635_vm1, %v3620_v53  ;;  %v2695_v53 = vld [vmem:[%s5955_s26 + $0x220] sm:$0xff] }
 0x280   : > { %v3069_v6 = vpop.permute.xlu1 %3068 }
 0x281   : > { %3764 = vst.msk [vmem:[%s5973_s29 + $0x400] sm:$0xff] %vm3635_vm1, %v3619_v0  ;;  %v3550_v55 = vmul.f32 %v3069_v6, %v2686_v13  ;;  %v2768_v6 = vld [vmem:[%s5955_s26 + $0x468] sm:$0xff] }
 0x282   : > { %v3064_v8 = vpop.permute.xlu0 %3063 }
 0x283   : > { %v3549_v52 = vmul.f32 %v3064_v8, %v2685_v25  ;;  %3695 = vst.msk [vmem:[%s5973_s29 + $0x1d8] sm:$0xff] %vm3635_vm1, %v3550_v55  ;;  %v2767_v55 = vld [vmem:[%s5955_s26 + $0x460] sm:$0xff] }
 0x284   : > { %v3429_v43 = vpop.permute.xlu1 %3428 }
 0x285   : > { %3694 = vst.msk [vmem:[%s5973_s29 + $0x1d0] sm:$0xff] %vm3635_vm1, %v3549_v52  ;;  %v3622_v42 = vmul.f32 %v3429_v43, %v2758_v28  ;;  %v2698_v43 = vld [vmem:[%s5955_s26 + $0x238] sm:$0xff] }
 0x286   : > { %v3424_v5 = vpop.permute.xlu0 %3423 }
 0x287   : > { %v3621_v22 = vmul.f32 %v3424_v5, %v2757_v31  ;;  %3767 = vst.msk [vmem:[%s5973_s29 + $0x418] sm:$0xff] %vm3635_vm1, %v3622_v42  ;;  %v2697_v42 = vld [vmem:[%s5955_s26 + $0x230] sm:$0xff] }
 0x288   : > { %v3079_v23 = vpop.permute.xlu1 %3078 }
 0x289   : > { %3766 = vst.msk [vmem:[%s5973_s29 + $0x410] sm:$0xff] %vm3635_vm1, %v3621_v22  ;;  %v3552_v63 = vmul.f32 %v3079_v23, %v2688_v16  ;;  %v2770_v23 = vld [vmem:[%s5955_s26 + $0x478] sm:$0xff] }
 0x28a   : > { %v3074_v46 = vpop.permute.xlu0 %3073 }
 0x28b   : > { %v3551_v40 = vmul.f32 %v3074_v46, %v2687_v62  ;;  %3697 = vst.msk [vmem:[%s5973_s29 + $0x1e8] sm:$0xff] %vm3635_vm1, %v3552_v63  ;;  %v2769_v63 = vld [vmem:[%s5955_s26 + $0x470] sm:$0xff] }
 0x28c   : > { %v3439_v15 = vpop.permute.xlu1 %3438 }
 0x28d   : > { %3696 = vst.msk [vmem:[%s5973_s29 + $0x1e0] sm:$0xff] %vm3635_vm1, %v3551_v40  ;;  %v3624_v19 = vmul.f32 %v3439_v15, %v2760_v51 }
 0x28e   : > { %v3434_v7 = vpop.permute.xlu0 %3433 }
 0x28f   : > { %v3623_v20 = vmul.f32 %v3434_v7, %v2759_v2  ;;  %3769 = vst.msk [vmem:[%s5973_s29 + $0x428] sm:$0xff] %vm3635_vm1, %v3624_v19 }
 0x290   : > { %v3089_v10 = vpop.permute.xlu1 %3088 }
 0x291   : > { %3768 = vst.msk [vmem:[%s5973_s29 + $0x420] sm:$0xff] %vm3635_vm1, %v3623_v20  ;;  %v3554_v34 = vmul.f32 %v3089_v10, %v2690_v44 }
 0x292   : > { %v3084_v38 = vpop.permute.xlu0 %3083 }
 0x293   : > { %v3553_v39 = vmul.f32 %v3084_v38, %v2689_v17  ;;  %3699 = vst.msk [vmem:[%s5973_s29 + $0x1f8] sm:$0xff] %vm3635_vm1, %v3554_v34 }
 0x294   : > { %v3449_v36 = vpop.permute.xlu1 %3448 }
 0x295   : > { %3698 = vst.msk [vmem:[%s5973_s29 + $0x1f0] sm:$0xff] %vm3635_vm1, %v3553_v39  ;;  %v3626_v9 = vmul.f32 %v3449_v36, %v2762_v59 }
 0x296   : > { %v3444_v50 = vpop.permute.xlu0 %3443 }
 0x297   : > { %v3625_v27 = vmul.f32 %v3444_v50, %v2761_v57  ;;  %3771 = vst.msk [vmem:[%s5973_s29 + $0x438] sm:$0xff] %vm3635_vm1, %v3626_v9 }
 0x298   : > { %v3099_v32 = vpop.permute.xlu1 %3098 }
 0x299   : > { %3770 = vst.msk [vmem:[%s5973_s29 + $0x430] sm:$0xff] %vm3635_vm1, %v3625_v27  ;;  %v3556_v11 = vmul.f32 %v3099_v32, %v2692_v56 }
 0x29a   : > { %v3094_v60 = vpop.permute.xlu0 %3093 }
 0x29b   : > { %v3555_v1 = vmul.f32 %v3094_v60, %v2691_v47  ;;  %3701 = vst.msk [vmem:[%s5973_s29 + $0x208] sm:$0xff] %vm3635_vm1, %v3556_v11 }
 0x29c   : > { %v3459_v49 = vpop.permute.xlu1 %3458 }
 0x29d   : > { %3700 = vst.msk [vmem:[%s5973_s29 + $0x200] sm:$0xff] %vm3635_vm1, %v3555_v1  ;;  %v3628_v26 = vmul.f32 %v3459_v49, %v2764_v37 }
 0x29e   : > { %v3454_v54 = vpop.permute.xlu0 %3453 }
 0x29f   : > { %v3627_v4 = vmul.f32 %v3454_v54, %v2763_v33  ;;  %3773 = vst.msk [vmem:[%s5973_s29 + $0x448] sm:$0xff] %vm3635_vm1, %v3628_v26 }
 0x2a0   : > { %v3109_v3 = vpop.permute.xlu1 %3108 }
 0x2a1   : > { %3772 = vst.msk [vmem:[%s5973_s29 + $0x440] sm:$0xff] %vm3635_vm1, %v3627_v4  ;;  %v3558_v29 = vmul.f32 %v3109_v3, %v2694_v21 }
 0x2a2   : > { %v3104_v58 = vpop.permute.xlu0 %3103 }
 0x2a3   : > { %v3557_v45 = vmul.f32 %v3104_v58, %v2693_v30  ;;  %3703 = vst.msk [vmem:[%s5973_s29 + $0x218] sm:$0xff] %vm3635_vm1, %v3558_v29 }
 0x2a4   : > { %v3469_v61 = vpop.permute.xlu1 %3468 }
 0x2a5   : > { %3702 = vst.msk [vmem:[%s5973_s29 + $0x210] sm:$0xff] %vm3635_vm1, %v3557_v45  ;;  %v3630_v41 = vmul.f32 %v3469_v61, %v2766_v35 }
 0x2a6   : > { %v3464_v14 = vpop.permute.xlu0 %3463 }
 0x2a7   : > { %v3629_v18 = vmul.f32 %v3464_v14, %v2765_v12  ;;  %3775 = vst.msk [vmem:[%s5973_s29 + $0x458] sm:$0xff] %vm3635_vm1, %v3630_v41 }
 0x2a8   : > { %v3119_v24 = vpop.permute.xlu1 %3118 }
 0x2a9   : > { %3774 = vst.msk [vmem:[%s5973_s29 + $0x450] sm:$0xff] %vm3635_vm1, %v3629_v18  ;;  %v3560_v0 = vmul.f32 %v3119_v24, %v2696_v48 }
 0x2aa   : > { %v3114_v13 = vpop.permute.xlu0 %3113 }
 0x2ab   : > { %v3559_v25 = vmul.f32 %v3114_v13, %v2695_v53  ;;  %3705 = vst.msk [vmem:[%s5973_s29 + $0x228] sm:$0xff] %vm3635_vm1, %v3560_v0 }
 0x2ac   : > { %v3479_v8 = vpop.permute.xlu1 %3478 }
 0x2ad   : > { %3704 = vst.msk [vmem:[%s5973_s29 + $0x220] sm:$0xff] %vm3635_vm1, %v3559_v25  ;;  %v3632_v52 = vmul.f32 %v3479_v8, %v2768_v6 }
 0x2ae   : > { %v3474_v28 = vpop.permute.xlu0 %3473 }
 0x2af   : > { %v3631_v31 = vmul.f32 %v3474_v28, %v2767_v55  ;;  %3777 = vst.msk [vmem:[%s5973_s29 + $0x468] sm:$0xff] %vm3635_vm1, %v3632_v52 }
 0x2b0   : > { %v3129_v5 = vpop.permute.xlu1 %3128 }
 0x2b1   : > { %3776 = vst.msk [vmem:[%s5973_s29 + $0x460] sm:$0xff] %vm3635_vm1, %v3631_v31  ;;  %v3562_v22 = vmul.f32 %v3129_v5, %v2698_v43 }
 0x2b2   : > { %v3124_v16 = vpop.permute.xlu0 %3123 }
 0x2b3   : > { %v3561_v62 = vmul.f32 %v3124_v16, %v2697_v42  ;;  %3707 = vst.msk [vmem:[%s5973_s29 + $0x238] sm:$0xff] %vm3635_vm1, %v3562_v22 }
 0x2b4   : > { %v3489_v46 = vpop.permute.xlu1 %3488 }
 0x2b5   : > { %3706 = vst.msk [vmem:[%s5973_s29 + $0x230] sm:$0xff] %vm3635_vm1, %v3561_v62  ;;  %v3634_v40 = vmul.f32 %v3489_v46, %v2770_v23 }
 0x2b6   : > { %v3484_v51 = vpop.permute.xlu0 %3483 }
 0x2b7   : > { %v3633_v2 = vmul.f32 %v3484_v51, %v2769_v63  ;;  %3779 = vst.msk [vmem:[%s5973_s29 + $0x478] sm:$0xff] %vm3635_vm1, %v3634_v40 }
 0x2b9   : > { %3778 = vst.msk [vmem:[%s5973_s29 + $0x470] sm:$0xff] %vm3635_vm1, %v3633_v2 }
 0x2ba PF: > { %s14_s15 = sadd.s32 1, %s5184_s15  }
 0x2bb   : > { %p11_p4 = scmp.ge.s32.totalorder %s14_s15, 4  }
 0x2bd   :  { %13 = sbr.rel (!%p11_p4) target bundleno = 1 (0x1), region = 72 }

</bundles_post_ra>
